<compile_context>
chip_gen: v7x
topology: tpu7x:2x2x1
jax: 0.10.0
libtpu: 0.0.40
codegen_flags: <defaults>
</compile_context>

<pallas_src>
import functools

import jax
import jax.numpy as jnp
import numpy as np
from jax.experimental import pallas as pl
from jax.experimental.pallas import tpu as pltpu


def _round_up(v, m):
    return ((v + m - 1) // m) * m


# -----------------------------------------------------------------------------
# Kernel 1: fused stride-2 3x3 Conv2d + bias + ReLU (encoder layer).
#
# The wrapper space-to-depths the padded input into
#   z[n, p*Wh + q, (a,b,c)] = xpad[n, 2p+a, 2q+b, c]
# (rows flattened, Wh+1 zero rows appended).  The conv then becomes 4 GEMMs
# over unit-shifted views of z:
#   y[p,q] = z[p,q]W00 + z[p,q+1]W01 + z[p+1,q]W10 + z[p+1,q+1]W11
# with shifts {0, 1, Wh, Wh+1} in flattened row coordinates.  Cells on the
# extra boundary row/col are computed but discarded by the wrapper.
# -----------------------------------------------------------------------------
def _enc_conv_kernel(z_ref, w00_ref, w01_ref, w10_ref, w11_ref, b_ref, o_ref,
                     *, n_rows, shift_w):
    L = n_rows
    acc = jnp.dot(z_ref[0, 0:L, :], w00_ref[...],
                  preferred_element_type=jnp.float32)
    acc += jnp.dot(z_ref[0, 1:L + 1, :], w01_ref[...],
                   preferred_element_type=jnp.float32)
    acc += jnp.dot(z_ref[0, shift_w:L + shift_w, :], w10_ref[...],
                   preferred_element_type=jnp.float32)
    acc += jnp.dot(z_ref[0, shift_w + 1:L + shift_w + 1, :], w11_ref[...],
                   preferred_element_type=jnp.float32)
    acc = jnp.maximum(acc + b_ref[...], 0.0)
    o_ref[0] = acc.astype(o_ref.dtype)


def conv2d_s2(x_nhwc, layer, out_dtype=jnp.bfloat16):
    """Conv2d(k=3, stride=2, pad=1) + bias + ReLU with in-kernel tap fusion."""
    N, H, W, C = x_nhwc.shape
    Ho, Wo = (H - 1) // 2 + 1, (W - 1) // 2 + 1
    Hh, Wh = Ho + 1, Wo + 1
    cp = layer["k4"] // 4            # per-phase (padded) channel count
    Np, cout = layer["npad"], layer["cout"]
    L, Lp = Hh * Wh, Hh * Wh + Wh + 1

    # conv pad (top/left=1) + pad to an even 2Hh x 2Wh grid + channel pad,
    # space-to-depth, flatten rows, append Wh+1 zero rows for the shifts.
    xp = jnp.pad(x_nhwc, ((0, 0), (1, 2 * Hh - H - 1), (1, 2 * Wh - W - 1),
                          (0, cp - C)))
    z = xp.reshape(N, Hh, 2, Wh, 2, cp).transpose(0, 1, 3, 2, 4, 5)
    z = z.reshape(N, L, 4 * cp)
    z = jnp.pad(z, ((0, 0), (0, Wh + 1), (0, 0))).astype(jnp.bfloat16)

    out = pl.pallas_call(
        functools.partial(_enc_conv_kernel, n_rows=L, shift_w=Wh),
        out_shape=jax.ShapeDtypeStruct((N, L, Np), out_dtype),
        grid=(N,),
        in_specs=[
            pl.BlockSpec((1, Lp, 4 * cp), lambda n: (n, 0, 0)),
            pl.BlockSpec((4 * cp, Np), lambda n: (0, 0)),
            pl.BlockSpec((4 * cp, Np), lambda n: (0, 0)),
            pl.BlockSpec((4 * cp, Np), lambda n: (0, 0)),
            pl.BlockSpec((4 * cp, Np), lambda n: (0, 0)),
            pl.BlockSpec((1, Np), lambda n: (0, 0)),
        ],
        out_specs=pl.BlockSpec((1, L, Np), lambda n: (n, 0, 0)),
        compiler_params=pltpu.CompilerParams(
            dimension_semantics=("parallel",)),
    )(z, layer["w00"], layer["w01"], layer["w10"], layer["w11"], layer["b"])

    # drop the boundary row/col and the padded output lanes
    return out.reshape(N, Hh, Wh, Np)[:, :Ho, :Wo, :cout]


# -----------------------------------------------------------------------------
# Kernel 2: fused ConvTranspose2d(k=3, s=2, p=1, op=1) + bias + act (decoder).
# All four sub-pixel phases computed in one kernel from in-kernel shifted views
# of a single flattened input; output is one lane-dense (L, 4*Np) block.
#   p00 = x00 W[1,1]
#   p01 = x00 W[1,2] + x01 W[1,0]
#   p10 = x00 W[2,1] + x10 W[0,1]
#   p11 = x00 W[2,2] + x01 W[2,0] + x10 W[0,2] + x11 W[0,0]
# -----------------------------------------------------------------------------
def _dec_convT_kernel(x_ref, wa_ref, wb_ref, wc_ref, wd_ref, b_ref, o_ref,
                      *, n_rows, shift_w, npad, act):
    L, Np = n_rows, npad
    v00 = x_ref[0, 0:L, :]
    v01 = x_ref[0, 1:L + 1, :]
    v10 = x_ref[0, shift_w:L + shift_w, :]
    v11 = x_ref[0, shift_w + 1:L + shift_w + 1, :]
    a = jnp.dot(v00, wa_ref[...], preferred_element_type=jnp.float32)   # (L, 4Np)
    b = jnp.dot(v01, wb_ref[...], preferred_element_type=jnp.float32)   # (L, 2Np)
    c = jnp.dot(v10, wc_ref[...], preferred_element_type=jnp.float32)   # (L, 2Np)
    d = jnp.dot(v11, wd_ref[...], preferred_element_type=jnp.float32)   # (L, Np)
    p00 = a[:, 0 * Np:1 * Np]
    p01 = a[:, 1 * Np:2 * Np] + b[:, 0:Np]
    p10 = a[:, 2 * Np:3 * Np] + c[:, 0:Np]
    p11 = a[:, 3 * Np:4 * Np] + b[:, Np:2 * Np] + c[:, Np:2 * Np] + d
    out = jnp.concatenate([p00, p01, p10, p11], axis=-1) + b_ref[...]
    if act == "relu":
        out = jnp.maximum(out, 0.0)
    else:
        out = jnp.tanh(out)
    o_ref[0] = out.astype(o_ref.dtype)


def conv_transpose2d_s2(x_nhwc, layer, act, out_dtype):
    N, H, W, Cin = x_nhwc.shape
    Np, cout = layer["npad"], layer["cout"]
    Wq = W + 1
    L, Lp = (H + 1) * Wq, (H + 1) * Wq + Wq + 1

    # pad bottom/right by 1 (so the +1 shifts read zeros), flatten rows,
    # append Wq+1 zero rows for the flattened shift offsets.
    xf = jnp.pad(x_nhwc, ((0, 0), (0, 1), (0, 1), (0, 0))).reshape(N, L, Cin)
    xf = jnp.pad(xf, ((0, 0), (0, Wq + 1), (0, 0))).astype(jnp.bfloat16)

    out = pl.pallas_call(
        functools.partial(_dec_convT_kernel, n_rows=L, shift_w=Wq, npad=Np,
                          act=act),
        out_shape=jax.ShapeDtypeStruct((N, L, 4 * Np), out_dtype),
        grid=(N,),
        in_specs=[
            pl.BlockSpec((1, Lp, Cin), lambda n: (n, 0, 0)),
            pl.BlockSpec((Cin, 4 * Np), lambda n: (0, 0)),
            pl.BlockSpec((Cin, 2 * Np), lambda n: (0, 0)),
            pl.BlockSpec((Cin, 2 * Np), lambda n: (0, 0)),
            pl.BlockSpec((Cin, Np), lambda n: (0, 0)),
            pl.BlockSpec((1, 4 * Np), lambda n: (0, 0)),
        ],
        out_specs=pl.BlockSpec((1, L, 4 * Np), lambda n: (n, 0, 0)),
        compiler_params=pltpu.CompilerParams(
            dimension_semantics=("parallel",)),
    )(xf, layer["wa"], layer["wb"], layer["wc"], layer["wd"], layer["b4"])

    # (N, L, 4Np) -> (N, H+1, W+1, 2, 2, Np): phases [p00|p01|p10|p11] become
    # the (a, b) sub-pixel axes; drop boundary cells and padded lanes, then
    # interleave with one transpose/reshape (no zeros + strided scatter).
    out = out.reshape(N, H + 1, Wq, 2, 2, Np)[:, :H, :W, :, :, :cout]
    return out.transpose(0, 1, 3, 2, 4, 5).reshape(N, 2 * H, 2 * W, cout)


# -----------------------------------------------------------------------------
# One-time weight packing: GEMM form, bf16, Cout padded to a lane-dense 128-mult
# -----------------------------------------------------------------------------
def prepare_params(p):
    prep = {}
    # Encoder Conv2d: weight (Cout, Cin, 3, 3).  For the space-to-depth GEMM,
    # the shift-(dp,dq) weight has a (Cin x Cout) block at z-channel (a, b)
    # equal to conv tap (dy, dx) = (2dp+a, 2dq+b) (zero if outside the 3x3).
    for name in ("enc1", "enc2", "enc3"):
        w, b = p[name + "_w"], p[name + "_b"]
        cout, cin = w.shape[0], w.shape[1]
        npad = _round_up(cout, 128)
        cp = _round_up(cin, 4)                    # K4 = 4*cp is a 16-multiple

        def blk(dy, dx):
            if dy <= 2 and dx <= 2:
                t = jnp.transpose(w[:, :, dy, dx], (1, 0))      # (Cin, Cout)
            else:
                t = jnp.zeros((cin, cout), w.dtype)
            return jnp.pad(t, ((0, cp - cin), (0, npad - cout)))

        ws = {}
        for dp in (0, 1):
            for dq in (0, 1):
                ws[(dp, dq)] = jnp.concatenate(
                    [blk(2 * dp + a, 2 * dq + bb)
                     for a in (0, 1) for bb in (0, 1)],
                    axis=0).astype(jnp.bfloat16)
        prep[name] = dict(
            w00=ws[(0, 0)], w01=ws[(0, 1)], w10=ws[(1, 0)], w11=ws[(1, 1)],
            b=jnp.pad(b, (0, npad - cout)).reshape(1, npad).astype(jnp.float32),
            npad=npad, cout=cout, k4=4 * cp)

    # Decoder ConvTranspose2d: weight (Cin, Cout, 3, 3), W[a,b] = w[:, :, a, b].
    for name in ("dec1", "dec2", "dec3"):
        w, b = p[name + "_w"], p[name + "_b"]
        cin, cout = w.shape[0], w.shape[1]
        npad = _round_up(cout, 128)

        def tap(a, c):
            return jnp.pad(w[:, :, a, c], ((0, 0), (0, npad - cout)))

        prep[name] = dict(
            wa=jnp.concatenate([tap(1, 1), tap(1, 2), tap(2, 1), tap(2, 2)],
                               axis=1).astype(jnp.bfloat16),
            wb=jnp.concatenate([tap(1, 0), tap(2, 0)],
                               axis=1).astype(jnp.bfloat16),
            wc=jnp.concatenate([tap(0, 1), tap(0, 2)],
                               axis=1).astype(jnp.bfloat16),
            wd=tap(0, 0).astype(jnp.bfloat16),
            b4=jnp.tile(jnp.pad(b, (0, npad - cout)), 4)
                .reshape(1, 4 * npad).astype(jnp.float32),
            npad=npad, cout=cout)
    return prep


# -----------------------------------------------------------------------------
# Autoencoder forward (NCHW in / NCHW out, like the PyTorch module)
# -----------------------------------------------------------------------------
def autoencoder_forward(x_nchw, prep):
    x = jnp.transpose(x_nchw, (0, 2, 3, 1))             # NCHW -> NHWC
    x = conv2d_s2(x, prep["enc1"])
    x = conv2d_s2(x, prep["enc2"])
    x = conv2d_s2(x, prep["enc3"])
    x = conv_transpose2d_s2(x, prep["dec1"], "relu", jnp.bfloat16)
    x = conv_transpose2d_s2(x, prep["dec2"], "relu", jnp.bfloat16)
    x = conv_transpose2d_s2(x, prep["dec3"], "tanh", jnp.float32)
    return jnp.transpose(x, (0, 3, 1, 2))               # NHWC -> NCHW


# -----------------------------------------------------------------------------
# Pure-JAX reference (lax.conv_general_dilated, bf16 operands to match the MXU)
# -----------------------------------------------------------------------------
def _ref_conv(x, w_oihw, b, stride, pad):
    w_hwio = jnp.transpose(w_oihw, (2, 3, 1, 0))
    y = jax.lax.conv_general_dilated(
        x.astype(jnp.bfloat16), w_hwio.astype(jnp.bfloat16),
        window_strides=(stride, stride),
        padding=[(pad, pad), (pad, pad)],
        dimension_numbers=("NHWC", "HWIO", "NHWC"),
        preferred_element_type=jnp.float32)
    return y + b


def _ref_convT(x, w_iohw, b, stride, pad, opad, k):
    w_hwio = jnp.transpose(w_iohw[:, :, ::-1, ::-1], (2, 3, 0, 1))
    y = jax.lax.conv_general_dilated(
        x.astype(jnp.bfloat16), w_hwio.astype(jnp.bfloat16),
        window_strides=(1, 1),
        padding=[(k - 1 - pad, k - 1 - pad + opad)] * 2,
        lhs_dilation=(stride, stride),
        dimension_numbers=("NHWC", "HWIO", "NHWC"),
        preferred_element_type=jnp.float32)
    return y + b


def ref_forward(x_nchw, p):
    x = jnp.transpose(x_nchw, (0, 2, 3, 1))
    x = jax.nn.relu(_ref_conv(x, p["enc1_w"], p["enc1_b"], 2, 1))
    x = jax.nn.relu(_ref_conv(x, p["enc2_w"], p["enc2_b"], 2, 1))
    x = jax.nn.relu(_ref_conv(x, p["enc3_w"], p["enc3_b"], 2, 1))
    x = jax.nn.relu(_ref_convT(x, p["dec1_w"], p["dec1_b"], 2, 1, 1, 3))
    x = jax.nn.relu(_ref_convT(x, p["dec2_w"], p["dec2_b"], 2, 1, 1, 3))
    x = jnp.tanh(_ref_convT(x, p["dec3_w"], p["dec3_b"], 2, 1, 1, 3))
    return jnp.transpose(x, (0, 3, 1, 2))


# -----------------------------------------------------------------------------
# Deterministic parameter init (same shapes as the PyTorch module __init__)
# -----------------------------------------------------------------------------
def init_params(key):
    shapes = {
        "enc1_w": (64, 3, 3, 3),    "enc1_b": (64,),     # Conv2d(3,64)
        "enc2_w": (128, 64, 3, 3),  "enc2_b": (128,),    # Conv2d(64,128)
        "enc3_w": (256, 128, 3, 3), "enc3_b": (256,),    # Conv2d(128,256)
        "dec1_w": (256, 128, 3, 3), "dec1_b": (128,),    # ConvT(256,128): (Cin,Cout,kH,kW)
        "dec2_w": (128, 64, 3, 3),  "dec2_b": (64,),     # ConvT(128,64)
        "dec3_w": (64, 3, 3, 3),    "dec3_b": (3,),      # ConvT(64,3)
    }
    params = {}
    keys = jax.random.split(key, len(shapes))
    for k_rng, (name, shp) in zip(keys, sorted(shapes.items())):
        if name.endswith("_w"):
            fan_in = shp[1] * shp[2] * shp[3] if "enc" in name else shp[0] * shp[2] * shp[3]
            params[name] = jax.random.normal(k_rng, shp, jnp.float32) / jnp.sqrt(fan_in)
        else:
            params[name] = 0.01 * jax.random.normal(k_rng, shp, jnp.float32)
    return params


if __name__ == "__main__":
    key = jax.random.PRNGKey(0)
    k_params, k_x = jax.random.split(key)
    params = init_params(k_params)
    prep = prepare_params(params)                        # packed once, reused every call

    # small but forward-consistent input: batch=2, channels=3, spatial=16
    x = jax.random.normal(k_x, (2, 3, 16, 16), jnp.float32)

    fwd = jax.jit(lambda xx: autoencoder_forward(xx, prep))
    y = fwd(x)
    jax.block_until_ready(y)
    assert y.shape == (2, 3, 16, 16), y.shape

    y_ref = jax.jit(lambda xx: ref_forward(xx, params))(x)
    jax.block_until_ready(y_ref)
    # bf16 MXU operands on both sides -> tight-ish tolerance still meaningful
    np.testing.assert_allclose(np.asarray(y), np.asarray(y_ref), atol=2e-2, rtol=2e-2)

    print("KERNEL_OK")
</pallas_src>

<mosaic_0001>
module attributes {stable_mosaic.version = 11 : i64} {
  func.func @_enc_conv_kernel(%arg0: i32, %arg1: memref<1x91x16xbf16, #tpu.memory_space<vmem>>, %arg2: memref<16x128xbf16, #tpu.memory_space<vmem>>, %arg3: memref<16x128xbf16, #tpu.memory_space<vmem>>, %arg4: memref<16x128xbf16, #tpu.memory_space<vmem>>, %arg5: memref<16x128xbf16, #tpu.memory_space<vmem>>, %arg6: memref<1x128xf32, #tpu.memory_space<vmem>>, %arg7: memref<1x81x128xbf16, #tpu.memory_space<vmem>>) attributes {dimension_semantics = [#tpu.dimension_semantics<parallel>], iteration_bounds = array<i64: 2>, scalar_prefetch = 0 : i64, scratch_operands = 0 : i64, tpu.core_type = #tpu.core_type<tc>, window_params = [{transform_indices = @transform_0, window_bounds = array<i64: 1, 91, 16>}, {pipeline_mode = #tpu.pipeline_mode<synchronous>, transform_indices = @transform_1, window_bounds = array<i64: 16, 128>}, {pipeline_mode = #tpu.pipeline_mode<synchronous>, transform_indices = @transform_2, window_bounds = array<i64: 16, 128>}, {pipeline_mode = #tpu.pipeline_mode<synchronous>, transform_indices = @transform_3, window_bounds = array<i64: 16, 128>}, {pipeline_mode = #tpu.pipeline_mode<synchronous>, transform_indices = @transform_4, window_bounds = array<i64: 16, 128>}, {pipeline_mode = #tpu.pipeline_mode<synchronous>, transform_indices = @transform_5, window_bounds = array<i64: 1, 128>}, {transform_indices = @transform_6, window_bounds = array<i64: 1, 81, 128>}]} {
    %c0 = arith.constant 0 : index
    %c0_0 = arith.constant 0 : index
    %c0_1 = arith.constant 0 : index
    %0 = vector.load %arg1[%c0, %c0_0, %c0_1] : memref<1x91x16xbf16, #tpu.memory_space<vmem>>, vector<1x81x16xbf16>
    %1 = vector.shape_cast %0 : vector<1x81x16xbf16> to vector<81x16xbf16>
    %c0_2 = arith.constant 0 : index
    %c0_3 = arith.constant 0 : index
    %2 = vector.load %arg2[%c0_2, %c0_3] : memref<16x128xbf16, #tpu.memory_space<vmem>>, vector<16x128xbf16>
    %cst = arith.constant dense<0.000000e+00> : vector<81x128xf32>
    %3 = tpu.matmul %1, %2, %cst {dimension_numbers = #tpu.dot_dimension_numbers<[1], [0], [0], [1], [0, 0, 1, 1], [], []>} : vector<81x16xbf16>, vector<16x128xbf16>, vector<81x128xf32> -> vector<81x128xf32>
    %c0_4 = arith.constant 0 : index
    %c1 = arith.constant 1 : index
    %c0_5 = arith.constant 0 : index
    %4 = vector.load %arg1[%c0_4, %c1, %c0_5] : memref<1x91x16xbf16, #tpu.memory_space<vmem>>, vector<1x81x16xbf16>
    %5 = vector.shape_cast %4 : vector<1x81x16xbf16> to vector<81x16xbf16>
    %c0_6 = arith.constant 0 : index
    %c0_7 = arith.constant 0 : index
    %6 = vector.load %arg3[%c0_6, %c0_7] : memref<16x128xbf16, #tpu.memory_space<vmem>>, vector<16x128xbf16>
    %cst_8 = arith.constant dense<0.000000e+00> : vector<81x128xf32>
    %7 = tpu.matmul %5, %6, %cst_8 {dimension_numbers = #tpu.dot_dimension_numbers<[1], [0], [0], [1], [0, 0, 1, 1], [], []>} : vector<81x16xbf16>, vector<16x128xbf16>, vector<81x128xf32> -> vector<81x128xf32>
    %8 = arith.addf %3, %7 : vector<81x128xf32>
    %c0_9 = arith.constant 0 : index
    %c9 = arith.constant 9 : index
    %c0_10 = arith.constant 0 : index
    %9 = vector.load %arg1[%c0_9, %c9, %c0_10] : memref<1x91x16xbf16, #tpu.memory_space<vmem>>, vector<1x81x16xbf16>
    %10 = vector.shape_cast %9 : vector<1x81x16xbf16> to vector<81x16xbf16>
    %c0_11 = arith.constant 0 : index
    %c0_12 = arith.constant 0 : index
    %11 = vector.load %arg4[%c0_11, %c0_12] : memref<16x128xbf16, #tpu.memory_space<vmem>>, vector<16x128xbf16>
    %cst_13 = arith.constant dense<0.000000e+00> : vector<81x128xf32>
    %12 = tpu.matmul %10, %11, %cst_13 {dimension_numbers = #tpu.dot_dimension_numbers<[1], [0], [0], [1], [0, 0, 1, 1], [], []>} : vector<81x16xbf16>, vector<16x128xbf16>, vector<81x128xf32> -> vector<81x128xf32>
    %13 = arith.addf %8, %12 : vector<81x128xf32>
    %c0_14 = arith.constant 0 : index
    %c10 = arith.constant 10 : index
    %c0_15 = arith.constant 0 : index
    %14 = vector.load %arg1[%c0_14, %c10, %c0_15] : memref<1x91x16xbf16, #tpu.memory_space<vmem>>, vector<1x81x16xbf16>
    %15 = vector.shape_cast %14 : vector<1x81x16xbf16> to vector<81x16xbf16>
    %c0_16 = arith.constant 0 : index
    %c0_17 = arith.constant 0 : index
    %16 = vector.load %arg5[%c0_16, %c0_17] : memref<16x128xbf16, #tpu.memory_space<vmem>>, vector<16x128xbf16>
    %cst_18 = arith.constant dense<0.000000e+00> : vector<81x128xf32>
    %17 = tpu.matmul %15, %16, %cst_18 {dimension_numbers = #tpu.dot_dimension_numbers<[1], [0], [0], [1], [0, 0, 1, 1], [], []>} : vector<81x16xbf16>, vector<16x128xbf16>, vector<81x128xf32> -> vector<81x128xf32>
    %18 = arith.addf %13, %17 : vector<81x128xf32>
    %c0_19 = arith.constant 0 : index
    %c0_20 = arith.constant 0 : index
    %19 = vector.load %arg6[%c0_19, %c0_20] : memref<1x128xf32, #tpu.memory_space<vmem>>, vector<1x128xf32>
    %20 = vector.broadcast %19 : vector<1x128xf32> to vector<81x128xf32>
    %21 = arith.addf %18, %20 : vector<81x128xf32>
    %cst_21 = arith.constant 0.000000e+00 : f32
    %22 = vector.broadcast %cst_21 : f32 to vector<81x128xf32>
    %23 = arith.maximumf %21, %22 : vector<81x128xf32>
    %24 = arith.truncf %23 : vector<81x128xf32> to vector<81x128xbf16>
    %c0_22 = arith.constant 0 : index
    %c0_23 = arith.constant 0 : index
    %c0_24 = arith.constant 0 : index
    %25 = vector.load %arg7[%c0_22, %c0_23, %c0_24] : memref<1x81x128xbf16, #tpu.memory_space<vmem>>, vector<1x81x128xbf16>
    %26 = vector.shape_cast %25 : vector<1x81x128xbf16> to vector<81x128xbf16>
    %27 = vector.shape_cast %24 : vector<81x128xbf16> to vector<1x81x128xbf16>
    tpu.vector_store %arg7[%c0_22, %c0_23, %c0_24], %27 {strides = array<i32>} : memref<1x81x128xbf16, #tpu.memory_space<vmem>>, vector<1x81x128xbf16>,
    return
  }
  func.func @transform_0(%arg0: i32) -> (i32, i32, i32) {
    %c0_i32 = arith.constant 0 : i32
    %c0_i32_0 = arith.constant 0 : i32
    %c0_i32_1 = arith.constant 0 : i32
    return %arg0, %c0_i32, %c0_i32_0 : i32, i32, i32
  }
  func.func @transform_1(%arg0: i32) -> (i32, i32) {
    %c0_i32 = arith.constant 0 : i32
    %c0_i32_0 = arith.constant 0 : i32
    %c0_i32_1 = arith.constant 0 : i32
    return %c0_i32, %c0_i32_0 : i32, i32
  }
  func.func @transform_2(%arg0: i32) -> (i32, i32) {
    %c0_i32 = arith.constant 0 : i32
    %c0_i32_0 = arith.constant 0 : i32
    %c0_i32_1 = arith.constant 0 : i32
    return %c0_i32, %c0_i32_0 : i32, i32
  }
  func.func @transform_3(%arg0: i32) -> (i32, i32) {
    %c0_i32 = arith.constant 0 : i32
    %c0_i32_0 = arith.constant 0 : i32
    %c0_i32_1 = arith.constant 0 : i32
    return %c0_i32, %c0_i32_0 : i32, i32
  }
  func.func @transform_4(%arg0: i32) -> (i32, i32) {
    %c0_i32 = arith.constant 0 : i32
    %c0_i32_0 = arith.constant 0 : i32
    %c0_i32_1 = arith.constant 0 : i32
    return %c0_i32, %c0_i32_0 : i32, i32
  }
  func.func @transform_5(%arg0: i32) -> (i32, i32) {
    %c0_i32 = arith.constant 0 : i32
    %c0_i32_0 = arith.constant 0 : i32
    %c0_i32_1 = arith.constant 0 : i32
    return %c0_i32, %c0_i32_0 : i32, i32
  }
  func.func @transform_6(%arg0: i32) -> (i32, i32, i32) {
    %c0_i32 = arith.constant 0 : i32
    %c0_i32_0 = arith.constant 0 : i32
    %c0_i32_1 = arith.constant 0 : i32
    return %arg0, %c0_i32, %c0_i32_0 : i32, i32, i32
  }
}

module attributes {stable_mosaic.version = 11 : i64} {
  func.func @_enc_conv_kernel(%arg0: i32, %arg1: memref<1x31x256xbf16, #tpu.memory_space<vmem>>, %arg2: memref<256x128xbf16, #tpu.memory_space<vmem>>, %arg3: memref<256x128xbf16, #tpu.memory_space<vmem>>, %arg4: memref<256x128xbf16, #tpu.memory_space<vmem>>, %arg5: memref<256x128xbf16, #tpu.memory_space<vmem>>, %arg6: memref<1x128xf32, #tpu.memory_space<vmem>>, %arg7: memref<1x25x128xbf16, #tpu.memory_space<vmem>>) attributes {dimension_semantics = [#tpu.dimension_semantics<parallel>], iteration_bounds = array<i64: 2>, scalar_prefetch = 0 : i64, scratch_operands = 0 : i64, tpu.core_type = #tpu.core_type<tc>, window_params = [{transform_indices = @transform_0, window_bounds = array<i64: 1, 31, 256>}, {pipeline_mode = #tpu.pipeline_mode<synchronous>, transform_indices = @transform_1, window_bounds = array<i64: 256, 128>}, {pipeline_mode = #tpu.pipeline_mode<synchronous>, transform_indices = @transform_2, window_bounds = array<i64: 256, 128>}, {pipeline_mode = #tpu.pipeline_mode<synchronous>, transform_indices = @transform_3, window_bounds = array<i64: 256, 128>}, {pipeline_mode = #tpu.pipeline_mode<synchronous>, transform_indices = @transform_4, window_bounds = array<i64: 256, 128>}, {pipeline_mode = #tpu.pipeline_mode<synchronous>, transform_indices = @transform_5, window_bounds = array<i64: 1, 128>}, {transform_indices = @transform_6, window_bounds = array<i64: 1, 25, 128>}]} {
    %c0 = arith.constant 0 : index
    %c0_0 = arith.constant 0 : index
    %c0_1 = arith.constant 0 : index
    %0 = vector.load %arg1[%c0, %c0_0, %c0_1] : memref<1x31x256xbf16, #tpu.memory_space<vmem>>, vector<1x25x256xbf16>
    %1 = vector.shape_cast %0 : vector<1x25x256xbf16> to vector<25x256xbf16>
    %c0_2 = arith.constant 0 : index
    %c0_3 = arith.constant 0 : index
    %2 = vector.load %arg2[%c0_2, %c0_3] : memref<256x128xbf16, #tpu.memory_space<vmem>>, vector<256x128xbf16>
    %cst = arith.constant dense<0.000000e+00> : vector<25x128xf32>
    %3 = tpu.matmul %1, %2, %cst {dimension_numbers = #tpu.dot_dimension_numbers<[1], [0], [0], [1], [0, 0, 1, 1], [], []>} : vector<25x256xbf16>, vector<256x128xbf16>, vector<25x128xf32> -> vector<25x128xf32>
    %c0_4 = arith.constant 0 : index
    %c1 = arith.constant 1 : index
    %c0_5 = arith.constant 0 : index
    %4 = vector.load %arg1[%c0_4, %c1, %c0_5] : memref<1x31x256xbf16, #tpu.memory_space<vmem>>, vector<1x25x256xbf16>
    %5 = vector.shape_cast %4 : vector<1x25x256xbf16> to vector<25x256xbf16>
    %c0_6 = arith.constant 0 : index
    %c0_7 = arith.constant 0 : index
    %6 = vector.load %arg3[%c0_6, %c0_7] : memref<256x128xbf16, #tpu.memory_space<vmem>>, vector<256x128xbf16>
    %cst_8 = arith.constant dense<0.000000e+00> : vector<25x128xf32>
    %7 = tpu.matmul %5, %6, %cst_8 {dimension_numbers = #tpu.dot_dimension_numbers<[1], [0], [0], [1], [0, 0, 1, 1], [], []>} : vector<25x256xbf16>, vector<256x128xbf16>, vector<25x128xf32> -> vector<25x128xf32>
    %8 = arith.addf %3, %7 : vector<25x128xf32>
    %c0_9 = arith.constant 0 : index
    %c5 = arith.constant 5 : index
    %c0_10 = arith.constant 0 : index
    %9 = vector.load %arg1[%c0_9, %c5, %c0_10] : memref<1x31x256xbf16, #tpu.memory_space<vmem>>, vector<1x25x256xbf16>
    %10 = vector.shape_cast %9 : vector<1x25x256xbf16> to vector<25x256xbf16>
    %c0_11 = arith.constant 0 : index
    %c0_12 = arith.constant 0 : index
    %11 = vector.load %arg4[%c0_11, %c0_12] : memref<256x128xbf16, #tpu.memory_space<vmem>>, vector<256x128xbf16>
    %cst_13 = arith.constant dense<0.000000e+00> : vector<25x128xf32>
    %12 = tpu.matmul %10, %11, %cst_13 {dimension_numbers = #tpu.dot_dimension_numbers<[1], [0], [0], [1], [0, 0, 1, 1], [], []>} : vector<25x256xbf16>, vector<256x128xbf16>, vector<25x128xf32> -> vector<25x128xf32>
    %13 = arith.addf %8, %12 : vector<25x128xf32>
    %c0_14 = arith.constant 0 : index
    %c6 = arith.constant 6 : index
    %c0_15 = arith.constant 0 : index
    %14 = vector.load %arg1[%c0_14, %c6, %c0_15] : memref<1x31x256xbf16, #tpu.memory_space<vmem>>, vector<1x25x256xbf16>
    %15 = vector.shape_cast %14 : vector<1x25x256xbf16> to vector<25x256xbf16>
    %c0_16 = arith.constant 0 : index
    %c0_17 = arith.constant 0 : index
    %16 = vector.load %arg5[%c0_16, %c0_17] : memref<256x128xbf16, #tpu.memory_space<vmem>>, vector<256x128xbf16>
    %cst_18 = arith.constant dense<0.000000e+00> : vector<25x128xf32>
    %17 = tpu.matmul %15, %16, %cst_18 {dimension_numbers = #tpu.dot_dimension_numbers<[1], [0], [0], [1], [0, 0, 1, 1], [], []>} : vector<25x256xbf16>, vector<256x128xbf16>, vector<25x128xf32> -> vector<25x128xf32>
    %18 = arith.addf %13, %17 : vector<25x128xf32>
    %c0_19 = arith.constant 0 : index
    %c0_20 = arith.constant 0 : index
    %19 = vector.load %arg6[%c0_19, %c0_20] : memref<1x128xf32, #tpu.memory_space<vmem>>, vector<1x128xf32>
    %20 = vector.broadcast %19 : vector<1x128xf32> to vector<25x128xf32>
    %21 = arith.addf %18, %20 : vector<25x128xf32>
    %cst_21 = arith.constant 0.000000e+00 : f32
    %22 = vector.broadcast %cst_21 : f32 to vector<25x128xf32>
    %23 = arith.maximumf %21, %22 : vector<25x128xf32>
    %24 = arith.truncf %23 : vector<25x128xf32> to vector<25x128xbf16>
    %c0_22 = arith.constant 0 : index
    %c0_23 = arith.constant 0 : index
    %c0_24 = arith.constant 0 : index
    %25 = vector.load %arg7[%c0_22, %c0_23, %c0_24] : memref<1x25x128xbf16, #tpu.memory_space<vmem>>, vector<1x25x128xbf16>
    %26 = vector.shape_cast %25 : vector<1x25x128xbf16> to vector<25x128xbf16>
    %27 = vector.shape_cast %24 : vector<25x128xbf16> to vector<1x25x128xbf16>
    tpu.vector_store %arg7[%c0_22, %c0_23, %c0_24], %27 {strides = array<i32>} : memref<1x25x128xbf16, #tpu.memory_space<vmem>>, vector<1x25x128xbf16>,
    return
  }
  func.func @transform_0(%arg0: i32) -> (i32, i32, i32) {
    %c0_i32 = arith.constant 0 : i32
    %c0_i32_0 = arith.constant 0 : i32
    %c0_i32_1 = arith.constant 0 : i32
    return %arg0, %c0_i32, %c0_i32_0 : i32, i32, i32
  }
  func.func @transform_1(%arg0: i32) -> (i32, i32) {
    %c0_i32 = arith.constant 0 : i32
    %c0_i32_0 = arith.constant 0 : i32
    %c0_i32_1 = arith.constant 0 : i32
    return %c0_i32, %c0_i32_0 : i32, i32
  }
  func.func @transform_2(%arg0: i32) -> (i32, i32) {
    %c0_i32 = arith.constant 0 : i32
    %c0_i32_0 = arith.constant 0 : i32
    %c0_i32_1 = arith.constant 0 : i32
    return %c0_i32, %c0_i32_0 : i32, i32
  }
  func.func @transform_3(%arg0: i32) -> (i32, i32) {
    %c0_i32 = arith.constant 0 : i32
    %c0_i32_0 = arith.constant 0 : i32
    %c0_i32_1 = arith.constant 0 : i32
    return %c0_i32, %c0_i32_0 : i32, i32
  }
  func.func @transform_4(%arg0: i32) -> (i32, i32) {
    %c0_i32 = arith.constant 0 : i32
    %c0_i32_0 = arith.constant 0 : i32
    %c0_i32_1 = arith.constant 0 : i32
    return %c0_i32, %c0_i32_0 : i32, i32
  }
  func.func @transform_5(%arg0: i32) -> (i32, i32) {
    %c0_i32 = arith.constant 0 : i32
    %c0_i32_0 = arith.constant 0 : i32
    %c0_i32_1 = arith.constant 0 : i32
    return %c0_i32, %c0_i32_0 : i32, i32
  }
  func.func @transform_6(%arg0: i32) -> (i32, i32, i32) {
    %c0_i32 = arith.constant 0 : i32
    %c0_i32_0 = arith.constant 0 : i32
    %c0_i32_1 = arith.constant 0 : i32
    return %arg0, %c0_i32, %c0_i32_0 : i32, i32, i32
  }
}

module attributes {stable_mosaic.version = 11 : i64} {
  func.func @_enc_conv_kernel(%arg0: i32, %arg1: memref<1x13x512xbf16, #tpu.memory_space<vmem>>, %arg2: memref<512x256xbf16, #tpu.memory_space<vmem>>, %arg3: memref<512x256xbf16, #tpu.memory_space<vmem>>, %arg4: memref<512x256xbf16, #tpu.memory_space<vmem>>, %arg5: memref<512x256xbf16, #tpu.memory_space<vmem>>, %arg6: memref<1x256xf32, #tpu.memory_space<vmem>>, %arg7: memref<1x9x256xbf16, #tpu.memory_space<vmem>>) attributes {dimension_semantics = [#tpu.dimension_semantics<parallel>], iteration_bounds = array<i64: 2>, scalar_prefetch = 0 : i64, scratch_operands = 0 : i64, tpu.core_type = #tpu.core_type<tc>, window_params = [{transform_indices = @transform_0, window_bounds = array<i64: 1, 13, 512>}, {pipeline_mode = #tpu.pipeline_mode<synchronous>, transform_indices = @transform_1, window_bounds = array<i64: 512, 256>}, {pipeline_mode = #tpu.pipeline_mode<synchronous>, transform_indices = @transform_2, window_bounds = array<i64: 512, 256>}, {pipeline_mode = #tpu.pipeline_mode<synchronous>, transform_indices = @transform_3, window_bounds = array<i64: 512, 256>}, {pipeline_mode = #tpu.pipeline_mode<synchronous>, transform_indices = @transform_4, window_bounds = array<i64: 512, 256>}, {pipeline_mode = #tpu.pipeline_mode<synchronous>, transform_indices = @transform_5, window_bounds = array<i64: 1, 256>}, {transform_indices = @transform_6, window_bounds = array<i64: 1, 9, 256>}]} {
    %c0 = arith.constant 0 : index
    %c0_0 = arith.constant 0 : index
    %c0_1 = arith.constant 0 : index
    %0 = vector.load %arg1[%c0, %c0_0, %c0_1] : memref<1x13x512xbf16, #tpu.memory_space<vmem>>, vector<1x9x512xbf16>
    %1 = vector.shape_cast %0 : vector<1x9x512xbf16> to vector<9x512xbf16>
    %c0_2 = arith.constant 0 : index
    %c0_3 = arith.constant 0 : index
    %2 = vector.load %arg2[%c0_2, %c0_3] : memref<512x256xbf16, #tpu.memory_space<vmem>>, vector<512x256xbf16>
    %cst = arith.constant dense<0.000000e+00> : vector<9x256xf32>
    %3 = tpu.matmul %1, %2, %cst {dimension_numbers = #tpu.dot_dimension_numbers<[1], [0], [0], [1], [0, 0, 1, 1], [], []>} : vector<9x512xbf16>, vector<512x256xbf16>, vector<9x256xf32> -> vector<9x256xf32>
    %c0_4 = arith.constant 0 : index
    %c1 = arith.constant 1 : index
    %c0_5 = arith.constant 0 : index
    %4 = vector.load %arg1[%c0_4, %c1, %c0_5] : memref<1x13x512xbf16, #tpu.memory_space<vmem>>, vector<1x9x512xbf16>
    %5 = vector.shape_cast %4 : vector<1x9x512xbf16> to vector<9x512xbf16>
    %c0_6 = arith.constant 0 : index
    %c0_7 = arith.constant 0 : index
    %6 = vector.load %arg3[%c0_6, %c0_7] : memref<512x256xbf16, #tpu.memory_space<vmem>>, vector<512x256xbf16>
    %cst_8 = arith.constant dense<0.000000e+00> : vector<9x256xf32>
    %7 = tpu.matmul %5, %6, %cst_8 {dimension_numbers = #tpu.dot_dimension_numbers<[1], [0], [0], [1], [0, 0, 1, 1], [], []>} : vector<9x512xbf16>, vector<512x256xbf16>, vector<9x256xf32> -> vector<9x256xf32>
    %8 = arith.addf %3, %7 : vector<9x256xf32>
    %c0_9 = arith.constant 0 : index
    %c3 = arith.constant 3 : index
    %c0_10 = arith.constant 0 : index
    %9 = vector.load %arg1[%c0_9, %c3, %c0_10] : memref<1x13x512xbf16, #tpu.memory_space<vmem>>, vector<1x9x512xbf16>
    %10 = vector.shape_cast %9 : vector<1x9x512xbf16> to vector<9x512xbf16>
    %c0_11 = arith.constant 0 : index
    %c0_12 = arith.constant 0 : index
    %11 = vector.load %arg4[%c0_11, %c0_12] : memref<512x256xbf16, #tpu.memory_space<vmem>>, vector<512x256xbf16>
    %cst_13 = arith.constant dense<0.000000e+00> : vector<9x256xf32>
    %12 = tpu.matmul %10, %11, %cst_13 {dimension_numbers = #tpu.dot_dimension_numbers<[1], [0], [0], [1], [0, 0, 1, 1], [], []>} : vector<9x512xbf16>, vector<512x256xbf16>, vector<9x256xf32> -> vector<9x256xf32>
    %13 = arith.addf %8, %12 : vector<9x256xf32>
    %c0_14 = arith.constant 0 : index
    %c4 = arith.constant 4 : index
    %c0_15 = arith.constant 0 : index
    %14 = vector.load %arg1[%c0_14, %c4, %c0_15] : memref<1x13x512xbf16, #tpu.memory_space<vmem>>, vector<1x9x512xbf16>
    %15 = vector.shape_cast %14 : vector<1x9x512xbf16> to vector<9x512xbf16>
    %c0_16 = arith.constant 0 : index
    %c0_17 = arith.constant 0 : index
    %16 = vector.load %arg5[%c0_16, %c0_17] : memref<512x256xbf16, #tpu.memory_space<vmem>>, vector<512x256xbf16>
    %cst_18 = arith.constant dense<0.000000e+00> : vector<9x256xf32>
    %17 = tpu.matmul %15, %16, %cst_18 {dimension_numbers = #tpu.dot_dimension_numbers<[1], [0], [0], [1], [0, 0, 1, 1], [], []>} : vector<9x512xbf16>, vector<512x256xbf16>, vector<9x256xf32> -> vector<9x256xf32>
    %18 = arith.addf %13, %17 : vector<9x256xf32>
    %c0_19 = arith.constant 0 : index
    %c0_20 = arith.constant 0 : index
    %19 = vector.load %arg6[%c0_19, %c0_20] : memref<1x256xf32, #tpu.memory_space<vmem>>, vector<1x256xf32>
    %20 = vector.broadcast %19 : vector<1x256xf32> to vector<9x256xf32>
    %21 = arith.addf %18, %20 : vector<9x256xf32>
    %cst_21 = arith.constant 0.000000e+00 : f32
    %22 = vector.broadcast %cst_21 : f32 to vector<9x256xf32>
    %23 = arith.maximumf %21, %22 : vector<9x256xf32>
    %24 = arith.truncf %23 : vector<9x256xf32> to vector<9x256xbf16>
    %c0_22 = arith.constant 0 : index
    %c0_23 = arith.constant 0 : index
    %c0_24 = arith.constant 0 : index
    %25 = vector.load %arg7[%c0_22, %c0_23, %c0_24] : memref<1x9x256xbf16, #tpu.memory_space<vmem>>, vector<1x9x256xbf16>
    %26 = vector.shape_cast %25 : vector<1x9x256xbf16> to vector<9x256xbf16>
    %27 = vector.shape_cast %24 : vector<9x256xbf16> to vector<1x9x256xbf16>
    tpu.vector_store %arg7[%c0_22, %c0_23, %c0_24], %27 {strides = array<i32>} : memref<1x9x256xbf16, #tpu.memory_space<vmem>>, vector<1x9x256xbf16>,
    return
  }
  func.func @transform_0(%arg0: i32) -> (i32, i32, i32) {
    %c0_i32 = arith.constant 0 : i32
    %c0_i32_0 = arith.constant 0 : i32
    %c0_i32_1 = arith.constant 0 : i32
    return %arg0, %c0_i32, %c0_i32_0 : i32, i32, i32
  }
  func.func @transform_1(%arg0: i32) -> (i32, i32) {
    %c0_i32 = arith.constant 0 : i32
    %c0_i32_0 = arith.constant 0 : i32
    %c0_i32_1 = arith.constant 0 : i32
    return %c0_i32, %c0_i32_0 : i32, i32
  }
  func.func @transform_2(%arg0: i32) -> (i32, i32) {
    %c0_i32 = arith.constant 0 : i32
    %c0_i32_0 = arith.constant 0 : i32
    %c0_i32_1 = arith.constant 0 : i32
    return %c0_i32, %c0_i32_0 : i32, i32
  }
  func.func @transform_3(%arg0: i32) -> (i32, i32) {
    %c0_i32 = arith.constant 0 : i32
    %c0_i32_0 = arith.constant 0 : i32
    %c0_i32_1 = arith.constant 0 : i32
    return %c0_i32, %c0_i32_0 : i32, i32
  }
  func.func @transform_4(%arg0: i32) -> (i32, i32) {
    %c0_i32 = arith.constant 0 : i32
    %c0_i32_0 = arith.constant 0 : i32
    %c0_i32_1 = arith.constant 0 : i32
    return %c0_i32, %c0_i32_0 : i32, i32
  }
  func.func @transform_5(%arg0: i32) -> (i32, i32) {
    %c0_i32 = arith.constant 0 : i32
    %c0_i32_0 = arith.constant 0 : i32
    %c0_i32_1 = arith.constant 0 : i32
    return %c0_i32, %c0_i32_0 : i32, i32
  }
  func.func @transform_6(%arg0: i32) -> (i32, i32, i32) {
    %c0_i32 = arith.constant 0 : i32
    %c0_i32_0 = arith.constant 0 : i32
    %c0_i32_1 = arith.constant 0 : i32
    return %arg0, %c0_i32, %c0_i32_0 : i32, i32, i32
  }
}

module attributes {stable_mosaic.version = 11 : i64} {
  func.func @_dec_convT_kernel(%arg0: i32, %arg1: memref<1x13x256xbf16, #tpu.memory_space<vmem>>, %arg2: memref<256x512xbf16, #tpu.memory_space<vmem>>, %arg3: memref<256x256xbf16, #tpu.memory_space<vmem>>, %arg4: memref<256x256xbf16, #tpu.memory_space<vmem>>, %arg5: memref<256x128xbf16, #tpu.memory_space<vmem>>, %arg6: memref<1x512xf32, #tpu.memory_space<vmem>>, %arg7: memref<1x9x512xbf16, #tpu.memory_space<vmem>>) attributes {dimension_semantics = [#tpu.dimension_semantics<parallel>], iteration_bounds = array<i64: 2>, scalar_prefetch = 0 : i64, scratch_operands = 0 : i64, tpu.core_type = #tpu.core_type<tc>, window_params = [{transform_indices = @transform_0, window_bounds = array<i64: 1, 13, 256>}, {pipeline_mode = #tpu.pipeline_mode<synchronous>, transform_indices = @transform_1, window_bounds = array<i64: 256, 512>}, {pipeline_mode = #tpu.pipeline_mode<synchronous>, transform_indices = @transform_2, window_bounds = array<i64: 256, 256>}, {pipeline_mode = #tpu.pipeline_mode<synchronous>, transform_indices = @transform_3, window_bounds = array<i64: 256, 256>}, {pipeline_mode = #tpu.pipeline_mode<synchronous>, transform_indices = @transform_4, window_bounds = array<i64: 256, 128>}, {pipeline_mode = #tpu.pipeline_mode<synchronous>, transform_indices = @transform_5, window_bounds = array<i64: 1, 512>}, {transform_indices = @transform_6, window_bounds = array<i64: 1, 9, 512>}]} {
    %c0 = arith.constant 0 : index
    %c0_0 = arith.constant 0 : index
    %c0_1 = arith.constant 0 : index
    %0 = vector.load %arg1[%c0, %c0_0, %c0_1] : memref<1x13x256xbf16, #tpu.memory_space<vmem>>, vector<1x9x256xbf16>
    %1 = vector.shape_cast %0 : vector<1x9x256xbf16> to vector<9x256xbf16>
    %c0_2 = arith.constant 0 : index
    %c1 = arith.constant 1 : index
    %c0_3 = arith.constant 0 : index
    %2 = vector.load %arg1[%c0_2, %c1, %c0_3] : memref<1x13x256xbf16, #tpu.memory_space<vmem>>, vector<1x9x256xbf16>
    %3 = vector.shape_cast %2 : vector<1x9x256xbf16> to vector<9x256xbf16>
    %c0_4 = arith.constant 0 : index
    %c3 = arith.constant 3 : index
    %c0_5 = arith.constant 0 : index
    %4 = vector.load %arg1[%c0_4, %c3, %c0_5] : memref<1x13x256xbf16, #tpu.memory_space<vmem>>, vector<1x9x256xbf16>
    %5 = vector.shape_cast %4 : vector<1x9x256xbf16> to vector<9x256xbf16>
    %c0_6 = arith.constant 0 : index
    %c4 = arith.constant 4 : index
    %c0_7 = arith.constant 0 : index
    %6 = vector.load %arg1[%c0_6, %c4, %c0_7] : memref<1x13x256xbf16, #tpu.memory_space<vmem>>, vector<1x9x256xbf16>
    %7 = vector.shape_cast %6 : vector<1x9x256xbf16> to vector<9x256xbf16>
    %c0_8 = arith.constant 0 : index
    %c0_9 = arith.constant 0 : index
    %8 = vector.load %arg2[%c0_8, %c0_9] : memref<256x512xbf16, #tpu.memory_space<vmem>>, vector<256x512xbf16>
    %cst = arith.constant dense<0.000000e+00> : vector<9x512xf32>
    %9 = tpu.matmul %1, %8, %cst {dimension_numbers = #tpu.dot_dimension_numbers<[1], [0], [0], [1], [0, 0, 1, 1], [], []>} : vector<9x256xbf16>, vector<256x512xbf16>, vector<9x512xf32> -> vector<9x512xf32>
    %c0_10 = arith.constant 0 : index
    %c0_11 = arith.constant 0 : index
    %10 = vector.load %arg3[%c0_10, %c0_11] : memref<256x256xbf16, #tpu.memory_space<vmem>>, vector<256x256xbf16>
    %cst_12 = arith.constant dense<0.000000e+00> : vector<9x256xf32>
    %11 = tpu.matmul %3, %10, %cst_12 {dimension_numbers = #tpu.dot_dimension_numbers<[1], [0], [0], [1], [0, 0, 1, 1], [], []>} : vector<9x256xbf16>, vector<256x256xbf16>, vector<9x256xf32> -> vector<9x256xf32>
    %c0_13 = arith.constant 0 : index
    %c0_14 = arith.constant 0 : index
    %12 = vector.load %arg4[%c0_13, %c0_14] : memref<256x256xbf16, #tpu.memory_space<vmem>>, vector<256x256xbf16>
    %cst_15 = arith.constant dense<0.000000e+00> : vector<9x256xf32>
    %13 = tpu.matmul %5, %12, %cst_15 {dimension_numbers = #tpu.dot_dimension_numbers<[1], [0], [0], [1], [0, 0, 1, 1], [], []>} : vector<9x256xbf16>, vector<256x256xbf16>, vector<9x256xf32> -> vector<9x256xf32>
    %c0_16 = arith.constant 0 : index
    %c0_17 = arith.constant 0 : index
    %14 = vector.load %arg5[%c0_16, %c0_17] : memref<256x128xbf16, #tpu.memory_space<vmem>>, vector<256x128xbf16>
    %cst_18 = arith.constant dense<0.000000e+00> : vector<9x128xf32>
    %15 = tpu.matmul %7, %14, %cst_18 {dimension_numbers = #tpu.dot_dimension_numbers<[1], [0], [0], [1], [0, 0, 1, 1], [], []>} : vector<9x256xbf16>, vector<256x128xbf16>, vector<9x128xf32> -> vector<9x128xf32>
    %16 = vector.extract_strided_slice %9 {offsets = [0, 0], sizes = [9, 128], strides = [1, 1]} : vector<9x512xf32> to vector<9x128xf32>
    %17 = vector.extract_strided_slice %9 {offsets = [0, 128], sizes = [9, 128], strides = [1, 1]} : vector<9x512xf32> to vector<9x128xf32>
    %18 = vector.extract_strided_slice %11 {offsets = [0, 0], sizes = [9, 128], strides = [1, 1]} : vector<9x256xf32> to vector<9x128xf32>
    %19 = arith.addf %17, %18 : vector<9x128xf32>
    %20 = vector.extract_strided_slice %9 {offsets = [0, 256], sizes = [9, 128], strides = [1, 1]} : vector<9x512xf32> to vector<9x128xf32>
    %21 = vector.extract_strided_slice %13 {offsets = [0, 0], sizes = [9, 128], strides = [1, 1]} : vector<9x256xf32> to vector<9x128xf32>
    %22 = arith.addf %20, %21 : vector<9x128xf32>
    %23 = vector.extract_strided_slice %9 {offsets = [0, 384], sizes = [9, 128], strides = [1, 1]} : vector<9x512xf32> to vector<9x128xf32>
    %24 = vector.extract_strided_slice %11 {offsets = [0, 128], sizes = [9, 128], strides = [1, 1]} : vector<9x256xf32> to vector<9x128xf32>
    %25 = arith.addf %23, %24 : vector<9x128xf32>
    %26 = vector.extract_strided_slice %13 {offsets = [0, 128], sizes = [9, 128], strides = [1, 1]} : vector<9x256xf32> to vector<9x128xf32>
    %27 = arith.addf %25, %26 : vector<9x128xf32>
    %28 = arith.addf %27, %15 : vector<9x128xf32>
    %29 = tpu.concatenate %16, %19, %22, %28 in 1 : vector<9x128xf32>, vector<9x128xf32>, vector<9x128xf32>, vector<9x128xf32> -> vector<9x512xf32>
    %c0_19 = arith.constant 0 : index
    %c0_20 = arith.constant 0 : index
    %30 = vector.load %arg6[%c0_19, %c0_20] : memref<1x512xf32, #tpu.memory_space<vmem>>, vector<1x512xf32>
    %31 = vector.broadcast %30 : vector<1x512xf32> to vector<9x512xf32>
    %32 = arith.addf %29, %31 : vector<9x512xf32>
    %cst_21 = arith.constant 0.000000e+00 : f32
    %33 = vector.broadcast %cst_21 : f32 to vector<9x512xf32>
    %34 = arith.maximumf %32, %33 : vector<9x512xf32>
    %35 = arith.truncf %34 : vector<9x512xf32> to vector<9x512xbf16>
    %c0_22 = arith.constant 0 : index
    %c0_23 = arith.constant 0 : index
    %c0_24 = arith.constant 0 : index
    %36 = vector.load %arg7[%c0_22, %c0_23, %c0_24] : memref<1x9x512xbf16, #tpu.memory_space<vmem>>, vector<1x9x512xbf16>
    %37 = vector.shape_cast %36 : vector<1x9x512xbf16> to vector<9x512xbf16>
    %38 = vector.shape_cast %35 : vector<9x512xbf16> to vector<1x9x512xbf16>
    tpu.vector_store %arg7[%c0_22, %c0_23, %c0_24], %38 {strides = array<i32>} : memref<1x9x512xbf16, #tpu.memory_space<vmem>>, vector<1x9x512xbf16>,
    return
  }
  func.func @transform_0(%arg0: i32) -> (i32, i32, i32) {
    %c0_i32 = arith.constant 0 : i32
    %c0_i32_0 = arith.constant 0 : i32
    %c0_i32_1 = arith.constant 0 : i32
    return %arg0, %c0_i32, %c0_i32_0 : i32, i32, i32
  }
  func.func @transform_1(%arg0: i32) -> (i32, i32) {
    %c0_i32 = arith.constant 0 : i32
    %c0_i32_0 = arith.constant 0 : i32
    %c0_i32_1 = arith.constant 0 : i32
    return %c0_i32, %c0_i32_0 : i32, i32
  }
  func.func @transform_2(%arg0: i32) -> (i32, i32) {
    %c0_i32 = arith.constant 0 : i32
    %c0_i32_0 = arith.constant 0 : i32
    %c0_i32_1 = arith.constant 0 : i32
    return %c0_i32, %c0_i32_0 : i32, i32
  }
  func.func @transform_3(%arg0: i32) -> (i32, i32) {
    %c0_i32 = arith.constant 0 : i32
    %c0_i32_0 = arith.constant 0 : i32
    %c0_i32_1 = arith.constant 0 : i32
    return %c0_i32, %c0_i32_0 : i32, i32
  }
  func.func @transform_4(%arg0: i32) -> (i32, i32) {
    %c0_i32 = arith.constant 0 : i32
    %c0_i32_0 = arith.constant 0 : i32
    %c0_i32_1 = arith.constant 0 : i32
    return %c0_i32, %c0_i32_0 : i32, i32
  }
  func.func @transform_5(%arg0: i32) -> (i32, i32) {
    %c0_i32 = arith.constant 0 : i32
    %c0_i32_0 = arith.constant 0 : i32
    %c0_i32_1 = arith.constant 0 : i32
    return %c0_i32, %c0_i32_0 : i32, i32
  }
  func.func @transform_6(%arg0: i32) -> (i32, i32, i32) {
    %c0_i32 = arith.constant 0 : i32
    %c0_i32_0 = arith.constant 0 : i32
    %c0_i32_1 = arith.constant 0 : i32
    return %arg0, %c0_i32, %c0_i32_0 : i32, i32, i32
  }
}

module attributes {stable_mosaic.version = 11 : i64} {
  func.func @_dec_convT_kernel(%arg0: i32, %arg1: memref<1x31x128xbf16, #tpu.memory_space<vmem>>, %arg2: memref<128x512xbf16, #tpu.memory_space<vmem>>, %arg3: memref<128x256xbf16, #tpu.memory_space<vmem>>, %arg4: memref<128x256xbf16, #tpu.memory_space<vmem>>, %arg5: memref<128x128xbf16, #tpu.memory_space<vmem>>, %arg6: memref<1x512xf32, #tpu.memory_space<vmem>>, %arg7: memref<1x25x512xbf16, #tpu.memory_space<vmem>>) attributes {dimension_semantics = [#tpu.dimension_semantics<parallel>], iteration_bounds = array<i64: 2>, scalar_prefetch = 0 : i64, scratch_operands = 0 : i64, tpu.core_type = #tpu.core_type<tc>, window_params = [{transform_indices = @transform_0, window_bounds = array<i64: 1, 31, 128>}, {pipeline_mode = #tpu.pipeline_mode<synchronous>, transform_indices = @transform_1, window_bounds = array<i64: 128, 512>}, {pipeline_mode = #tpu.pipeline_mode<synchronous>, transform_indices = @transform_2, window_bounds = array<i64: 128, 256>}, {pipeline_mode = #tpu.pipeline_mode<synchronous>, transform_indices = @transform_3, window_bounds = array<i64: 128, 256>}, {pipeline_mode = #tpu.pipeline_mode<synchronous>, transform_indices = @transform_4, window_bounds = array<i64: 128, 128>}, {pipeline_mode = #tpu.pipeline_mode<synchronous>, transform_indices = @transform_5, window_bounds = array<i64: 1, 512>}, {transform_indices = @transform_6, window_bounds = array<i64: 1, 25, 512>}]} {
    %c0 = arith.constant 0 : index
    %c0_0 = arith.constant 0 : index
    %c0_1 = arith.constant 0 : index
    %0 = vector.load %arg1[%c0, %c0_0, %c0_1] : memref<1x31x128xbf16, #tpu.memory_space<vmem>>, vector<1x25x128xbf16>
    %1 = vector.shape_cast %0 : vector<1x25x128xbf16> to vector<25x128xbf16>
    %c0_2 = arith.constant 0 : index
    %c1 = arith.constant 1 : index
    %c0_3 = arith.constant 0 : index
    %2 = vector.load %arg1[%c0_2, %c1, %c0_3] : memref<1x31x128xbf16, #tpu.memory_space<vmem>>, vector<1x25x128xbf16>
    %3 = vector.shape_cast %2 : vector<1x25x128xbf16> to vector<25x128xbf16>
    %c0_4 = arith.constant 0 : index
    %c5 = arith.constant 5 : index
    %c0_5 = arith.constant 0 : index
    %4 = vector.load %arg1[%c0_4, %c5, %c0_5] : memref<1x31x128xbf16, #tpu.memory_space<vmem>>, vector<1x25x128xbf16>
    %5 = vector.shape_cast %4 : vector<1x25x128xbf16> to vector<25x128xbf16>
    %c0_6 = arith.constant 0 : index
    %c6 = arith.constant 6 : index
    %c0_7 = arith.constant 0 : index
    %6 = vector.load %arg1[%c0_6, %c6, %c0_7] : memref<1x31x128xbf16, #tpu.memory_space<vmem>>, vector<1x25x128xbf16>
    %7 = vector.shape_cast %6 : vector<1x25x128xbf16> to vector<25x128xbf16>
    %c0_8 = arith.constant 0 : index
    %c0_9 = arith.constant 0 : index
    %8 = vector.load %arg2[%c0_8, %c0_9] : memref<128x512xbf16, #tpu.memory_space<vmem>>, vector<128x512xbf16>
    %cst = arith.constant dense<0.000000e+00> : vector<25x512xf32>
    %9 = tpu.matmul %1, %8, %cst {dimension_numbers = #tpu.dot_dimension_numbers<[1], [0], [0], [1], [0, 0, 1, 1], [], []>} : vector<25x128xbf16>, vector<128x512xbf16>, vector<25x512xf32> -> vector<25x512xf32>
    %c0_10 = arith.constant 0 : index
    %c0_11 = arith.constant 0 : index
    %10 = vector.load %arg3[%c0_10, %c0_11] : memref<128x256xbf16, #tpu.memory_space<vmem>>, vector<128x256xbf16>
    %cst_12 = arith.constant dense<0.000000e+00> : vector<25x256xf32>
    %11 = tpu.matmul %3, %10, %cst_12 {dimension_numbers = #tpu.dot_dimension_numbers<[1], [0], [0], [1], [0, 0, 1, 1], [], []>} : vector<25x128xbf16>, vector<128x256xbf16>, vector<25x256xf32> -> vector<25x256xf32>
    %c0_13 = arith.constant 0 : index
    %c0_14 = arith.constant 0 : index
    %12 = vector.load %arg4[%c0_13, %c0_14] : memref<128x256xbf16, #tpu.memory_space<vmem>>, vector<128x256xbf16>
    %cst_15 = arith.constant dense<0.000000e+00> : vector<25x256xf32>
    %13 = tpu.matmul %5, %12, %cst_15 {dimension_numbers = #tpu.dot_dimension_numbers<[1], [0], [0], [1], [0, 0, 1, 1], [], []>} : vector<25x128xbf16>, vector<128x256xbf16>, vector<25x256xf32> -> vector<25x256xf32>
    %c0_16 = arith.constant 0 : index
    %c0_17 = arith.constant 0 : index
    %14 = vector.load %arg5[%c0_16, %c0_17] : memref<128x128xbf16, #tpu.memory_space<vmem>>, vector<128x128xbf16>
    %cst_18 = arith.constant dense<0.000000e+00> : vector<25x128xf32>
    %15 = tpu.matmul %7, %14, %cst_18 {dimension_numbers = #tpu.dot_dimension_numbers<[1], [0], [0], [1], [0, 0, 1, 1], [], []>} : vector<25x128xbf16>, vector<128x128xbf16>, vector<25x128xf32> -> vector<25x128xf32>
    %16 = vector.extract_strided_slice %9 {offsets = [0, 0], sizes = [25, 128], strides = [1, 1]} : vector<25x512xf32> to vector<25x128xf32>
    %17 = vector.extract_strided_slice %9 {offsets = [0, 128], sizes = [25, 128], strides = [1, 1]} : vector<25x512xf32> to vector<25x128xf32>
    %18 = vector.extract_strided_slice %11 {offsets = [0, 0], sizes = [25, 128], strides = [1, 1]} : vector<25x256xf32> to vector<25x128xf32>
    %19 = arith.addf %17, %18 : vector<25x128xf32>
    %20 = vector.extract_strided_slice %9 {offsets = [0, 256], sizes = [25, 128], strides = [1, 1]} : vector<25x512xf32> to vector<25x128xf32>
    %21 = vector.extract_strided_slice %13 {offsets = [0, 0], sizes = [25, 128], strides = [1, 1]} : vector<25x256xf32> to vector<25x128xf32>
    %22 = arith.addf %20, %21 : vector<25x128xf32>
    %23 = vector.extract_strided_slice %9 {offsets = [0, 384], sizes = [25, 128], strides = [1, 1]} : vector<25x512xf32> to vector<25x128xf32>
    %24 = vector.extract_strided_slice %11 {offsets = [0, 128], sizes = [25, 128], strides = [1, 1]} : vector<25x256xf32> to vector<25x128xf32>
    %25 = arith.addf %23, %24 : vector<25x128xf32>
    %26 = vector.extract_strided_slice %13 {offsets = [0, 128], sizes = [25, 128], strides = [1, 1]} : vector<25x256xf32> to vector<25x128xf32>
    %27 = arith.addf %25, %26 : vector<25x128xf32>
    %28 = arith.addf %27, %15 : vector<25x128xf32>
    %29 = tpu.concatenate %16, %19, %22, %28 in 1 : vector<25x128xf32>, vector<25x128xf32>, vector<25x128xf32>, vector<25x128xf32> -> vector<25x512xf32>
    %c0_19 = arith.constant 0 : index
    %c0_20 = arith.constant 0 : index
    %30 = vector.load %arg6[%c0_19, %c0_20] : memref<1x512xf32, #tpu.memory_space<vmem>>, vector<1x512xf32>
    %31 = vector.broadcast %30 : vector<1x512xf32> to vector<25x512xf32>
    %32 = arith.addf %29, %31 : vector<25x512xf32>
    %cst_21 = arith.constant 0.000000e+00 : f32
    %33 = vector.broadcast %cst_21 : f32 to vector<25x512xf32>
    %34 = arith.maximumf %32, %33 : vector<25x512xf32>
    %35 = arith.truncf %34 : vector<25x512xf32> to vector<25x512xbf16>
    %c0_22 = arith.constant 0 : index
    %c0_23 = arith.constant 0 : index
    %c0_24 = arith.constant 0 : index
    %36 = vector.load %arg7[%c0_22, %c0_23, %c0_24] : memref<1x25x512xbf16, #tpu.memory_space<vmem>>, vector<1x25x512xbf16>
    %37 = vector.shape_cast %36 : vector<1x25x512xbf16> to vector<25x512xbf16>
    %38 = vector.shape_cast %35 : vector<25x512xbf16> to vector<1x25x512xbf16>
    tpu.vector_store %arg7[%c0_22, %c0_23, %c0_24], %38 {strides = array<i32>} : memref<1x25x512xbf16, #tpu.memory_space<vmem>>, vector<1x25x512xbf16>,
    return
  }
  func.func @transform_0(%arg0: i32) -> (i32, i32, i32) {
    %c0_i32 = arith.constant 0 : i32
    %c0_i32_0 = arith.constant 0 : i32
    %c0_i32_1 = arith.constant 0 : i32
    return %arg0, %c0_i32, %c0_i32_0 : i32, i32, i32
  }
  func.func @transform_1(%arg0: i32) -> (i32, i32) {
    %c0_i32 = arith.constant 0 : i32
    %c0_i32_0 = arith.constant 0 : i32
    %c0_i32_1 = arith.constant 0 : i32
    return %c0_i32, %c0_i32_0 : i32, i32
  }
  func.func @transform_2(%arg0: i32) -> (i32, i32) {
    %c0_i32 = arith.constant 0 : i32
    %c0_i32_0 = arith.constant 0 : i32
    %c0_i32_1 = arith.constant 0 : i32
    return %c0_i32, %c0_i32_0 : i32, i32
  }
  func.func @transform_3(%arg0: i32) -> (i32, i32) {
    %c0_i32 = arith.constant 0 : i32
    %c0_i32_0 = arith.constant 0 : i32
    %c0_i32_1 = arith.constant 0 : i32
    return %c0_i32, %c0_i32_0 : i32, i32
  }
  func.func @transform_4(%arg0: i32) -> (i32, i32) {
    %c0_i32 = arith.constant 0 : i32
    %c0_i32_0 = arith.constant 0 : i32
    %c0_i32_1 = arith.constant 0 : i32
    return %c0_i32, %c0_i32_0 : i32, i32
  }
  func.func @transform_5(%arg0: i32) -> (i32, i32) {
    %c0_i32 = arith.constant 0 : i32
    %c0_i32_0 = arith.constant 0 : i32
    %c0_i32_1 = arith.constant 0 : i32
    return %c0_i32, %c0_i32_0 : i32, i32
  }
  func.func @transform_6(%arg0: i32) -> (i32, i32, i32) {
    %c0_i32 = arith.constant 0 : i32
    %c0_i32_0 = arith.constant 0 : i32
    %c0_i32_1 = arith.constant 0 : i32
    return %arg0, %c0_i32, %c0_i32_0 : i32, i32, i32
  }
}

module attributes {stable_mosaic.version = 11 : i64} {
  func.func @_dec_convT_kernel(%arg0: i32, %arg1: memref<1x91x64xbf16, #tpu.memory_space<vmem>>, %arg2: memref<64x512xbf16, #tpu.memory_space<vmem>>, %arg3: memref<64x256xbf16, #tpu.memory_space<vmem>>, %arg4: memref<64x256xbf16, #tpu.memory_space<vmem>>, %arg5: memref<64x128xbf16, #tpu.memory_space<vmem>>, %arg6: memref<1x512xf32, #tpu.memory_space<vmem>>, %arg7: memref<1x81x512xf32, #tpu.memory_space<vmem>>) attributes {dimension_semantics = [#tpu.dimension_semantics<parallel>], iteration_bounds = array<i64: 2>, scalar_prefetch = 0 : i64, scratch_operands = 0 : i64, tpu.core_type = #tpu.core_type<tc>, window_params = [{transform_indices = @transform_0, window_bounds = array<i64: 1, 91, 64>}, {pipeline_mode = #tpu.pipeline_mode<synchronous>, transform_indices = @transform_1, window_bounds = array<i64: 64, 512>}, {pipeline_mode = #tpu.pipeline_mode<synchronous>, transform_indices = @transform_2, window_bounds = array<i64: 64, 256>}, {pipeline_mode = #tpu.pipeline_mode<synchronous>, transform_indices = @transform_3, window_bounds = array<i64: 64, 256>}, {pipeline_mode = #tpu.pipeline_mode<synchronous>, transform_indices = @transform_4, window_bounds = array<i64: 64, 128>}, {pipeline_mode = #tpu.pipeline_mode<synchronous>, transform_indices = @transform_5, window_bounds = array<i64: 1, 512>}, {transform_indices = @transform_6, window_bounds = array<i64: 1, 81, 512>}]} {
    %c0 = arith.constant 0 : index
    %c0_0 = arith.constant 0 : index
    %c0_1 = arith.constant 0 : index
    %0 = vector.load %arg1[%c0, %c0_0, %c0_1] : memref<1x91x64xbf16, #tpu.memory_space<vmem>>, vector<1x81x64xbf16>
    %1 = vector.shape_cast %0 : vector<1x81x64xbf16> to vector<81x64xbf16>
    %c0_2 = arith.constant 0 : index
    %c1 = arith.constant 1 : index
    %c0_3 = arith.constant 0 : index
    %2 = vector.load %arg1[%c0_2, %c1, %c0_3] : memref<1x91x64xbf16, #tpu.memory_space<vmem>>, vector<1x81x64xbf16>
    %3 = vector.shape_cast %2 : vector<1x81x64xbf16> to vector<81x64xbf16>
    %c0_4 = arith.constant 0 : index
    %c9 = arith.constant 9 : index
    %c0_5 = arith.constant 0 : index
    %4 = vector.load %arg1[%c0_4, %c9, %c0_5] : memref<1x91x64xbf16, #tpu.memory_space<vmem>>, vector<1x81x64xbf16>
    %5 = vector.shape_cast %4 : vector<1x81x64xbf16> to vector<81x64xbf16>
    %c0_6 = arith.constant 0 : index
    %c10 = arith.constant 10 : index
    %c0_7 = arith.constant 0 : index
    %6 = vector.load %arg1[%c0_6, %c10, %c0_7] : memref<1x91x64xbf16, #tpu.memory_space<vmem>>, vector<1x81x64xbf16>
    %7 = vector.shape_cast %6 : vector<1x81x64xbf16> to vector<81x64xbf16>
    %c0_8 = arith.constant 0 : index
    %c0_9 = arith.constant 0 : index
    %8 = vector.load %arg2[%c0_8, %c0_9] : memref<64x512xbf16, #tpu.memory_space<vmem>>, vector<64x512xbf16>
    %cst = arith.constant dense<0.000000e+00> : vector<81x512xf32>
    %9 = tpu.matmul %1, %8, %cst {dimension_numbers = #tpu.dot_dimension_numbers<[1], [0], [0], [1], [0, 0, 1, 1], [], []>} : vector<81x64xbf16>, vector<64x512xbf16>, vector<81x512xf32> -> vector<81x512xf32>
    %c0_10 = arith.constant 0 : index
    %c0_11 = arith.constant 0 : index
    %10 = vector.load %arg3[%c0_10, %c0_11] : memref<64x256xbf16, #tpu.memory_space<vmem>>, vector<64x256xbf16>
    %cst_12 = arith.constant dense<0.000000e+00> : vector<81x256xf32>
    %11 = tpu.matmul %3, %10, %cst_12 {dimension_numbers = #tpu.dot_dimension_numbers<[1], [0], [0], [1], [0, 0, 1, 1], [], []>} : vector<81x64xbf16>, vector<64x256xbf16>, vector<81x256xf32> -> vector<81x256xf32>
    %c0_13 = arith.constant 0 : index
    %c0_14 = arith.constant 0 : index
    %12 = vector.load %arg4[%c0_13, %c0_14] : memref<64x256xbf16, #tpu.memory_space<vmem>>, vector<64x256xbf16>
    %cst_15 = arith.constant dense<0.000000e+00> : vector<81x256xf32>
    %13 = tpu.matmul %5, %12, %cst_15 {dimension_numbers = #tpu.dot_dimension_numbers<[1], [0], [0], [1], [0, 0, 1, 1], [], []>} : vector<81x64xbf16>, vector<64x256xbf16>, vector<81x256xf32> -> vector<81x256xf32>
    %c0_16 = arith.constant 0 : index
    %c0_17 = arith.constant 0 : index
    %14 = vector.load %arg5[%c0_16, %c0_17] : memref<64x128xbf16, #tpu.memory_space<vmem>>, vector<64x128xbf16>
    %cst_18 = arith.constant dense<0.000000e+00> : vector<81x128xf32>
    %15 = tpu.matmul %7, %14, %cst_18 {dimension_numbers = #tpu.dot_dimension_numbers<[1], [0], [0], [1], [0, 0, 1, 1], [], []>} : vector<81x64xbf16>, vector<64x128xbf16>, vector<81x128xf32> -> vector<81x128xf32>
    %16 = vector.extract_strided_slice %9 {offsets = [0, 0], sizes = [81, 128], strides = [1, 1]} : vector<81x512xf32> to vector<81x128xf32>
    %17 = vector.extract_strided_slice %9 {offsets = [0, 128], sizes = [81, 128], strides = [1, 1]} : vector<81x512xf32> to vector<81x128xf32>
    %18 = vector.extract_strided_slice %11 {offsets = [0, 0], sizes = [81, 128], strides = [1, 1]} : vector<81x256xf32> to vector<81x128xf32>
    %19 = arith.addf %17, %18 : vector<81x128xf32>
    %20 = vector.extract_strided_slice %9 {offsets = [0, 256], sizes = [81, 128], strides = [1, 1]} : vector<81x512xf32> to vector<81x128xf32>
    %21 = vector.extract_strided_slice %13 {offsets = [0, 0], sizes = [81, 128], strides = [1, 1]} : vector<81x256xf32> to vector<81x128xf32>
    %22 = arith.addf %20, %21 : vector<81x128xf32>
    %23 = vector.extract_strided_slice %9 {offsets = [0, 384], sizes = [81, 128], strides = [1, 1]} : vector<81x512xf32> to vector<81x128xf32>
    %24 = vector.extract_strided_slice %11 {offsets = [0, 128], sizes = [81, 128], strides = [1, 1]} : vector<81x256xf32> to vector<81x128xf32>
    %25 = arith.addf %23, %24 : vector<81x128xf32>
    %26 = vector.extract_strided_slice %13 {offsets = [0, 128], sizes = [81, 128], strides = [1, 1]} : vector<81x256xf32> to vector<81x128xf32>
    %27 = arith.addf %25, %26 : vector<81x128xf32>
    %28 = arith.addf %27, %15 : vector<81x128xf32>
    %29 = tpu.concatenate %16, %19, %22, %28 in 1 : vector<81x128xf32>, vector<81x128xf32>, vector<81x128xf32>, vector<81x128xf32> -> vector<81x512xf32>
    %c0_19 = arith.constant 0 : index
    %c0_20 = arith.constant 0 : index
    %30 = vector.load %arg6[%c0_19, %c0_20] : memref<1x512xf32, #tpu.memory_space<vmem>>, vector<1x512xf32>
    %31 = vector.broadcast %30 : vector<1x512xf32> to vector<81x512xf32>
    %32 = arith.addf %29, %31 : vector<81x512xf32>
    %33 = math.tanh %32 : vector<81x512xf32>
    %c0_21 = arith.constant 0 : index
    %c0_22 = arith.constant 0 : index
    %c0_23 = arith.constant 0 : index
    %34 = vector.load %arg7[%c0_21, %c0_22, %c0_23] : memref<1x81x512xf32, #tpu.memory_space<vmem>>, vector<1x81x512xf32>
    %35 = vector.shape_cast %34 : vector<1x81x512xf32> to vector<81x512xf32>
    %36 = vector.shape_cast %33 : vector<81x512xf32> to vector<1x81x512xf32>
    tpu.vector_store %arg7[%c0_21, %c0_22, %c0_23], %36 {strides = array<i32>} : memref<1x81x512xf32, #tpu.memory_space<vmem>>, vector<1x81x512xf32>,
    return
  }
  func.func @transform_0(%arg0: i32) -> (i32, i32, i32) {
    %c0_i32 = arith.constant 0 : i32
    %c0_i32_0 = arith.constant 0 : i32
    %c0_i32_1 = arith.constant 0 : i32
    return %arg0, %c0_i32, %c0_i32_0 : i32, i32, i32
  }
  func.func @transform_1(%arg0: i32) -> (i32, i32) {
    %c0_i32 = arith.constant 0 : i32
    %c0_i32_0 = arith.constant 0 : i32
    %c0_i32_1 = arith.constant 0 : i32
    return %c0_i32, %c0_i32_0 : i32, i32
  }
  func.func @transform_2(%arg0: i32) -> (i32, i32) {
    %c0_i32 = arith.constant 0 : i32
    %c0_i32_0 = arith.constant 0 : i32
    %c0_i32_1 = arith.constant 0 : i32
    return %c0_i32, %c0_i32_0 : i32, i32
  }
  func.func @transform_3(%arg0: i32) -> (i32, i32) {
    %c0_i32 = arith.constant 0 : i32
    %c0_i32_0 = arith.constant 0 : i32
    %c0_i32_1 = arith.constant 0 : i32
    return %c0_i32, %c0_i32_0 : i32, i32
  }
  func.func @transform_4(%arg0: i32) -> (i32, i32) {
    %c0_i32 = arith.constant 0 : i32
    %c0_i32_0 = arith.constant 0 : i32
    %c0_i32_1 = arith.constant 0 : i32
    return %c0_i32, %c0_i32_0 : i32, i32
  }
  func.func @transform_5(%arg0: i32) -> (i32, i32) {
    %c0_i32 = arith.constant 0 : i32
    %c0_i32_0 = arith.constant 0 : i32
    %c0_i32_1 = arith.constant 0 : i32
    return %c0_i32, %c0_i32_0 : i32, i32
  }
  func.func @transform_6(%arg0: i32) -> (i32, i32, i32) {
    %c0_i32 = arith.constant 0 : i32
    %c0_i32_0 = arith.constant 0 : i32
    %c0_i32_1 = arith.constant 0 : i32
    return %arg0, %c0_i32, %c0_i32_0 : i32, i32, i32
  }
}

</mosaic_0001>

<bundles_post_ra>
// kernel: _lambda_.6
= control target key start
LH: loop header
LB: loop body
LE: loop exit
PB: predicated region body
PF: predicated region fallthrough
CT: control target
= control target key end

     0   :  { %s1312_s21 = smov 0   ;;  %s1478_s0 = inlined_call_operand.vmem [shape: bf16[2,91,16], index: 0, kind: input, shape index: {}]   ;;  %s1479_s1 = inlined_call_operand.vmem [shape: bf16[16,128], index: 1, kind: input, shape index: {}]   ;;  %s1480_s2 = inlined_call_operand.vmem [shape: bf16[16,128], index: 2, kind: input, shape index: {}]   ;;  %s1481_s3 = inlined_call_operand.vmem [shape: bf16[16,128], index: 3, kind: input, shape index: {}]   ;;  %s1482_s4 = inlined_call_operand.vmem [shape: bf16[16,128], index: 4, kind: input, shape index: {}]   ;;  %s1483_s5 = inlined_call_operand.vmem [shape: f32[1,128], index: 5, kind: input, shape index: {}]   ;;  %s1484_s6 = inlined_call_operand.vmem [shape: bf16[2,81,128], index: 6, kind: output, shape index: {}]  }
   0x1 LB: > { %s1030_s22 = sadd.s32 4294967295, %s1275_s21   ;;  %p1034_p0 = scmp.ge.s32.totalorder %s1275_s21, 1  ;;  %s1275_s21 = sphi %s1312_s21, %s16_s21  }
   0x2   : > { %p212_p1 = scmp.lt.s32.totalorder %s1275_s21, 3 }
   0x4   : > { %p213_p2 = pnand %p1034_p0, %p212_p1 }
   0x5   : > { %v1251_v0 = vld [vmem:[%s1480_s2] sm:$0xff] (!%p213_p2)   ;;  %p242_p3 = scmp.lt.s32.totalorder (!%p213_p2), %s1030_s22, 1  ;;  %vm296_vm0 = vsmask.f32 (!%p213_p2), 7424  ;;  %vm349_vm1 = vcmask (!%p213_p2), 130048   ;;  %vm758_vm2 = vcmask (!%p213_p2), 1046528  }
   0x6   : > { %216 = sbr.rel (%p213_p2) target bundleno = 294 (0x126), region = 44  ;;  %v1252_v1 = vld [vmem:[%s1481_s3] sm:$0xff] (!%p213_p2)   ;;  %1161 = vmatprep.subr.bf16.mxu1 (!%p213_p2), %v1251_v0  ;;  %vm969_vm3 = vcmask (!%p213_p2), 1040384   ;;  %vm970_vm4 = vsmask.f32 (!%p213_p2), 256 }
   0x7   : > { %v1255_v2 = vld [vmem:[%s1479_s1] sm:$0xff] (!%p213_p2)   ;;  %1162 = vmatpush3.bf16.msra.mxu1 (!%p213_p2), %v1251_v0  ;;  %1189 = vmatprep.subr.bf16.mxu0 (!%p213_p2), %v1252_v1  ;;  %vm971_vm5 = vmand (!%p213_p2), %vm969_vm3, %vm970_vm4 }
   0x8   : > { %1190 = vmatpush3.bf16.msra.mxu0 (!%p213_p2), %v1252_v1  ;;  %1175 = vmatprep.subr.bf16.mxu1 (!%p213_p2), %v1255_v2  ;;  %v1260_v3 = vld [vmem:[%s1482_s4] sm:$0xff] (!%p213_p2)  }
   0x9   : > { %1203 = vmatprep.subr.bf16.mxu0 (!%p213_p2), %v1260_v3 }
   0xd   : > { %s1486_s22 = smov (!%p242_p3, %s1030_s22), 1 }
   0xe   : > { %s1241_s29 = smul.u32 48, %s1486_s22 }
   0xf   : > { %s1242_s13 = smul.u32 44, %s1486_s22 }
  0x10   : > { %s1338_s10 = scalar_lea.vmem %s1478_s0, %s1241_s29 }
  0x11   : > { %v1341_v4 = vld [vmem:[%s1338_s10] sm:$0xff]   ;;  %v1344_v5 = vld [vmem:[%s1338_s10 + $0x8] sm:$0xff]   ;;  %v1359_v16 = vld [vmem:[%s1338_s10 + $0x10] sm:$0xff]   ;;  %s1458_s16 = scalar_lea.vmem %s1484_s6, %s1242_s13 }
  0x12   : > { %v546_v6 = vld [vmem:[%s1338_s10 + $0x4] sm:$0xf]  ;;  %v1348_v7 = vld [vmem:[%s1338_s10 + $0x8] sm:$0xf]  ;;  %v298_v8 = vshrl.u32 %v1341_v4, 16  ;;  %v300_v9 = vshll.u32 %v1341_v4, 16 }
  0x13   : > { %v305_v10 = vshll.u32 %v1344_v5, 16  ;;  %v309_v11 = vshrl.u32 %v1344_v5, 16  ;;  %v1057_v12 = vcombine.low %v546_v6, %v1348_v7  ;;  %v1356_v13 = vld [vmem:[%s1338_s10 + $0xc] sm:$0xff]   ;;  %v1362_v17 = vld [vmem:[%s1338_s10 + $0x14] sm:$0xff]   ;;  %v313_v24 = vshll.u32 %v1359_v16, 16  ;;  %v1374_v33 = vld [vmem:[%s1338_s10 + $0x1c] sm:$0xff]  }
  0x14   : > { %v302_v14 = vrot.slane %v300_v9, 1  ;;  %v595_v20 = vshll.u32 %v1356_v13, 16  ;;  %v599_v21 = vshrl.u32 %v1356_v13, 16  ;;  %v603_v25 = vshll.u32 %v1362_v17, 16  ;;  %v1369_v28 = vld [vmem:[%s1338_s10 + $0x18] sm:$0xff]   ;;  %v1380_v38 = vld [vmem:[%s1338_s10 + $0x20] sm:$0xff]  }
  0x15   : > { %v307_v15 = vrot.slane %v305_v10, 1  ;;  %v588_v18 = vshrl.u32 %v1057_v12, 16  ;;  %v590_v19 = vshll.u32 %v1057_v12, 16  ;;  %v317_v29 = vshrl.u32 %v1359_v16, 16  ;;  %v1385_v43 = vld [vmem:[%s1338_s10 + $0x24] sm:$0xff]  }
  0x16   : > { %v303_v22 = vor.u32 %v302_v14, %v298_v8  ;;  %v597_v27 = vrot.slane %v595_v20, 1  ;;  %v315_v31 = vrot.slane %v313_v24, 1  ;;  %v605_v32 = vrot.slane %v603_v25, 1  ;;  %v1265_v54 = vld [vmem:[%s1338_s10 + $0x28] ss:$0 sps:$4 sm:$0x11]  }
  0x17   : > { %v311_v23 = vor.u32 %v309_v11, %v307_v15  ;;  %v592_v26 = vrot.slane %v590_v19, 1  ;;  %v607_v34 = vshrl.u32 %v1362_v17, 16  ;;  %v321_v37 = vshll.u32 %v1369_v28, 16  ;;  %v1266_v61 = vld [vmem:[%s1338_s10 + $0x2c] ss:$0 sps:$4 sm:$0x11]  }
  0x18   : > { %v308_v30 = vsel %vm296_vm0, %v303_v22, %v307_v15  ;;  %v601_v36 = vor.u32 %v599_v21, %v597_v27  ;;  %v319_v40 = vor.u32 %v317_v29, %v315_v31  ;;  %v611_v42 = vshll.u32 %v1374_v33, 16  ;;  %v748_v1 = vld [vmem:[%s1338_s10 + $0x4] sm:$0xe] }
  0x19   : > { %1163 = vmatprep.mubr.msk.bf16.mxu1 %vm349_vm1, %v308_v30  ;;  %v593_v35 = vor.u32 %v592_v26, %v588_v18  ;;  %v316_v39 = vsel %vm296_vm0, %v311_v23, %v315_v31  ;;  %v609_v41 = vor.u32 %v607_v34, %v605_v32  ;;  %v323_v46 = vrot.slane %v321_v37, 1  ;;  %v1268_v23 = vld [vmem:[%s1338_s10 + $0x2c] ss:$0 sps:$4 sm:$0x33]  }
  0x1a   : > { %1164 = vmatmul.mubr.msk.bf16.vlgmr.msra.gmra.mrb[0].mxu1 %vm349_vm1, %v316_v39  ;;  %v606_v45 = vsel %vm296_vm0, %v601_v36, %v605_v32  ;;  %v325_v47 = vshrl.u32 %v1369_v28, 16  ;;  %v613_v48 = vrot.slane %v611_v42, 1  ;;  %v329_v49 = vshll.u32 %v1380_v38, 16 }
  0x1b   : > { %v598_v44 = vsel %vm296_vm0, %v593_v35, %v597_v27  ;;  %1176 = vmatpush3.bf16.msra.mxu1 %v1255_v2  ;;  %v615_v50 = vshrl.u32 %v1374_v33, 16  ;;  %v619_v51 = vshll.u32 %v1385_v43, 16  ;;  %v324_v52 = vsel %vm296_vm0, %v319_v40, %v323_v46  ;;  %v1448_v35 = vld [vmem:[%s1483_s5] ss:$0 sm:$0xff] }
  0x1c   : > { %1191 = vmatprep.mubr.msk.bf16.mxu0 %vm349_vm1, %v598_v44  ;;  %v327_v53 = vor.u32 %v325_v47, %v323_v46  ;;  %v333_v55 = vshrl.u32 %v1380_v38, 16  ;;  %v623_v56 = vshrl.u32 %v1385_v43, 16  ;;  %1167 = vmatprep.mubr.msk.bf16.mxu1 %vm349_vm1, %v324_v52  ;;  %v614_v57 = vsel %vm296_vm0, %v609_v41, %v613_v48 }
  0x1d   : > { %1192 = vmatmul.mubr.msk.bf16.vlgmr.msra.gmra.mrb[0].mxu0 %vm349_vm1, %v606_v45  ;;  %v331_v58 = vrot.slane %v329_v49, 1  ;;  %v617_v59 = vor.u32 %v615_v50, %v613_v48  ;;  %v621_v60 = vrot.slane %v619_v51, 1  ;;  %v337_v62 = vshll.u32 %v1265_v54, 16 }
  0x1e   : > { %1204 = vmatpush3.bf16.msra.mxu0 %v1260_v3  ;;  %1195 = vmatprep.mubr.msk.bf16.mxu0 %vm349_vm1, %v614_v57  ;;  %v627_v8 = vshll.u32 %v1266_v61, 16  ;;  %v1070_v11 = vcombine.low %v748_v1, %v1348_v7  ;;  %v341_v14 = vshrl.u32 %v1265_v54, 16  ;;  %v760_v18 = vrot.slane %v1356_v13, 1 }
  0x1f   : > { %v332_v63 = vsel %vm296_vm0, %v327_v53, %v331_v58  ;;  %v335_v0 = vor.u32 %v333_v55, %v331_v58  ;;  %v339_v2 = vrot.slane %v337_v62, 1  ;;  %v625_v6 = vor.u32 %v623_v56, %v621_v60 }
  0x20   : > { %v622_v3 = vsel %vm296_vm0, %v617_v59, %v621_v60  ;;  %v629_v10 = vrot.slane %v627_v8, 1  ;;  %v759_v15 = vrot.slane %v1070_v11, 1  ;;  %v631_v19 = vshrl.u32 %v1266_v61, 16 }
  0x21   : > { %v340_v9 = vsel %vm296_vm0, %v335_v0, %v339_v2  ;;  %v762_v7 = vrot.slane %v1362_v17, 1  ;;  %v764_v21 = vrot.slane %v1374_v33, 1  ;;  %v768_v17 = vrot.slane %v1268_v23, 1 }
  0x22   : > { %1168 = vmatmul.mubr.msk.bf16.gmra.mrb[4].mxu1 %vm349_vm1, %v332_v63  ;;  %v630_v12 = vsel %vm296_vm0, %v625_v6, %v629_v10  ;;  %v761_v20 = vsel %vm758_vm2, %v759_v15, %v760_v18 }
  0x23   : > { %1171 = vmatprep.mubr.msk.bf16.mxu1 %vm349_vm1, %v340_v9  ;;  %v763_v22 = vsel %vm758_vm2, %v760_v18, %v762_v7  ;;  %v765_v13 = vsel %vm758_vm2, %v762_v7, %v764_v21 }
  0x25   : > { %1196 = vmatmul.mubr.msk.bf16.gmra.mrb[4].mxu0 %vm349_vm1, %v622_v3 }
  0x26   : > { %1199 = vmatprep.mubr.msk.bf16.mxu0 %vm349_vm1, %v630_v12 }
  0x2a   : > { %1172 = vmatmul.mubr.msk.bf16.gmra.mrb[8].mxu1 %vm349_vm1, %v341_v14 }
  0x2b   : > { %1177 = vmatprep.mubr.msk.bf16.mxu1 %vm349_vm1, %v1341_v4  ;;  %v766_v4 = vrot.slane %v1385_v43, 1 }
  0x2d   : > { %1200 = vmatmul.mubr.msk.bf16.gmra.mrb[8].mxu0 %vm349_vm1, %v631_v19  ;;  %v767_v24 = vsel %vm758_vm2, %v764_v21, %v766_v4 }
  0x2e   : > { %1205 = vmatprep.mubr.msk.bf16.mxu0 %vm349_vm1, %v761_v20 }
  0x32   : > { %1178 = vmatmul.mubr.msk.bf16.vlgmr.msra.gmra.mrb[0].mxu1 %vm349_vm1, %v1344_v5  ;;  %v769_v5 = vsel %vm758_vm2, %v766_v4, %v768_v17 }
  0x33   : > { %1181 = vmatprep.mubr.msk.bf16.mxu1 %vm349_vm1, %v1359_v16 }
  0x35   : > { %1206 = vmatmul.mubr.msk.bf16.vlgmr.msra.gmra.mrb[0].mxu0 %vm349_vm1, %v763_v22 }
  0x36   : > { %1209 = vmatprep.mubr.msk.bf16.mxu0 %vm349_vm1, %v765_v13 }
  0x3a   : > { %1182 = vmatmul.mubr.msk.bf16.gmra.mrb[4].mxu1 %vm349_vm1, %v1369_v28 }
  0x3b   : > { %1185 = vmatprep.mubr.msk.bf16.mxu1 %vm349_vm1, %v1380_v38 }
  0x3d   : > { %1210 = vmatmul.mubr.msk.bf16.gmra.mrb[4].mxu0 %vm349_vm1, %v767_v24 }
  0x3e   : > { %1213 = vmatprep.mubr.msk.bf16.mxu0 %vm349_vm1, %v769_v5 }
  0x42   : > { %1186 = vmatmul.mubr.msk.bf16.gmra.mrb[12].mxu1 %vm349_vm1, %v1265_v54 }
  0x45   : > { %1214 = vmatmul.mubr.msk.bf16.gmra.mrb[12].mxu0 %vm349_vm1, %v768_v17 }
  0xfd   : > { %v1173_v16 = vpop.f32.mrb[8].mxu1 }
  0xfe   : > { %v434_v25 = vpop.f32.mrb[9].mxu1 }
  0xff   : > { %v1174_v27 = vpop.f32.mrb[10].mxu1 }
 0x100   : > { %v1201_v26 = vpop.f32.mrb[8].mxu0  ;;  %v437_v30 = vpop.f32.mrb[11].mxu1 }
 0x101   : > { %v723_v29 = vpop.f32.mrb[9].mxu0 }
 0x102   : > { %v1202_v28 = vpop.f32.mrb[10].mxu0 }
 0x103   : > { %v1443_v31 = vpop.f32.mrb[11].mxu0 }
 0x105   : > { %v1179_v32 = vpop.f32.mrb[0].mxu1 }
 0x106   : > { %v500_v33 = vpop.f32.mrb[1].mxu1 }
 0x107   : > { %v1180_v36 = vpop.f32.mrb[2].mxu1 }
 0x108   : > { %v1207_v34 = vpop.f32.mrb[0].mxu0  ;;  %v503_v39 = vpop.f32.mrb[3].mxu1 }
 0x109   : > { %v1217_v37 = vadd.f32 %v1207_v34, %v1179_v32  ;;  %v828_v38 = vpop.f32.mrb[1].mxu0 }
 0x10a   : > { %v1218_v40 = vadd.f32 %v828_v38, %v500_v33  ;;  %v1208_v41 = vpop.f32.mrb[2].mxu0 }
 0x10b   : > { %v894_v42 = vadd.f32 %v1217_v37, %v1448_v35  ;;  %v1219_v43 = vadd.f32 %v1208_v41, %v1180_v36  ;;  %v831_v44 = vpop.f32.mrb[3].mxu0 }
 0x10c   : > { %v892_v45 = vadd.f32 %v1218_v40, %v1448_v35  ;;  %v1220_v46 = vadd.f32 %v831_v44, %v503_v39 }
 0x10d   : > { %v895_v47 = vadd.f32 %v1219_v43, %v1448_v35  ;;  %v1183_v49 = vpop.f32.mrb[4].mxu1  ;;  %v905_v50 = vmax.f32 %v894_v42, 0.0 }
 0x10e   : > { %v893_v48 = vadd.f32 %v1220_v46, %v1448_v35  ;;  %v516_v52 = vpop.f32.mrb[5].mxu1  ;;  %v903_v53 = vmax.f32 %v892_v45, 0.0 }
 0x10f   : > { %v906_v51 = vmax.f32 %v895_v47, 0.0  ;;  %v1184_v56 = vpop.f32.mrb[6].mxu1 }
 0x110   : > { %v904_v54 = vmax.f32 %v893_v48, 0.0  ;;  %v1211_v55 = vpop.f32.mrb[4].mxu0  ;;  %v519_v60 = vpop.f32.mrb[7].mxu1 }
 0x111   : > { %v1112_v57 = vpack.c.bf16 %v906_v51, %v905_v50  ;;  %v1221_v58 = vadd.f32 %v1211_v55, %v1183_v49  ;;  %v844_v59 = vpop.f32.mrb[5].mxu0 }
 0x112   : > { %v1107_v61 = vpack.c.bf16 %v904_v54, %v903_v53  ;;  %v1222_v62 = vadd.f32 %v844_v59, %v516_v52  ;;  %v1212_v63 = vpop.f32.mrb[6].mxu0 }
 0x113   : > { %1129 = vst [vmem:[%s1458_s16 + $0x8] sm:$0xff] %v1112_v57   ;;  %v898_v0 = vadd.f32 %v1221_v58, %v1448_v35  ;;  %v1223_v1 = vadd.f32 %v1212_v63, %v1184_v56  ;;  %v847_v2 = vpop.f32.mrb[7].mxu0 }
 0x114   : > { %1108 = vst [vmem:[%s1458_s16] sm:$0xff] %v1107_v61   ;;  %v896_v6 = vadd.f32 %v1222_v62, %v1448_v35  ;;  %v1224_v8 = vadd.f32 %v847_v2, %v519_v60 }
 0x115   : > { %v899_v3 = vadd.f32 %v1223_v1, %v1448_v35  ;;  %v1187_v10 = vpop.f32.mrb[12].mxu1  ;;  %v909_v11 = vmax.f32 %v898_v0, 0.0 }
 0x116   : > { %v897_v9 = vadd.f32 %v1224_v8, %v1448_v35  ;;  %v541_v14 = vadd.f32 %v1187_v10, %v1173_v16  ;;  %v532_v15 = vpop.f32.mrb[13].mxu1  ;;  %v907_v18 = vmax.f32 %v896_v6, 0.0 }
 0x117   : > { %v910_v12 = vmax.f32 %v899_v3, 0.0  ;;  %v533_v20 = vadd.f32 %v532_v15, %v434_v25  ;;  %v1188_v21 = vpop.f32.mrb[14].mxu1 }
 0x118   : > { %v908_v19 = vmax.f32 %v897_v9, 0.0  ;;  %v1215_v7 = vpop.f32.mrb[12].mxu0  ;;  %v747_v13 = vadd.f32 %v1201_v26, %v541_v14  ;;  %v535_v4 = vpop.f32.mrb[15].mxu1 }
 0x119   : > { %v1122_v22 = vpack.c.bf16 %v910_v12, %v909_v11  ;;  %v860_v23 = vpop.f32.mrb[13].mxu0  ;;  %v745_v24 = vadd.f32 %v723_v29, %v533_v20  ;;  %v536_v5 = vadd.f32 %v535_v4, %v437_v30  ;;  %v972_v30 = vld [vmem:[%s1458_s16 + $0x28] sm:$0x1] }
 0x11a   : > { %v1117_v17 = vpack.c.bf16 %v908_v19, %v907_v18  ;;  %v1216_v27 = vpop.f32.mrb[14].mxu0  ;;  %v884_v28 = vadd.f32 %v1215_v7, %v747_v13 }
 0x11b   : > { %1131 = vst [vmem:[%s1458_s16 + $0x18] sm:$0xff] %v1122_v22   ;;  %v863_v32 = vpop.f32.mrb[15].mxu0  ;;  %v882_v16 = vadd.f32 %v860_v23, %v745_v24  ;;  %v746_v33 = vadd.f32 %v1443_v31, %v536_v5 }
 0x11c   : > { %1130 = vst [vmem:[%s1458_s16 + $0x10] sm:$0xff] %v1117_v17   ;;  %v902_v25 = vadd.f32 %v1448_v35, %v884_v28 }
 0x11d   : > { %v900_v26 = vadd.f32 %v1448_v35, %v882_v16  ;;  %v883_v34 = vadd.f32 %v863_v32, %v746_v33 }
 0x11e   : > { %v913_v29 = vmax.f32 %v902_v25, 0.0 }
 0x11f   : > { %v901_v36 = vadd.f32 %v1448_v35, %v883_v34  ;;  %v911_v38 = vmax.f32 %v900_v26, 0.0 }
 0x120   : > { %v1103_v37 = vpack.c.bf16 %v913_v29, %v913_v29 }
 0x121   : > { %v912_v39 = vmax.f32 %v901_v36, 0.0 }
 0x122   : > { %v973_v40 = vsel %vm971_vm5, %v1103_v37, %v972_v30 }
 0x123   : > { %974 = vst [vmem:[%s1458_s16 + $0x28] sm:$0x1] %v973_v40  ;;  %v1127_v41 = vpack.c.bf16 %v912_v39, %v911_v38 }
 0x125   : > { %1132 = vst [vmem:[%s1458_s16 + $0x20] sm:$0xff] %v1127_v41  }
 0x126 PF: > { %s16_s21 = sadd.s32 1, %s1275_s21  }
 0x127   : > { %p13_p4 = scmp.ge.s32.totalorder %s16_s21, 4  }
 0x129   :  { %15 = sbr.rel (!%p13_p4) target bundleno = 1 (0x1), region = 74 }

// kernel: _lambda_.7
= control target key start
LH: loop header
LB: loop body
LE: loop exit
PB: predicated region body
PF: predicated region fallthrough
CT: control target
= control target key end

     0   :  { %s1539_s21 = smov 0   ;;  %s1791_s0 = inlined_call_operand.vmem [shape: bf16[2,31,256], index: 0, kind: input, shape index: {}]   ;;  %s1792_s1 = inlined_call_operand.vmem [shape: bf16[256,128], index: 1, kind: input, shape index: {}]   ;;  %s1793_s2 = inlined_call_operand.vmem [shape: bf16[256,128], index: 2, kind: input, shape index: {}]   ;;  %s1794_s3 = inlined_call_operand.vmem [shape: bf16[256,128], index: 3, kind: input, shape index: {}]   ;;  %s1795_s4 = inlined_call_operand.vmem [shape: bf16[256,128], index: 4, kind: input, shape index: {}]   ;;  %s1796_s5 = inlined_call_operand.vmem [shape: f32[1,128], index: 5, kind: input, shape index: {}]   ;;  %s1797_s6 = inlined_call_operand.vmem [shape: bf16[2,25,128], index: 6, kind: output, shape index: {}]  }
   0x1 LB: > { %s1197_s22 = sadd.s32 4294967295, %s1502_s21   ;;  %p1201_p0 = scmp.ge.s32.totalorder %s1502_s21, 1  ;;  %s1502_s21 = sphi %s1539_s21, %s16_s21  }
   0x2   : > { %p212_p1 = scmp.lt.s32.totalorder %s1502_s21, 3 }
   0x4   : > { %p213_p2 = pnand %p1201_p0, %p212_p1 }
   0x5   : > { %v1420_v0 = vld [vmem:[%s1793_s2 + $0x40] sm:$0xff] (!%p213_p2)   ;;  %v1424_v4 = vld [vmem:[%s1793_s2 + $0x48] sm:$0xff] (!%p213_p2)   ;;  %v1428_v8 = vld [vmem:[%s1793_s2 + $0x50] sm:$0xff] (!%p213_p2)   ;;  %p242_p3 = scmp.lt.s32.totalorder (!%p213_p2), %s1197_s22, 1  ;;  %vm337_vm0 = vsmask.f32 (!%p213_p2), 7424 }
   0x6   : > { %216 = sbr.rel (%p213_p2) target bundleno = 308 (0x134), region = 44  ;;  %v1421_v1 = vld [vmem:[%s1792_s1 + $0x40] sm:$0xff] (!%p213_p2)   ;;  %1300 = vmatprep.subr.bf16.mxu0 (!%p213_p2), %v1420_v0  ;;  %v1425_v5 = vld [vmem:[%s1792_s1 + $0x48] sm:$0xff] (!%p213_p2)   ;;  %v1429_v9 = vld [vmem:[%s1792_s1 + $0x50] sm:$0xff] (!%p213_p2)   ;;  %vm942_vm1 = vcmask (!%p213_p2), 1044480   ;;  %vm1136_vm3 = vcmask (!%p213_p2), 1040384  }
   0x7   : > { %v1422_v2 = vld [vmem:[%s1793_s2] sm:$0xff] (!%p213_p2)   ;;  %1328 = vmatprep.subr.bf16.mxu1 (!%p213_p2), %v1421_v1  ;;  %v1426_v6 = vld [vmem:[%s1793_s2 + $0x8] sm:$0xff] (!%p213_p2)   ;;  %v1430_v10 = vld [vmem:[%s1793_s2 + $0x10] sm:$0xff] (!%p213_p2)   ;;  %vm710_vm2 = vsmask.f32 (!%p213_p2), 5376 }
   0x8   : > { %v1423_v3 = vld [vmem:[%s1792_s1] sm:$0xff] (!%p213_p2)   ;;  %1301 = vmatpush3.bf16.msra.mxu0 (!%p213_p2), %v1422_v2  ;;  %v1427_v7 = vld [vmem:[%s1792_s1 + $0x8] sm:$0xff] (!%p213_p2)   ;;  %v1431_v11 = vld [vmem:[%s1792_s1 + $0x10] sm:$0xff] (!%p213_p2)   ;;  %vm1137_vm4 = vsmask.f32 (!%p213_p2), 256 }
   0x9   : > { %1329 = vmatpush3.bf16.msra.mxu1 (!%p213_p2), %v1423_v3  ;;  %1302 = vmatprep.subr.bf16.mxu0 (!%p213_p2), %v1424_v4  ;;  %v1432_v12 = vld [vmem:[%s1793_s2 + $0x58] sm:$0xff] (!%p213_p2)   ;;  %v1436_v16 = vld [vmem:[%s1793_s2 + $0x60] sm:$0xff] (!%p213_p2)   ;;  %v1440_v20 = vld [vmem:[%s1793_s2 + $0x68] sm:$0xff] (!%p213_p2)  }
   0xa   : > { %1330 = vmatprep.subr.bf16.mxu1 (!%p213_p2), %v1425_v5  ;;  %v1433_v13 = vld [vmem:[%s1792_s1 + $0x58] sm:$0xff] (!%p213_p2)   ;;  %v1437_v17 = vld [vmem:[%s1792_s1 + $0x60] sm:$0xff] (!%p213_p2)   ;;  %v1441_v21 = vld [vmem:[%s1792_s1 + $0x68] sm:$0xff] (!%p213_p2)  }
   0xb   : > { %v1434_v14 = vld [vmem:[%s1793_s2 + $0x18] sm:$0xff] (!%p213_p2)   ;;  %v1438_v18 = vld [vmem:[%s1793_s2 + $0x20] sm:$0xff] (!%p213_p2)   ;;  %v1442_v22 = vld [vmem:[%s1793_s2 + $0x28] sm:$0xff] (!%p213_p2)  }
   0xc   : > { %1303 = vmatpush3.bf16.msra.mxu0 (!%p213_p2), %v1426_v6  ;;  %v1435_v15 = vld [vmem:[%s1792_s1 + $0x18] sm:$0xff] (!%p213_p2)   ;;  %v1439_v19 = vld [vmem:[%s1792_s1 + $0x20] sm:$0xff] (!%p213_p2)   ;;  %v1443_v23 = vld [vmem:[%s1792_s1 + $0x28] sm:$0xff] (!%p213_p2)  }
   0xd   : > { %1331 = vmatpush3.bf16.msra.mxu1 %v1427_v7  ;;  %1304 = vmatprep.subr.bf16.mxu0 %v1428_v8  ;;  %s1799_s22 = smov (!%p242_p3, %s1197_s22), 1  ;;  %v1444_v24 = vld [vmem:[%s1793_s2 + $0x70] sm:$0xff]   ;;  %v1448_v28 = vld [vmem:[%s1793_s2 + $0x78] sm:$0xff]   ;;  %v1456_v40 = vld [vmem:[%s1794_s3 + $0x40] sm:$0xff]  }
   0xe   : > { %1332 = vmatprep.subr.bf16.mxu1 %v1429_v9  ;;  %v1445_v25 = vld [vmem:[%s1792_s1 + $0x70] sm:$0xff]   ;;  %s1289_s9 = sshll.u32 %s1799_s22, 5  ;;  %v1449_v29 = vld [vmem:[%s1792_s1 + $0x78] sm:$0xff]   ;;  %v1457_v45 = vld [vmem:[%s1795_s4 + $0x40] sm:$0xff]   ;;  %s1290_s27 = sshll.u32 %s1799_s22, 4 }
   0xf   : > { %v1446_v26 = vld [vmem:[%s1793_s2 + $0x30] sm:$0xff]   ;;  %s1647_s18 = scalar_lea.vmem %s1791_s0, %s1289_s9  ;;  %v1450_v30 = vld [vmem:[%s1793_s2 + $0x38] sm:$0xff]   ;;  %v1458_v52 = vld [vmem:[%s1794_s3] sm:$0xff]   ;;  %s251_s30 = scalar_lea.vmem %s1797_s6, %s1290_s27 }
  0x10   : > { %1305 = vmatpush3.bf16.msra.mxu0 %v1430_v10  ;;  %v1447_v27 = vld [vmem:[%s1792_s1 + $0x30] sm:$0xff]   ;;  %v1451_v31 = vld [vmem:[%s1792_s1 + $0x38] sm:$0xff]   ;;  %v253_v32 = vld [vmem:[%s1647_s18] sm:$0xff] }
  0x11   : > { %1333 = vmatpush3.bf16.msra.mxu1 %v1431_v11  ;;  %1306 = vmatprep.subr.bf16.mxu0 %v1432_v12  ;;  %v1657_v33 = vld [vmem:[%s1647_s18 + $0x8] sm:$0xff]  ;;  %v1660_v34 = vld [vmem:[%s1647_s18 + $0x10] sm:$0xff]  ;;  %v256_v35 = vld [vmem:[%s1647_s18 + $0x18] sm:$0x11] }
  0x12   : > { %1334 = vmatprep.subr.bf16.mxu1 %v1433_v13  ;;  %v1207_v36 = vcombine.high %v253_v32, %v1657_v33  ;;  %v1206_v37 = vcombine.low %v253_v32, %v1657_v33  ;;  %v1209_v38 = vcombine.high %v1660_v34, %v256_v35  ;;  %v1208_v39 = vcombine.low %v1660_v34, %v256_v35  ;;  %v1459_v53 = vld [vmem:[%s1795_s4] sm:$0xff]   ;;  %v1461_v56 = vld [vmem:[%s1795_s4 + $0x48] sm:$0xff]   ;;  %v1465_v1 = vld [vmem:[%s1795_s4 + $0x50] sm:$0xff]  }
  0x13   : > { %v1460_v60 = vld [vmem:[%s1794_s3 + $0x48] sm:$0xff]   ;;  %v1464_v2 = vld [vmem:[%s1794_s3 + $0x50] sm:$0xff]   ;;  %v1469_v6 = vld [vmem:[%s1795_s4 + $0x58] sm:$0xff]  }
  0x14   : > { %1307 = vmatpush3.bf16.msra.mxu0 %v1434_v14  ;;  %v351_v41 = vshrl.u32 %v1207_v36, 16  ;;  %v353_v42 = vshll.u32 %v1207_v36, 16  ;;  %649 = vmatprep.mubr.bf16.mxu1 %v1207_v36  ;;  %v339_v43 = vshrl.u32 %v1206_v37, 16  ;;  %v341_v44 = vshll.u32 %v1206_v37, 16  ;;  %v1463_v61 = vld [vmem:[%s1795_s4 + $0x8] sm:$0xff]   ;;  %v1467_v3 = vld [vmem:[%s1795_s4 + $0x10] sm:$0xff]   ;;  %vm1138_vm5 = vmand %vm1136_vm3, %vm1137_vm4 }
  0x15   : > { %1335 = vmatpush3.bf16.msra.mxu1 %v1435_v15  ;;  %1308 = vmatprep.subr.bf16.mxu0 %v1436_v16  ;;  %v358_v46 = vshll.u32 %v1209_v38, 16  ;;  %v346_v47 = vshll.u32 %v1208_v39, 16  ;;  %v365_v57 = vshrl.u32 %v1209_v38, 16  ;;  %v1462_v63 = vld [vmem:[%s1794_s3 + $0x8] sm:$0xff]   ;;  %v362_v0 = vshrl.u32 %v1208_v39, 16  ;;  %v1466_v4 = vld [vmem:[%s1794_s3 + $0x10] sm:$0xff]  }
  0x16   : > { %1336 = vmatprep.subr.bf16.mxu1 %v1437_v17  ;;  %v355_v48 = vrot.slane %v353_v42, 1  ;;  %v343_v49 = vrot.slane %v341_v44, 1  ;;  %v1468_v7 = vld [vmem:[%s1794_s3 + $0x58] sm:$0xff]   ;;  %v1473_v10 = vld [vmem:[%s1795_s4 + $0x60] sm:$0xff]   ;;  %v1477_v14 = vld [vmem:[%s1795_s4 + $0x68] sm:$0xff]  }
  0x17   : > { %v360_v50 = vrot.slane %v358_v46, 1  ;;  %v348_v51 = vrot.slane %v346_v47, 1  ;;  %v1471_v8 = vld [vmem:[%s1795_s4 + $0x18] sm:$0xff]   ;;  %v1472_v11 = vld [vmem:[%s1794_s3 + $0x60] sm:$0xff]   ;;  %v1476_v15 = vld [vmem:[%s1794_s3 + $0x68] sm:$0xff]  }
  0x18   : > { %1309 = vmatpush3.bf16.msra.mxu0 %v1438_v18  ;;  %v356_v54 = vor.u32 %v355_v48, %v351_v41  ;;  %v344_v55 = vor.u32 %v343_v49, %v339_v43  ;;  %v1470_v9 = vld [vmem:[%s1794_s3 + $0x18] sm:$0xff]   ;;  %v1475_v12 = vld [vmem:[%s1795_s4 + $0x20] sm:$0xff]   ;;  %v1479_v16 = vld [vmem:[%s1795_s4 + $0x28] sm:$0xff]  }
  0x19   : > { %1337 = vmatpush3.bf16.msra.mxu1 %v1439_v19  ;;  %1310 = vmatprep.subr.bf16.mxu0 %v1440_v20  ;;  %v367_v62 = vor.u32 %v365_v57, %v360_v50  ;;  %v364_v5 = vor.u32 %v362_v0, %v348_v51  ;;  %v1474_v13 = vld [vmem:[%s1794_s3 + $0x20] sm:$0xff]   ;;  %v1478_v17 = vld [vmem:[%s1794_s3 + $0x28] sm:$0xff]   ;;  %v1481_v18 = vld [vmem:[%s1795_s4 + $0x70] sm:$0xff]  }
  0x1a   : > { %1338 = vmatprep.subr.bf16.mxu1 %v1441_v21  ;;  %v361_v58 = vsel %vm337_vm0, %v356_v54, %v360_v50  ;;  %v349_v59 = vsel %vm337_vm0, %v344_v55, %v348_v51  ;;  %v1480_v19 = vld [vmem:[%s1794_s3 + $0x70] sm:$0xff]   ;;  %v899_v32 = vld [vmem:[%s1647_s18 + $0x18] sm:$0xff] }
  0x1b   : > { %500 = vmatprep.mubr.bf16.mxu0 %v361_v58  ;;  %v1483_v20 = vld [vmem:[%s1795_s4 + $0x30] sm:$0xff]   ;;  %v1486_v35 = vld [vmem:[%s1794_s3 + $0x38] sm:$0xff]   ;;  %v1265_v43 = vcombine.high %v1660_v34, %v899_v32 }
  0x1c   : > { %1311 = vmatpush3.bf16.msra.mxu0 %v1442_v22  ;;  %v1482_v21 = vld [vmem:[%s1794_s3 + $0x30] sm:$0xff]   ;;  %v1485_v22 = vld [vmem:[%s1795_s4 + $0x78] sm:$0xff]  }
  0x1d   : > { %1339 = vmatpush3.bf16.msra.mxu1 %v1443_v23  ;;  %1312 = vmatprep.subr.bf16.mxu0 %v1444_v24  ;;  %v1484_v23 = vld [vmem:[%s1794_s3 + $0x78] sm:$0xff]   ;;  %v947_v51 = vrot.slane %v1265_v43, 3 }
  0x1e   : > { %1340 = vmatprep.subr.bf16.mxu1 %v1445_v25  ;;  %v1487_v24 = vld [vmem:[%s1795_s4 + $0x38] sm:$0xff]   ;;  %v666_v25 = vld [vmem:[%s1647_s18] sm:$0xcc] }
  0x20   : > { %1313 = vmatpush3.bf16.msra.mxu0 %v1446_v26  ;;  %v667_v26 = vld [vmem:[%s1647_s18 + $0x18] sm:$0x77] }
  0x21   : > { %1341 = vmatpush3.bf16.msra.mxu1 %v1447_v27  ;;  %1314 = vmatprep.subr.bf16.mxu0 %v1448_v28  ;;  %v1242_v27 = vcombine.low %v666_v25, %v1657_v33  ;;  %v1243_v28 = vcombine.high %v666_v25, %v1657_v33 }
  0x22   : > { %1342 = vmatprep.subr.bf16.mxu1 %v1449_v29  ;;  %v1244_v29 = vcombine.low %v1660_v34, %v667_v26 }
  0x24   : > { %1315 = vmatpush3.bf16.msra.mxu0 %v1450_v30  ;;  %v1245_v30 = vcombine.high %v1660_v34, %v667_v26 }
  0x25   : > { %1343 = vmatpush3.bf16.msra.mxu1 %v1451_v31  ;;  %1356 = vmatprep.subr.bf16.mxu0 %v1456_v40  ;;  %v898_v31 = vld [vmem:[%s1647_s18] sm:$0x88]  ;;  %v732_v40 = vshll.u32 %v1243_v28, 16 }
  0x26   : > { %1384 = vmatprep.subr.bf16.mxu1 %v1457_v45  ;;  %v1262_v36 = vcombine.low %v898_v31, %v1657_v33  ;;  %v737_v41 = vshrl.u32 %v1245_v30, 16  ;;  %v740_v42 = vshll.u32 %v1245_v30, 16 }
  0x27   : > { %501 = vmatmul.mubr.bf16.vlgmr.msra.gmra.mrb[0].mxu0 %v349_v59  ;;  %v734_v48 = vrot.slane %v732_v40, 3 }
  0x28   : > { %650 = vmatmul.mubr.bf16.vlgmr.msra.gmra.mrb[0].mxu1 %v1206_v37  ;;  %1357 = vmatpush3.bf16.msra.mxu0 %v1458_v52  ;;  %v1263_v37 = vcombine.high %v898_v31, %v1657_v33  ;;  %v943_v44 = vrot.slane %v1262_v36, 3  ;;  %v739_v49 = vrot.slane %v737_v41, 2  ;;  %v742_v50 = vrot.slane %v740_v42, 3 }
  0x29   : > { %657 = vmatprep.mubr.bf16.mxu1 %v1209_v38  ;;  %1385 = vmatpush3.bf16.msra.mxu1 %v1459_v53  ;;  %v1264_v38 = vcombine.low %v1660_v34, %v899_v32  ;;  %v712_v52 = vshrl.u32 %v1242_v27, 16  ;;  %v715_v33 = vshll.u32 %v1242_v27, 16  ;;  %v720_v53 = vshrl.u32 %v1244_v29, 16 }
  0x2a   : > { %1386 = vmatprep.subr.bf16.mxu1 %v1461_v56  ;;  %1358 = vmatprep.subr.bf16.mxu0 %v1460_v60  ;;  %v946_v46 = vrot.slane %v1263_v37, 3  ;;  %v743_v55 = vor.u32 %v742_v50, %v739_v49  ;;  %v723_v56 = vshll.u32 %v1244_v29, 16 }
  0x2b   : > { %508 = vmatprep.mubr.bf16.mxu0 %v367_v62  ;;  %v944_v45 = vrot.slane %v1264_v38, 3  ;;  %v714_v34 = vrot.slane %v712_v52, 2  ;;  %v717_v59 = vrot.slane %v715_v33, 3  ;;  %v722_v60 = vrot.slane %v720_v53, 2 }
  0x2c   : > { %1359 = vmatpush3.bf16.msra.mxu0 %v1462_v63  ;;  %v948_v58 = vsel %vm942_vm1, %v946_v46, %v947_v51  ;;  %v725_v62 = vrot.slane %v723_v56, 3  ;;  %v1282_v46 = vld [vmem:[%s1796_s5] ss:$0 sm:$0xff] }
  0x2d   : > { %1387 = vmatpush3.bf16.msra.mxu1 %v1463_v61  ;;  %1360 = vmatprep.subr.bf16.mxu0 %v1464_v2  ;;  %v945_v57 = vsel %vm942_vm1, %v943_v44, %v944_v45  ;;  %v718_v63 = vor.u32 %v717_v59, %v714_v34 }
  0x2e   : > { %1388 = vmatprep.subr.bf16.mxu1 %v1465_v1  ;;  %v726_v0 = vor.u32 %v725_v62, %v722_v60 }
  0x2f   : > { %509 = vmatmul.mubr.bf16.gmra.mrb[4].mxu0 %v364_v5 }
  0x30   : > { %658 = vmatmul.mubr.bf16.gmra.mrb[4].mxu1 %v1208_v39  ;;  %1361 = vmatpush3.bf16.msra.mxu0 %v1466_v4  ;;  %v729_v39 = vshrl.u32 %v1243_v28, 16  ;;  %v727_v1 = vsel %vm710_vm2, %v718_v63, %v726_v0 }
  0x31   : > { %1389 = vmatpush3.bf16.msra.mxu1 %v1467_v3  ;;  %1362 = vmatprep.subr.bf16.mxu0 %v1468_v7 }
  0x32   : > { %1390 = vmatprep.subr.bf16.mxu1 %v1469_v6  ;;  %v731_v47 = vrot.slane %v729_v39, 2  ;;  %1081 = vmatprep.mubr.bf16.mxu1 %v948_v58 }
  0x34   : > { %1363 = vmatpush3.bf16.msra.mxu0 %v1470_v9  ;;  %v735_v54 = vor.u32 %v734_v48, %v731_v47 }
  0x35   : > { %1391 = vmatpush3.bf16.msra.mxu1 %v1471_v8  ;;  %1364 = vmatprep.subr.bf16.mxu0 %v1472_v11 }
  0x36   : > { %1392 = vmatprep.subr.bf16.mxu1 %v1473_v10  ;;  %v744_v61 = vsel %vm710_vm2, %v735_v54, %v743_v55 }
  0x37   : > { %877 = vmatprep.mubr.bf16.mxu0 %v744_v61 }
  0x38   : > { %1365 = vmatpush3.bf16.msra.mxu0 %v1474_v13 }
  0x39   : > { %1393 = vmatpush3.bf16.msra.mxu1 %v1475_v12  ;;  %1366 = vmatprep.subr.bf16.mxu0 %v1476_v15 }
  0x3a   : > { %1394 = vmatprep.subr.bf16.mxu1 %v1477_v14 }
  0x3c   : > { %1367 = vmatpush3.bf16.msra.mxu0 %v1478_v17 }
  0x3d   : > { %1395 = vmatpush3.bf16.msra.mxu1 %v1479_v16  ;;  %1368 = vmatprep.subr.bf16.mxu0 %v1480_v19 }
  0x3e   : > { %1396 = vmatprep.subr.bf16.mxu1 %v1481_v18 }
  0x40   : > { %1369 = vmatpush3.bf16.msra.mxu0 %v1482_v21 }
  0x41   : > { %1397 = vmatpush3.bf16.msra.mxu1 %v1483_v20  ;;  %1370 = vmatprep.subr.bf16.mxu0 %v1484_v23 }
  0x42   : > { %1398 = vmatprep.subr.bf16.mxu1 %v1485_v22 }
  0x44   : > { %1371 = vmatpush3.bf16.msra.mxu0 %v1486_v35 }
  0x45   : > { %1399 = vmatpush3.bf16.msra.mxu1 %v1487_v24 }
  0x47   : > { %878 = vmatmul.mubr.bf16.vlgmr.msra.gmra.mrb[8].mxu0 %v727_v1 }
  0x48   : > { %1082 = vmatmul.mubr.bf16.vlgmr.msra.gmra.mrb[8].mxu1 %v945_v57  ;;  %885 = vmatprep.mubr.bf16.mxu0 %v743_v55 }
  0x49   : > { %1089 = vmatprep.mubr.bf16.mxu1 %v947_v51 }
  0x4f   : > { %886 = vmatmul.mubr.bf16.gmra.mrb[12].mxu0 %v726_v0 }
  0x50   : > { %1090 = vmatmul.mubr.bf16.gmra.mrb[12].mxu1 %v944_v45 }
  0xfa   : > { %v1316_v8 = vpop.f32.mrb[0].mxu0 }
  0xfb   : > { %v1344_v2 = vpop.f32.mrb[0].mxu1  ;;  %v1317_v9 = vpop.f32.mrb[1].mxu0 }
  0xfc   : > { %v1345_v3 = vpop.f32.mrb[1].mxu1  ;;  %v1318_v10 = vadd.f32 %v1317_v9, %v1316_v8  ;;  %v1319_v11 = vpop.f32.mrb[2].mxu0  ;;  %v1139_v9 = vld [vmem:[%s251_s30 + $0xc] sm:$0x1] }
  0xfd   : > { %v1346_v4 = vadd.f32 %v1345_v3, %v1344_v2  ;;  %v1347_v5 = vpop.f32.mrb[2].mxu1  ;;  %v1320_v12 = vpop.f32.mrb[3].mxu0 }
  0xfe   : > { %v1348_v6 = vpop.f32.mrb[3].mxu1  ;;  %v1321_v15 = vadd.f32 %v1320_v12, %v1319_v11 }
  0xff   : > { %v1349_v7 = vadd.f32 %v1348_v6, %v1347_v5  ;;  %v652_v14 = vadd.f32 %v1346_v4, %v1318_v10 }
 0x101   : > { %v655_v19 = vadd.f32 %v1349_v7, %v1321_v15 }
 0x102   : > { %v1322_v22 = vpop.f32.mrb[4].mxu0 }
 0x103   : > { %v1350_v13 = vpop.f32.mrb[4].mxu1  ;;  %v1323_v23 = vpop.f32.mrb[5].mxu0 }
 0x104   : > { %v1351_v16 = vpop.f32.mrb[5].mxu1  ;;  %v1324_v24 = vadd.f32 %v1323_v23, %v1322_v22  ;;  %v1325_v25 = vpop.f32.mrb[6].mxu0 }
 0x105   : > { %v1352_v17 = vadd.f32 %v1351_v16, %v1350_v13  ;;  %v1353_v18 = vpop.f32.mrb[6].mxu1  ;;  %v1326_v26 = vpop.f32.mrb[7].mxu0 }
 0x106   : > { %v1354_v20 = vpop.f32.mrb[7].mxu1  ;;  %v1327_v28 = vadd.f32 %v1326_v26, %v1325_v25 }
 0x107   : > { %v1355_v21 = vadd.f32 %v1354_v20, %v1353_v18  ;;  %v660_v27 = vadd.f32 %v1352_v17, %v1324_v24 }
 0x109   : > { %v663_v29 = vadd.f32 %v1355_v21, %v1327_v28 }
 0x11a   : > { %v1372_v37 = vpop.f32.mrb[8].mxu0 }
 0x11b   : > { %v1400_v30 = vpop.f32.mrb[8].mxu1  ;;  %v1373_v39 = vpop.f32.mrb[9].mxu0 }
 0x11c   : > { %v1401_v31 = vpop.f32.mrb[9].mxu1  ;;  %v1374_v40 = vadd.f32 %v1373_v39, %v1372_v37  ;;  %v1375_v41 = vpop.f32.mrb[10].mxu0 }
 0x11d   : > { %v1402_v32 = vadd.f32 %v1401_v31, %v1400_v30  ;;  %v1403_v35 = vpop.f32.mrb[10].mxu1  ;;  %v1376_v42 = vpop.f32.mrb[11].mxu0 }
 0x11e   : > { %v1404_v36 = vpop.f32.mrb[11].mxu1  ;;  %v894_v43 = vadd.f32 %v1374_v40, %v652_v14  ;;  %v1377_v44 = vadd.f32 %v1376_v42, %v1375_v41 }
 0x11f   : > { %v1405_v38 = vadd.f32 %v1404_v36, %v1403_v35 }
 0x120   : > { %v1098_v48 = vadd.f32 %v1402_v32, %v894_v43  ;;  %v895_v49 = vadd.f32 %v1377_v44, %v655_v19 }
 0x122   : > { %v1109_v33 = vadd.f32 %v1282_v46, %v1098_v48  ;;  %v1099_v53 = vadd.f32 %v1405_v38, %v895_v49  ;;  %v1378_v54 = vpop.f32.mrb[12].mxu0 }
 0x123   : > { %v1406_v45 = vpop.f32.mrb[12].mxu1  ;;  %v1379_v56 = vpop.f32.mrb[13].mxu0 }
 0x124   : > { %v1407_v47 = vpop.f32.mrb[13].mxu1  ;;  %v1110_v57 = vadd.f32 %v1282_v46, %v1099_v53  ;;  %v1380_v58 = vadd.f32 %v1379_v56, %v1378_v54  ;;  %v1381_v34 = vpop.f32.mrb[14].mxu0  ;;  %v1113_v60 = vmax.f32 %v1109_v33, 0.0 }
 0x125   : > { %v1408_v50 = vadd.f32 %v1407_v47, %v1406_v45  ;;  %v1409_v51 = vpop.f32.mrb[14].mxu1  ;;  %v1382_v59 = vpop.f32.mrb[15].mxu0 }
 0x126   : > { %v1410_v52 = vpop.f32.mrb[15].mxu1  ;;  %v1114_v61 = vmax.f32 %v1110_v57, 0.0  ;;  %v896_v62 = vadd.f32 %v1380_v58, %v660_v27  ;;  %v1383_v63 = vadd.f32 %v1382_v59, %v1381_v34 }
 0x127   : > { %v1411_v55 = vadd.f32 %v1410_v52, %v1409_v51 }
 0x128   : > { %v1298_v0 = vpack.c.bf16 %v1114_v61, %v1113_v60  ;;  %v1100_v1 = vadd.f32 %v1408_v50, %v896_v62  ;;  %v897_v2 = vadd.f32 %v1383_v63, %v663_v29 }
 0x12a   : > { %1299 = vst [vmem:[%s251_s30] sm:$0xff] %v1298_v0   ;;  %v1111_v3 = vadd.f32 %v1282_v46, %v1100_v1  ;;  %v1101_v4 = vadd.f32 %v1411_v55, %v897_v2 }
 0x12c   : > { %v1115_v5 = vmax.f32 %v1111_v3, 0.0  ;;  %v1112_v6 = vadd.f32 %v1282_v46, %v1101_v4 }
 0x12e   : > { %v1293_v7 = vpack.c.bf16 %v1115_v5, %v1115_v5  ;;  %v1116_v8 = vmax.f32 %v1112_v6, 0.0 }
 0x130   : > { %1135 = vst [vmem:[%s251_s30 + $0x8] sm:$0xf] %v1293_v7  ;;  %v1294_v10 = vpack.c.bf16 %v1116_v8, %v1116_v8 }
 0x132   : > { %v1140_v11 = vsel %vm1138_vm5, %v1294_v10, %v1139_v9 }
 0x133   : > { %1141 = vst [vmem:[%s251_s30 + $0xc] sm:$0x1] %v1140_v11 }
 0x134 PF: > { %s16_s21 = sadd.s32 1, %s1502_s21  }
 0x135   : > { %p13_p4 = scmp.ge.s32.totalorder %s16_s21, 4  }
 0x137   :  { %15 = sbr.rel (!%p13_p4) target bundleno = 1 (0x1), region = 74 }

// kernel: _lambda_.8
= control target key start
LH: loop header
LB: loop body
LE: loop exit
PB: predicated region body
PF: predicated region fallthrough
CT: control target
= control target key end

     0   :  { %s3145_s21 = smov 0   ;;  %s3971_s0 = inlined_call_operand.vmem [shape: bf16[2,13,512], index: 0, kind: input, shape index: {}]   ;;  %s3972_s1 = inlined_call_operand.vmem [shape: bf16[512,256], index: 1, kind: input, shape index: {}]   ;;  %s3973_s2 = inlined_call_operand.vmem [shape: bf16[512,256], index: 2, kind: input, shape index: {}]   ;;  %s3974_s3 = inlined_call_operand.vmem [shape: bf16[512,256], index: 3, kind: input, shape index: {}]   ;;  %s3975_s4 = inlined_call_operand.vmem [shape: bf16[512,256], index: 4, kind: input, shape index: {}]   ;;  %s3976_s5 = inlined_call_operand.vmem [shape: f32[1,256], index: 5, kind: input, shape index: {}]   ;;  %s3977_s6 = inlined_call_operand.vmem [shape: bf16[2,9,256], index: 6, kind: output, shape index: {}]  }
   0x1 LB: > { %s2378_s22 = sadd.s32 4294967295, %s3108_s21   ;;  %p2382_p0 = scmp.ge.s32.totalorder %s3108_s21, 1  ;;  %s3108_s21 = sphi %s3145_s21, %s16_s21  }
   0x2   : > { %p212_p1 = scmp.lt.s32.totalorder %s3108_s21, 3 }
   0x4   : > { %p213_p2 = pnand %p2382_p0, %p212_p1 }
   0x5   : > { %v2699_v0 = vld [vmem:[%s3973_s2 + $0x4] ss:$8 sps:$4 sm:$0xff] (!%p213_p2)   ;;  %v2703_v2 = vld [vmem:[%s3973_s2] ss:$8 sps:$4 sm:$0xff] (!%p213_p2)   ;;  %v2705_v4 = vld [vmem:[%s3973_s2 + $0x14] ss:$8 sps:$4 sm:$0xff] (!%p213_p2)  }
   0x6   : > { %216 = sbr.rel (%p213_p2) target bundleno = 488 (0x1e8), region = 44  ;;  %v2701_v1 = vld [vmem:[%s3974_s3 + $0x4] ss:$8 sps:$4 sm:$0xff] (!%p213_p2)   ;;  %752 = vmatprep.subr.bf16.mxu1 (!%p213_p2), %v2699_v0  ;;  %v2704_v3 = vld [vmem:[%s3974_s3] ss:$8 sps:$4 sm:$0xff] (!%p213_p2)   ;;  %p242_p3 = scmp.lt.s32.totalorder (!%p213_p2), %s2378_s22, 1 }
   0x7   : > { %1688 = vmatprep.subr.bf16.mxu0 (!%p213_p2), %v2701_v1  ;;  %753 = vmatpush1.bf16.msra.mxu1 (!%p213_p2), %v2703_v2  ;;  %v2707_v5 = vld [vmem:[%s3974_s3 + $0x14] ss:$8 sps:$4 sm:$0xff] (!%p213_p2)   ;;  %v2709_v6 = vld [vmem:[%s3973_s2 + $0x10] ss:$8 sps:$4 sm:$0xff] (!%p213_p2)   ;;  %v2711_v8 = vld [vmem:[%s3973_s2 + $0x24] ss:$8 sps:$4 sm:$0xff] (!%p213_p2)  }
   0x8   : > { %1689 = vmatpush1.bf16.msra.mxu0 (!%p213_p2), %v2704_v3  ;;  %754 = vmatprep.subr.bf16.mxu1 (!%p213_p2), %v2705_v4  ;;  %v2710_v7 = vld [vmem:[%s3974_s3 + $0x10] ss:$8 sps:$4 sm:$0xff] (!%p213_p2)   ;;  %v2713_v9 = vld [vmem:[%s3974_s3 + $0x24] ss:$8 sps:$4 sm:$0xff] (!%p213_p2)   ;;  %v2715_v10 = vld [vmem:[%s3973_s2 + $0x20] ss:$8 sps:$4 sm:$0xff] (!%p213_p2)  }
   0x9   : > { %1690 = vmatprep.subr.bf16.mxu0 (!%p213_p2), %v2707_v5  ;;  %v2716_v11 = vld [vmem:[%s3974_s3 + $0x20] ss:$8 sps:$4 sm:$0xff] (!%p213_p2)   ;;  %v2717_v12 = vld [vmem:[%s3973_s2 + $0x34] ss:$8 sps:$4 sm:$0xff] (!%p213_p2)   ;;  %v2721_v14 = vld [vmem:[%s3973_s2 + $0x30] ss:$8 sps:$4 sm:$0xff] (!%p213_p2)  }
   0xa   : > { %v2719_v13 = vld [vmem:[%s3974_s3 + $0x34] ss:$8 sps:$4 sm:$0xff] (!%p213_p2)   ;;  %v2722_v15 = vld [vmem:[%s3974_s3 + $0x30] ss:$8 sps:$4 sm:$0xff] (!%p213_p2)   ;;  %v2723_v16 = vld [vmem:[%s3973_s2 + $0x44] ss:$8 sps:$4 sm:$0xff] (!%p213_p2)  }
   0xb   : > { %755 = vmatpush1.bf16.msra.mxu1 (!%p213_p2), %v2709_v6  ;;  %v2725_v17 = vld [vmem:[%s3974_s3 + $0x44] ss:$8 sps:$4 sm:$0xff] (!%p213_p2)   ;;  %v2727_v18 = vld [vmem:[%s3973_s2 + $0x40] ss:$8 sps:$4 sm:$0xff] (!%p213_p2)   ;;  %v2729_v20 = vld [vmem:[%s3973_s2 + $0x54] ss:$8 sps:$4 sm:$0xff] (!%p213_p2)  }
   0xc   : > { %1691 = vmatpush1.bf16.msra.mxu0 (!%p213_p2), %v2710_v7  ;;  %756 = vmatprep.subr.bf16.mxu1 (!%p213_p2), %v2711_v8  ;;  %v2728_v19 = vld [vmem:[%s3974_s3 + $0x40] ss:$8 sps:$4 sm:$0xff] (!%p213_p2)   ;;  %v2731_v21 = vld [vmem:[%s3974_s3 + $0x54] ss:$8 sps:$4 sm:$0xff] (!%p213_p2)   ;;  %v2733_v22 = vld [vmem:[%s3973_s2 + $0x50] ss:$8 sps:$4 sm:$0xff] (!%p213_p2)  }
   0xd   : > { %1692 = vmatprep.subr.bf16.mxu0 %v2713_v9  ;;  %v2734_v23 = vld [vmem:[%s3974_s3 + $0x50] ss:$8 sps:$4 sm:$0xff]   ;;  %v2735_v24 = vld [vmem:[%s3973_s2 + $0x64] ss:$8 sps:$4 sm:$0xff]   ;;  %v2739_v26 = vld [vmem:[%s3973_s2 + $0x60] ss:$8 sps:$4 sm:$0xff]  }
   0xe   : > { %v2737_v25 = vld [vmem:[%s3974_s3 + $0x64] ss:$8 sps:$4 sm:$0xff]   ;;  %v2740_v27 = vld [vmem:[%s3974_s3 + $0x60] ss:$8 sps:$4 sm:$0xff]   ;;  %v2741_v28 = vld [vmem:[%s3973_s2 + $0x74] ss:$8 sps:$4 sm:$0xff]  }
   0xf   : > { %757 = vmatpush1.bf16.msra.mxu1 %v2715_v10  ;;  %v2743_v29 = vld [vmem:[%s3974_s3 + $0x74] ss:$8 sps:$4 sm:$0xff]   ;;  %v2745_v30 = vld [vmem:[%s3973_s2 + $0x70] ss:$8 sps:$4 sm:$0xff]   ;;  %v2747_v32 = vld [vmem:[%s3973_s2 + $0x84] ss:$8 sps:$4 sm:$0xff]  }
  0x10   : > { %1693 = vmatpush1.bf16.msra.mxu0 %v2716_v11  ;;  %758 = vmatprep.subr.bf16.mxu1 %v2717_v12  ;;  %v2746_v31 = vld [vmem:[%s3974_s3 + $0x70] ss:$8 sps:$4 sm:$0xff]   ;;  %v2749_v33 = vld [vmem:[%s3974_s3 + $0x84] ss:$8 sps:$4 sm:$0xff]   ;;  %v2751_v34 = vld [vmem:[%s3973_s2 + $0x80] ss:$8 sps:$4 sm:$0xff]  }
  0x11   : > { %1694 = vmatprep.subr.bf16.mxu0 %v2719_v13  ;;  %v2752_v35 = vld [vmem:[%s3974_s3 + $0x80] ss:$8 sps:$4 sm:$0xff]   ;;  %v2753_v36 = vld [vmem:[%s3973_s2 + $0x94] ss:$8 sps:$4 sm:$0xff]   ;;  %s3979_s22 = smov (!%p242_p3, %s2378_s22), 1  ;;  %vm2313_vm0 = vcmask 1040384  }
  0x12   : > { %v2755_v37 = vld [vmem:[%s3974_s3 + $0x94] ss:$8 sps:$4 sm:$0xff]   ;;  %v2757_v38 = vld [vmem:[%s3973_s2 + $0x90] ss:$8 sps:$4 sm:$0xff]   ;;  %v2759_v40 = vld [vmem:[%s3973_s2 + $0xa4] ss:$8 sps:$4 sm:$0xff]  }
  0x13   : > { %759 = vmatpush1.bf16.msra.mxu1 %v2721_v14  ;;  %v2758_v39 = vld [vmem:[%s3974_s3 + $0x90] ss:$8 sps:$4 sm:$0xff]   ;;  %v2761_v41 = vld [vmem:[%s3974_s3 + $0xa4] ss:$8 sps:$4 sm:$0xff]   ;;  %s2659_s17 = sshll.u32 %s3979_s22, 5  ;;  %s2660_s8 = sshll.u32 %s3979_s22, 4 }
  0x14   : > { %1695 = vmatpush1.bf16.msra.mxu0 %v2722_v15  ;;  %760 = vmatprep.subr.bf16.mxu1 %v2723_v16  ;;  %v2763_v42 = vld [vmem:[%s3973_s2 + $0xa0] ss:$8 sps:$4 sm:$0xff]   ;;  %v2765_v44 = vld [vmem:[%s3973_s2 + $0xb4] ss:$8 sps:$4 sm:$0xff]   ;;  %s3301_s30 = scalar_lea.vmem %s3971_s0, %s2659_s17  ;;  %v2769_v46 = vld [vmem:[%s3973_s2 + $0xb0] ss:$8 sps:$4 sm:$0xff]   ;;  %s251_s11 = scalar_lea.vmem %s3977_s6, %s2660_s8 }
  0x15   : > { %1696 = vmatprep.subr.bf16.mxu0 %v2725_v17  ;;  %v2764_v43 = vld [vmem:[%s3974_s3 + $0xa0] ss:$8 sps:$4 sm:$0xff]   ;;  %v2767_v45 = vld [vmem:[%s3974_s3 + $0xb4] ss:$8 sps:$4 sm:$0xff]   ;;  %v2770_v47 = vld [vmem:[%s3974_s3 + $0xb0] ss:$8 sps:$4 sm:$0xff]  }
  0x16   : > { %v2771_v48 = vld [vmem:[%s3973_s2 + $0xc4] ss:$8 sps:$4 sm:$0xff]   ;;  %v2775_v51 = vld [vmem:[%s3973_s2 + $0xc0] ss:$8 sps:$4 sm:$0xff]   ;;  %v2777_v56 = vld [vmem:[%s3973_s2 + $0xd4] ss:$8 sps:$4 sm:$0xff]  }
  0x17   : > { %761 = vmatpush1.bf16.msra.mxu1 %v2727_v18  ;;  %v3313_v49 = vld [vmem:[%s3301_s30 + $0x4] ss:$16 sps:$4 sm:$0x1f]   ;;  %v2776_v54 = vld [vmem:[%s3974_s3 + $0xc0] ss:$8 sps:$4 sm:$0xff]   ;;  %vm2316_vm2 = vcmask 1044484  }
  0x18   : > { %1697 = vmatpush1.bf16.msra.mxu0 %v2728_v19  ;;  %762 = vmatprep.subr.bf16.mxu1 %v2729_v20  ;;  %v2773_v50 = vld [vmem:[%s3974_s3 + $0xc4] ss:$8 sps:$4 sm:$0xff]   ;;  %v408_v52 = vshrl.u32 %v3313_v49, 16  ;;  %v410_v53 = vshll.u32 %v3313_v49, 16  ;;  %v2779_v57 = vld [vmem:[%s3974_s3 + $0xd4] ss:$8 sps:$4 sm:$0xff]  }
  0x19   : > { %1698 = vmatprep.subr.bf16.mxu0 %v2731_v21  ;;  %v2803_v55 = vld [vmem:[%s3301_s30 + $0x4] ss:$16 sps:$4 sm:$0x3e]   ;;  %v2781_v61 = vld [vmem:[%s3973_s2 + $0xd0] ss:$8 sps:$4 sm:$0xff]  }
  0x1a   : > { %v412_v58 = vrot.slane %v410_v53, 1  ;;  %v1341_v59 = vshrl.u32 %v2803_v55, 16  ;;  %v1344_v60 = vshll.u32 %v2803_v55, 16  ;;  %v2795_v62 = vld [vmem:[%s3301_s30] ss:$16 sps:$4 sm:$0x1f]  }
  0x1b   : > { %763 = vmatpush1.bf16.msra.mxu1 %v2733_v22  ;;  %v2801_v0 = vld [vmem:[%s3301_s30] ss:$16 sps:$4 sm:$0x3e]   ;;  %v2783_v4 = vld [vmem:[%s3973_s2 + $0xe4] ss:$8 sps:$4 sm:$0xff]   ;;  %v403_v8 = vshll.u32 %v2795_v62, 16 }
  0x1c   : > { %1699 = vmatpush1.bf16.msra.mxu0 %v2734_v23  ;;  %764 = vmatprep.subr.bf16.mxu1 %v2735_v24  ;;  %v413_v63 = vor.u32 %v412_v58, %v408_v52  ;;  %v1343_v1 = vrot.slane %v1341_v59, 1  ;;  %v1346_v2 = vrot.slane %v1344_v60, 2  ;;  %v2782_v3 = vld [vmem:[%s3974_s3 + $0xd0] ss:$8 sps:$4 sm:$0xff]   ;;  %v2785_v5 = vld [vmem:[%s3974_s3 + $0xe4] ss:$8 sps:$4 sm:$0xff]  }
  0x1d   : > { %1700 = vmatprep.subr.bf16.mxu0 %v2737_v25  ;;  %v2787_v7 = vld [vmem:[%s3973_s2 + $0xe0] ss:$8 sps:$4 sm:$0xff]   ;;  %v1333_v9 = vshrl.u32 %v2801_v0, 16  ;;  %v1336_v10 = vshll.u32 %v2801_v0, 16  ;;  %v2789_v12 = vld [vmem:[%s3973_s2 + $0xf4] ss:$8 sps:$4 sm:$0xff]  }
  0x1e   : > { %v1347_v6 = vor.u32 %v1346_v2, %v1343_v1  ;;  %784 = vmatprep.mubr.bf16.mxu1 %v413_v63  ;;  %v2788_v11 = vld [vmem:[%s3974_s3 + $0xe0] ss:$8 sps:$4 sm:$0xff]   ;;  %v2791_v13 = vld [vmem:[%s3974_s3 + $0xf4] ss:$8 sps:$4 sm:$0xff]   ;;  %v2793_v14 = vld [vmem:[%s3973_s2 + $0xf0] ss:$8 sps:$4 sm:$0xff]  }
  0x1f   : > { %765 = vmatpush1.bf16.msra.mxu1 %v2739_v26  ;;  %v401_v15 = vshrl.u32 %v2795_v62, 16  ;;  %v405_v16 = vrot.slane %v403_v8, 1  ;;  %v1335_v17 = vrot.slane %v1333_v9, 1  ;;  %v1338_v18 = vrot.slane %v1336_v10, 2  ;;  %v2794_v19 = vld [vmem:[%s3974_s3 + $0xf0] ss:$8 sps:$4 sm:$0xff]  }
  0x20   : > { %1701 = vmatpush1.bf16.msra.mxu0 %v2740_v27  ;;  %766 = vmatprep.subr.bf16.mxu1 %v2741_v28  ;;  %v2800_v20 = vld [vmem:[%s3973_s2 + $0x104] ss:$8 sps:$4 sm:$0xff]   ;;  %v2798_v22 = vld [vmem:[%s3973_s2 + $0x100] ss:$8 sps:$4 sm:$0xff]   ;;  %v2809_v26 = vld [vmem:[%s3973_s2 + $0x114] ss:$8 sps:$4 sm:$0xff]  }
  0x21   : > { %1702 = vmatprep.subr.bf16.mxu0 %v2743_v29  ;;  %1720 = vmatprep.mubr.bf16.mxu0 %v1347_v6  ;;  %v2806_v21 = vld [vmem:[%s3974_s3 + $0x104] ss:$8 sps:$4 sm:$0xff]   ;;  %v406_v23 = vor.u32 %v405_v16, %v401_v15  ;;  %v1339_v24 = vor.u32 %v1338_v18, %v1335_v17  ;;  %v2804_v25 = vld [vmem:[%s3974_s3 + $0x100] ss:$8 sps:$4 sm:$0xff]   ;;  %v2812_v27 = vld [vmem:[%s3974_s3 + $0x114] ss:$8 sps:$4 sm:$0xff]  }
  0x22   : > { %v2807_v28 = vld [vmem:[%s3973_s2 + $0x110] ss:$8 sps:$4 sm:$0xff]   ;;  %v2848_v52 = vld [vmem:[%s3974_s3 + $0x174] ss:$8 sps:$4 sm:$0xff]   ;;  %v2852_v62 = vld [vmem:[%s3974_s3 + $0x180] ss:$8 sps:$4 sm:$0xff]  }
  0x23   : > { %767 = vmatpush1.bf16.msra.mxu1 %v2745_v30  ;;  %v2810_v29 = vld [vmem:[%s3974_s3 + $0x110] ss:$8 sps:$4 sm:$0xff]   ;;  %v2815_v30 = vld [vmem:[%s3973_s2 + $0x124] ss:$8 sps:$4 sm:$0xff]   ;;  %v2857_v2 = vld [vmem:[%s3973_s2 + $0x194] ss:$8 sps:$4 sm:$0xff]  }
  0x24   : > { %1703 = vmatpush1.bf16.msra.mxu0 %v2746_v31  ;;  %768 = vmatprep.subr.bf16.mxu1 %v2747_v32  ;;  %v2818_v31 = vld [vmem:[%s3974_s3 + $0x124] ss:$8 sps:$4 sm:$0xff]   ;;  %v2813_v32 = vld [vmem:[%s3973_s2 + $0x120] ss:$8 sps:$4 sm:$0xff]   ;;  %v2843_v53 = vld [vmem:[%s3973_s2 + $0x170] ss:$8 sps:$4 sm:$0xff]  }
  0x25   : > { %1704 = vmatprep.subr.bf16.mxu0 %v2749_v33  ;;  %v2816_v33 = vld [vmem:[%s3974_s3 + $0x120] ss:$8 sps:$4 sm:$0xff]   ;;  %v3462_v55 = vld [vmem:[%s3301_s30 + $0xc] ss:$16 sps:$4 sm:$0x1f]  }
  0x26   : > { %v422_v58 = vshrl.u32 %v3462_v55, 16  ;;  %v424_v59 = vshll.u32 %v3462_v55, 16  ;;  %v2905_v60 = vld [vmem:[%s3301_s30 + $0xc] ss:$16 sps:$4 sm:$0x3e]  }
  0x27   : > { %769 = vmatpush1.bf16.msra.mxu1 %v2751_v34  ;;  %v2821_v34 = vld [vmem:[%s3973_s2 + $0x134] ss:$8 sps:$4 sm:$0xff]   ;;  %v1357_v0 = vshrl.u32 %v2905_v60, 16  ;;  %v1360_v1 = vshll.u32 %v2905_v60, 16  ;;  %v2858_v8 = vld [vmem:[%s3974_s3 + $0x190] ss:$8 sps:$4 sm:$0xff]  }
  0x28   : > { %1705 = vmatpush1.bf16.msra.mxu0 %v2752_v35  ;;  %770 = vmatprep.subr.bf16.mxu1 %v2753_v36  ;;  %v2824_v35 = vld [vmem:[%s3974_s3 + $0x134] ss:$8 sps:$4 sm:$0xff]   ;;  %v2819_v36 = vld [vmem:[%s3973_s2 + $0x130] ss:$8 sps:$4 sm:$0xff]   ;;  %v426_v63 = vrot.slane %v424_v59, 1 }
  0x29   : > { %1706 = vmatprep.subr.bf16.mxu0 %v2755_v37  ;;  %v2822_v37 = vld [vmem:[%s3974_s3 + $0x130] ss:$8 sps:$4 sm:$0xff]   ;;  %v1362_v6 = vrot.slane %v1360_v1, 2  ;;  %v2863_v10 = vld [vmem:[%s3973_s2 + $0x1a4] ss:$8 sps:$4 sm:$0xff]  }
  0x2a   : > { %v2872_v15 = vld [vmem:[%s3974_s3 + $0x1b4] ss:$8 sps:$4 sm:$0xff]   ;;  %v2867_v16 = vld [vmem:[%s3973_s2 + $0x1b0] ss:$8 sps:$4 sm:$0xff]   ;;  %v2875_v18 = vld [vmem:[%s3973_s2 + $0x1c4] ss:$8 sps:$4 sm:$0xff]  }
  0x2b   : > { %771 = vmatpush1.bf16.msra.mxu1 %v2757_v38  ;;  %v2827_v38 = vld [vmem:[%s3973_s2 + $0x144] ss:$8 sps:$4 sm:$0xff]   ;;  %v2870_v17 = vld [vmem:[%s3974_s3 + $0x1b0] ss:$8 sps:$4 sm:$0xff]   ;;  %v2923_v59 = vld [vmem:[%s3972_s1 + $0x34] ss:$8 sps:$4 sm:$0xff]  }
  0x2c   : > { %1707 = vmatpush1.bf16.msra.mxu0 %v2758_v39  ;;  %772 = vmatprep.subr.bf16.mxu1 %v2759_v40  ;;  %v2830_v39 = vld [vmem:[%s3974_s3 + $0x144] ss:$8 sps:$4 sm:$0xff]   ;;  %v2825_v40 = vld [vmem:[%s3973_s2 + $0x140] ss:$8 sps:$4 sm:$0xff]   ;;  %v2921_v60 = vld [vmem:[%s3972_s1 + $0x30] ss:$8 sps:$4 sm:$0xff]  }
  0x2d   : > { %1708 = vmatprep.subr.bf16.mxu0 %v2761_v41  ;;  %v2828_v41 = vld [vmem:[%s3974_s3 + $0x140] ss:$8 sps:$4 sm:$0xff]   ;;  %vm2314_vm1 = vsmask.f32 256  ;;  %vm2317_vm3 = vsmask.f32 4352 }
  0x2e   : > { %vm2315_vm4 = vmand %vm2313_vm0, %vm2314_vm1 }
  0x2f   : > { %773 = vmatpush1.bf16.msra.mxu1 %v2763_v42  ;;  %v2833_v42 = vld [vmem:[%s3973_s2 + $0x154] ss:$8 sps:$4 sm:$0xff]   ;;  %vm2318_vm5 = vmand %vm2316_vm2, %vm2317_vm3 }
  0x30   : > { %1709 = vmatpush1.bf16.msra.mxu0 %v2764_v43  ;;  %774 = vmatprep.subr.bf16.mxu1 %v2765_v44  ;;  %v2836_v43 = vld [vmem:[%s3974_s3 + $0x154] ss:$8 sps:$4 sm:$0xff]   ;;  %v2831_v44 = vld [vmem:[%s3973_s2 + $0x150] ss:$8 sps:$4 sm:$0xff]   ;;  %vm2319_vm6 = vmor %vm2318_vm5, %vm2315_vm4 }
  0x31   : > { %1710 = vmatprep.subr.bf16.mxu0 %v2767_v45  ;;  %v2834_v45 = vld [vmem:[%s3974_s3 + $0x150] ss:$8 sps:$4 sm:$0xff]  }
  0x33   : > { %775 = vmatpush1.bf16.msra.mxu1 %v2769_v46  ;;  %v2839_v46 = vld [vmem:[%s3973_s2 + $0x164] ss:$8 sps:$4 sm:$0xff]  }
  0x34   : > { %1711 = vmatpush1.bf16.msra.mxu0 %v2770_v47  ;;  %776 = vmatprep.subr.bf16.mxu1 %v2771_v48  ;;  %v2842_v47 = vld [vmem:[%s3974_s3 + $0x164] ss:$8 sps:$4 sm:$0xff]   ;;  %v2837_v48 = vld [vmem:[%s3973_s2 + $0x160] ss:$8 sps:$4 sm:$0xff]  }
  0x35   : > { %1712 = vmatprep.subr.bf16.mxu0 %v2773_v50  ;;  %v2840_v50 = vld [vmem:[%s3974_s3 + $0x160] ss:$8 sps:$4 sm:$0xff]  }
  0x37   : > { %777 = vmatpush1.bf16.msra.mxu1 %v2775_v51  ;;  %v2845_v51 = vld [vmem:[%s3973_s2 + $0x174] ss:$8 sps:$4 sm:$0xff]  }
  0x38   : > { %1713 = vmatpush1.bf16.msra.mxu0 %v2776_v54  ;;  %778 = vmatprep.subr.bf16.mxu1 %v2777_v56  ;;  %v2846_v54 = vld [vmem:[%s3974_s3 + $0x170] ss:$8 sps:$4 sm:$0xff]   ;;  %v2851_v56 = vld [vmem:[%s3973_s2 + $0x184] ss:$8 sps:$4 sm:$0xff]  }
  0x39   : > { %1714 = vmatprep.subr.bf16.mxu0 %v2779_v57  ;;  %v2854_v57 = vld [vmem:[%s3974_s3 + $0x184] ss:$8 sps:$4 sm:$0xff]  }
  0x3b   : > { %779 = vmatpush1.bf16.msra.mxu1 %v2781_v61  ;;  %v2849_v61 = vld [vmem:[%s3973_s2 + $0x180] ss:$8 sps:$4 sm:$0xff]  }
  0x3c   : > { %1715 = vmatpush1.bf16.msra.mxu0 %v2782_v3  ;;  %780 = vmatprep.subr.bf16.mxu1 %v2783_v4  ;;  %v2860_v3 = vld [vmem:[%s3974_s3 + $0x194] ss:$8 sps:$4 sm:$0xff]   ;;  %v427_v4 = vor.u32 %v426_v63, %v422_v58  ;;  %v2918_v58 = vld [vmem:[%s3975_s4 + $0x20] ss:$8 sps:$4 sm:$0xff]   ;;  %v2929_v63 = vld [vmem:[%s3972_s1 + $0x44] ss:$8 sps:$4 sm:$0xff]  }
  0x3d   : > { %1716 = vmatprep.subr.bf16.mxu0 %v2785_v5  ;;  %v1359_v5 = vrot.slane %v1357_v0, 1  ;;  %v2932_v0 = vld [vmem:[%s3975_s4 + $0x44] ss:$8 sps:$4 sm:$0xff]  }
  0x3f   : > { %781 = vmatpush1.bf16.msra.mxu1 %v2787_v7  ;;  %v2855_v7 = vld [vmem:[%s3973_s2 + $0x190] ss:$8 sps:$4 sm:$0xff]   ;;  %v1363_v9 = vor.u32 %v1362_v6, %v1359_v5  ;;  %v2938_v5 = vld [vmem:[%s3975_s4 + $0x54] ss:$8 sps:$4 sm:$0xff]  }
  0x40   : > { %1717 = vmatpush1.bf16.msra.mxu0 %v2788_v11  ;;  %782 = vmatprep.subr.bf16.mxu1 %v2789_v12  ;;  %v2866_v11 = vld [vmem:[%s3974_s3 + $0x1a4] ss:$8 sps:$4 sm:$0xff]   ;;  %v2861_v12 = vld [vmem:[%s3973_s2 + $0x1a0] ss:$8 sps:$4 sm:$0xff]   ;;  %v2933_v6 = vld [vmem:[%s3972_s1 + $0x50] ss:$8 sps:$4 sm:$0xff]  }
  0x41   : > { %1718 = vmatprep.subr.bf16.mxu0 %v2791_v13  ;;  %v2864_v13 = vld [vmem:[%s3974_s3 + $0x1a0] ss:$8 sps:$4 sm:$0xff]  }
  0x43   : > { %783 = vmatpush1.bf16.msra.mxu1 %v2793_v14  ;;  %v2869_v14 = vld [vmem:[%s3973_s2 + $0x1b4] ss:$8 sps:$4 sm:$0xff]  }
  0x44   : > { %1719 = vmatpush1.bf16.msra.mxu0 %v2794_v19  ;;  %795 = vmatprep.subr.bf16.mxu1 %v2800_v20  ;;  %v2878_v19 = vld [vmem:[%s3974_s3 + $0x1c4] ss:$8 sps:$4 sm:$0xff]   ;;  %v2873_v20 = vld [vmem:[%s3973_s2 + $0x1c0] ss:$8 sps:$4 sm:$0xff]  }
  0x45   : > { %1731 = vmatprep.subr.bf16.mxu0 %v2806_v21  ;;  %v2876_v21 = vld [vmem:[%s3974_s3 + $0x1c0] ss:$8 sps:$4 sm:$0xff]  }
  0x46   : > { %785 = vmatmul.mubr.bf16.vlgmr.msra.gmra.mrb[0].mxu1 %v406_v23  ;;  %v2884_v23 = vld [vmem:[%s3974_s3 + $0x1d4] ss:$8 sps:$4 sm:$0xff]  }
  0x47   : > { %1721 = vmatmul.mubr.bf16.vlgmr.msra.gmra.mrb[0].mxu0 %v1339_v24  ;;  %796 = vmatpush1.bf16.msra.mxu1 %v2798_v22  ;;  %v2881_v22 = vld [vmem:[%s3973_s2 + $0x1d4] ss:$8 sps:$4 sm:$0xff]   ;;  %v3534_v24 = vld [vmem:[%s3301_s30 + $0x8] ss:$16 sps:$4 sm:$0x1f]  }
  0x48   : > { %1732 = vmatpush1.bf16.msra.mxu0 %v2804_v25  ;;  %797 = vmatprep.subr.bf16.mxu1 %v2809_v26  ;;  %v2903_v25 = vld [vmem:[%s3301_s30 + $0x8] ss:$16 sps:$4 sm:$0x3e]  }
  0x49   : > { %1733 = vmatprep.subr.bf16.mxu0 %v2812_v27  ;;  %827 = vmatprep.mubr.bf16.mxu1 %v427_v4  ;;  %v2879_v26 = vld [vmem:[%s3973_s2 + $0x1d0] ss:$8 sps:$4 sm:$0xff]   ;;  %v2935_v4 = vld [vmem:[%s3972_s1 + $0x54] ss:$8 sps:$4 sm:$0xff]  }
  0x4a   : > { %1763 = vmatprep.mubr.bf16.mxu0 %v1363_v9  ;;  %v2882_v27 = vld [vmem:[%s3974_s3 + $0x1d0] ss:$8 sps:$4 sm:$0xff]   ;;  %v2944_v9 = vld [vmem:[%s3975_s4 + $0x64] ss:$8 sps:$4 sm:$0xff]  }
  0x4b   : > { %798 = vmatpush1.bf16.msra.mxu1 %v2807_v28  ;;  %v2887_v28 = vld [vmem:[%s3973_s2 + $0x1e4] ss:$8 sps:$4 sm:$0xff]  }
  0x4c   : > { %1734 = vmatpush1.bf16.msra.mxu0 %v2810_v29  ;;  %799 = vmatprep.subr.bf16.mxu1 %v2815_v30  ;;  %v2890_v29 = vld [vmem:[%s3974_s3 + $0x1e4] ss:$8 sps:$4 sm:$0xff]   ;;  %v417_v30 = vshll.u32 %v3534_v24, 16 }
  0x4d   : > { %1735 = vmatprep.subr.bf16.mxu0 %v2818_v31  ;;  %v1349_v31 = vshrl.u32 %v2903_v25, 16 }
  0x4f   : > { %800 = vmatpush1.bf16.msra.mxu1 %v2813_v32  ;;  %v1352_v32 = vshll.u32 %v2903_v25, 16  ;;  %v2965_v25 = vld [vmem:[%s3972_s1 + $0xa4] ss:$8 sps:$4 sm:$0xff]  }
  0x50   : > { %1736 = vmatpush1.bf16.msra.mxu0 %v2816_v33  ;;  %801 = vmatprep.subr.bf16.mxu1 %v2821_v34  ;;  %v2885_v33 = vld [vmem:[%s3973_s2 + $0x1e0] ss:$8 sps:$4 sm:$0xff]  }
  0x51   : > { %1737 = vmatprep.subr.bf16.mxu0 %v2824_v35  ;;  %v2888_v34 = vld [vmem:[%s3974_s3 + $0x1e0] ss:$8 sps:$4 sm:$0xff]   ;;  %v2893_v35 = vld [vmem:[%s3973_s2 + $0x1f4] ss:$8 sps:$4 sm:$0xff]  }
  0x53   : > { %802 = vmatpush1.bf16.msra.mxu1 %v2819_v36  ;;  %v2896_v36 = vld [vmem:[%s3974_s3 + $0x1f4] ss:$8 sps:$4 sm:$0xff]  }
  0x54   : > { %1738 = vmatpush1.bf16.msra.mxu0 %v2822_v37  ;;  %803 = vmatprep.subr.bf16.mxu1 %v2827_v38  ;;  %v415_v37 = vshrl.u32 %v3534_v24, 16  ;;  %v419_v38 = vrot.slane %v417_v30, 1  ;;  %v2974_v30 = vld [vmem:[%s3975_s4 + $0xb4] ss:$8 sps:$4 sm:$0xff]  }
  0x55   : > { %1739 = vmatprep.subr.bf16.mxu0 %v2830_v39  ;;  %v1351_v39 = vrot.slane %v1349_v31, 1  ;;  %v2969_v31 = vld [vmem:[%s3972_s1 + $0xb0] ss:$8 sps:$4 sm:$0xff]  }
  0x57   : > { %804 = vmatpush1.bf16.msra.mxu1 %v2825_v40  ;;  %v1354_v40 = vrot.slane %v1352_v32, 2  ;;  %v2972_v32 = vld [vmem:[%s3975_s4 + $0xb0] ss:$8 sps:$4 sm:$0xff]  }
  0x58   : > { %1740 = vmatpush1.bf16.msra.mxu0 %v2828_v41  ;;  %805 = vmatprep.subr.bf16.mxu1 %v2833_v42  ;;  %v2891_v41 = vld [vmem:[%s3973_s2 + $0x1f0] ss:$8 sps:$4 sm:$0xff]  }
  0x59   : > { %1741 = vmatprep.subr.bf16.mxu0 %v2836_v43  ;;  %v2894_v42 = vld [vmem:[%s3974_s3 + $0x1f0] ss:$8 sps:$4 sm:$0xff]   ;;  %v2902_v43 = vld [vmem:[%s3972_s1 + $0x4] ss:$8 sps:$4 sm:$0xff]  }
  0x5b   : > { %806 = vmatpush1.bf16.msra.mxu1 %v2831_v44  ;;  %v2908_v44 = vld [vmem:[%s3975_s4 + $0x4] ss:$8 sps:$4 sm:$0xff]  }
  0x5c   : > { %1742 = vmatpush1.bf16.msra.mxu0 %v2834_v45  ;;  %807 = vmatprep.subr.bf16.mxu1 %v2839_v46  ;;  %v420_v45 = vor.u32 %v419_v38, %v415_v37  ;;  %v1355_v46 = vor.u32 %v1354_v40, %v1351_v39  ;;  %v2983_v37 = vld [vmem:[%s3972_s1 + $0xd4] ss:$8 sps:$4 sm:$0xff]   ;;  %v2981_v39 = vld [vmem:[%s3972_s1 + $0xd0] ss:$8 sps:$4 sm:$0xff]  }
  0x5d   : > { %1743 = vmatprep.subr.bf16.mxu0 %v2842_v47  ;;  %v2900_v47 = vld [vmem:[%s3972_s1] ss:$8 sps:$4 sm:$0xff]   ;;  %v2986_v38 = vld [vmem:[%s3975_s4 + $0xd4] ss:$8 sps:$4 sm:$0xff]   ;;  %v2984_v40 = vld [vmem:[%s3975_s4 + $0xd0] ss:$8 sps:$4 sm:$0xff]  }
  0x5f   : > { %808 = vmatpush1.bf16.msra.mxu1 %v2837_v48  ;;  %v2906_v48 = vld [vmem:[%s3975_s4] ss:$8 sps:$4 sm:$0xff]  }
  0x60   : > { %1744 = vmatpush1.bf16.msra.mxu0 %v2840_v50  ;;  %809 = vmatprep.subr.bf16.mxu1 %v2845_v51  ;;  %v2911_v50 = vld [vmem:[%s3972_s1 + $0x14] ss:$8 sps:$4 sm:$0xff]  }
  0x61   : > { %1745 = vmatprep.subr.bf16.mxu0 %v2848_v52  ;;  %v2914_v51 = vld [vmem:[%s3975_s4 + $0x14] ss:$8 sps:$4 sm:$0xff]   ;;  %v2909_v52 = vld [vmem:[%s3972_s1 + $0x10] ss:$8 sps:$4 sm:$0xff]  }
  0x63   : > { %810 = vmatpush1.bf16.msra.mxu1 %v2843_v53  ;;  %v2912_v53 = vld [vmem:[%s3975_s4 + $0x10] ss:$8 sps:$4 sm:$0xff]  }
  0x64   : > { %1746 = vmatpush1.bf16.msra.mxu0 %v2846_v54  ;;  %811 = vmatprep.subr.bf16.mxu1 %v2851_v56  ;;  %v2917_v54 = vld [vmem:[%s3972_s1 + $0x24] ss:$8 sps:$4 sm:$0xff]  }
  0x65   : > { %1747 = vmatprep.subr.bf16.mxu0 %v2854_v57  ;;  %v2920_v56 = vld [vmem:[%s3975_s4 + $0x24] ss:$8 sps:$4 sm:$0xff]   ;;  %v2915_v57 = vld [vmem:[%s3972_s1 + $0x20] ss:$8 sps:$4 sm:$0xff]  }
  0x67   : > { %812 = vmatpush1.bf16.msra.mxu1 %v2849_v61  ;;  %v3004_v61 = vld [vmem:[%s3301_s30 + $0x4] ss:$16 sps:$4 sm:$0x7c]  }
  0x68   : > { %1748 = vmatpush1.bf16.msra.mxu0 %v2852_v62  ;;  %813 = vmatprep.subr.bf16.mxu1 %v2857_v2  ;;  %v2924_v62 = vld [vmem:[%s3975_s4 + $0x30] ss:$8 sps:$4 sm:$0xff]   ;;  %v1863_v1 = vrot.slane %v3004_v61, 2  ;;  %v2927_v2 = vld [vmem:[%s3972_s1 + $0x40] ss:$8 sps:$4 sm:$0xff]  }
  0x69   : > { %1749 = vmatprep.subr.bf16.mxu0 %v2860_v3  ;;  %v2930_v3 = vld [vmem:[%s3975_s4 + $0x40] ss:$8 sps:$4 sm:$0xff]   ;;  %v3008_v61 = vld [vmem:[%s3972_s1 + $0x110] ss:$8 sps:$4 sm:$0xff]  }
  0x6b   : > { %814 = vmatpush1.bf16.msra.mxu1 %v2855_v7  ;;  %v2936_v7 = vld [vmem:[%s3975_s4 + $0x50] ss:$8 sps:$4 sm:$0xff]  }
  0x6c   : > { %1750 = vmatpush1.bf16.msra.mxu0 %v2858_v8  ;;  %815 = vmatprep.subr.bf16.mxu1 %v2863_v10  ;;  %v2941_v8 = vld [vmem:[%s3972_s1 + $0x64] ss:$8 sps:$4 sm:$0xff]   ;;  %v2939_v10 = vld [vmem:[%s3972_s1 + $0x60] ss:$8 sps:$4 sm:$0xff]  }
  0x6d   : > { %1751 = vmatprep.subr.bf16.mxu0 %v2866_v11  ;;  %v2942_v11 = vld [vmem:[%s3975_s4 + $0x60] ss:$8 sps:$4 sm:$0xff]  }
  0x6f   : > { %816 = vmatpush1.bf16.msra.mxu1 %v2861_v12  ;;  %v2947_v12 = vld [vmem:[%s3972_s1 + $0x74] ss:$8 sps:$4 sm:$0xff]  }
  0x70   : > { %1752 = vmatpush1.bf16.msra.mxu0 %v2864_v13  ;;  %817 = vmatprep.subr.bf16.mxu1 %v2869_v14  ;;  %v2950_v13 = vld [vmem:[%s3975_s4 + $0x74] ss:$8 sps:$4 sm:$0xff]   ;;  %v2945_v14 = vld [vmem:[%s3972_s1 + $0x70] ss:$8 sps:$4 sm:$0xff]  }
  0x71   : > { %1753 = vmatprep.subr.bf16.mxu0 %v2872_v15  ;;  %v2948_v15 = vld [vmem:[%s3975_s4 + $0x70] ss:$8 sps:$4 sm:$0xff]  }
  0x73   : > { %818 = vmatpush1.bf16.msra.mxu1 %v2867_v16  ;;  %v2953_v16 = vld [vmem:[%s3972_s1 + $0x84] ss:$8 sps:$4 sm:$0xff]  }
  0x74   : > { %1754 = vmatpush1.bf16.msra.mxu0 %v2870_v17  ;;  %819 = vmatprep.subr.bf16.mxu1 %v2875_v18  ;;  %v2956_v17 = vld [vmem:[%s3975_s4 + $0x84] ss:$8 sps:$4 sm:$0xff]   ;;  %v2951_v18 = vld [vmem:[%s3972_s1 + $0x80] ss:$8 sps:$4 sm:$0xff]  }
  0x75   : > { %1755 = vmatprep.subr.bf16.mxu0 %v2878_v19  ;;  %v2954_v19 = vld [vmem:[%s3975_s4 + $0x80] ss:$8 sps:$4 sm:$0xff]  }
  0x77   : > { %820 = vmatpush1.bf16.msra.mxu1 %v2873_v20  ;;  %v2959_v20 = vld [vmem:[%s3972_s1 + $0x94] ss:$8 sps:$4 sm:$0xff]  }
  0x78   : > { %1756 = vmatpush1.bf16.msra.mxu0 %v2876_v21  ;;  %821 = vmatprep.subr.bf16.mxu1 %v2881_v22  ;;  %v2962_v21 = vld [vmem:[%s3975_s4 + $0x94] ss:$8 sps:$4 sm:$0xff]   ;;  %v2957_v22 = vld [vmem:[%s3972_s1 + $0x90] ss:$8 sps:$4 sm:$0xff]  }
  0x79   : > { %1757 = vmatprep.subr.bf16.mxu0 %v2884_v23  ;;  %v2960_v23 = vld [vmem:[%s3975_s4 + $0x90] ss:$8 sps:$4 sm:$0xff]  }
  0x7b   : > { %822 = vmatpush1.bf16.msra.mxu1 %v2879_v26  ;;  %v2968_v26 = vld [vmem:[%s3975_s4 + $0xa4] ss:$8 sps:$4 sm:$0xff]  }
  0x7c   : > { %1758 = vmatpush1.bf16.msra.mxu0 %v2882_v27  ;;  %823 = vmatprep.subr.bf16.mxu1 %v2887_v28  ;;  %v2963_v27 = vld [vmem:[%s3972_s1 + $0xa0] ss:$8 sps:$4 sm:$0xff]  }
  0x7d   : > { %1759 = vmatprep.subr.bf16.mxu0 %v2890_v29  ;;  %v2966_v28 = vld [vmem:[%s3975_s4 + $0xa0] ss:$8 sps:$4 sm:$0xff]   ;;  %v2971_v29 = vld [vmem:[%s3972_s1 + $0xb4] ss:$8 sps:$4 sm:$0xff]  }
  0x7f   : > { %824 = vmatpush1.bf16.msra.mxu1 %v2885_v33  ;;  %v2977_v33 = vld [vmem:[%s3972_s1 + $0xc4] ss:$8 sps:$4 sm:$0xff]  }
  0x80   : > { %1760 = vmatpush1.bf16.msra.mxu0 %v2888_v34  ;;  %825 = vmatprep.subr.bf16.mxu1 %v2893_v35  ;;  %v2980_v34 = vld [vmem:[%s3975_s4 + $0xc4] ss:$8 sps:$4 sm:$0xff]   ;;  %v2975_v35 = vld [vmem:[%s3972_s1 + $0xc0] ss:$8 sps:$4 sm:$0xff]  }
  0x81   : > { %1761 = vmatprep.subr.bf16.mxu0 %v2896_v36  ;;  %v2978_v36 = vld [vmem:[%s3975_s4 + $0xc0] ss:$8 sps:$4 sm:$0xff]  }
  0x83   : > { %826 = vmatpush1.bf16.msra.mxu1 %v2891_v41  ;;  %v2989_v41 = vld [vmem:[%s3972_s1 + $0xe4] ss:$8 sps:$4 sm:$0xff]  }
  0x84   : > { %1762 = vmatpush1.bf16.msra.mxu0 %v2894_v42  ;;  %1162 = vmatprep.subr.bf16.mxu1 %v2902_v43  ;;  %v2992_v42 = vld [vmem:[%s3975_s4 + $0xe4] ss:$8 sps:$4 sm:$0xff]   ;;  %v2987_v43 = vld [vmem:[%s3972_s1 + $0xe0] ss:$8 sps:$4 sm:$0xff]  }
  0x85   : > { %2190 = vmatprep.subr.bf16.mxu0 %v2908_v44  ;;  %v2990_v44 = vld [vmem:[%s3975_s4 + $0xe0] ss:$8 sps:$4 sm:$0xff]  }
  0x86   : > { %828 = vmatmul.mubr.bf16.vlgmr.msra.gmra.mrb[0].mxu1 %v420_v45  ;;  %v2995_v45 = vld [vmem:[%s3972_s1 + $0xf4] ss:$8 sps:$4 sm:$0xff]  }
  0x87   : > { %1764 = vmatmul.mubr.bf16.vlgmr.msra.gmra.mrb[0].mxu0 %v1355_v46  ;;  %1163 = vmatpush1.bf16.msra.mxu1 %v2900_v47  ;;  %v2998_v46 = vld [vmem:[%s3975_s4 + $0xf4] ss:$8 sps:$4 sm:$0xff]   ;;  %v3002_v47 = vld [vmem:[%s3301_s30] ss:$16 sps:$4 sm:$0x7c]  }
  0x88   : > { %2191 = vmatpush1.bf16.msra.mxu0 %v2906_v48  ;;  %1164 = vmatprep.subr.bf16.mxu1 %v2911_v50  ;;  %v2993_v48 = vld [vmem:[%s3972_s1 + $0xf0] ss:$8 sps:$4 sm:$0xff]  }
  0x89   : > { %2192 = vmatprep.subr.bf16.mxu0 %v2914_v51  ;;  %1194 = vmatprep.mubr.bf16.mxu1 %v3313_v49  ;;  %v2926_v49 = vld [vmem:[%s3975_s4 + $0x34] ss:$8 sps:$4 sm:$0xff]   ;;  %v2996_v50 = vld [vmem:[%s3975_s4 + $0xf0] ss:$8 sps:$4 sm:$0xff]   ;;  %v3001_v51 = vld [vmem:[%s3972_s1 + $0x104] ss:$8 sps:$4 sm:$0xff]  }
  0x8a   : > { %2222 = vmatprep.mubr.bf16.mxu0 %v1863_v1  ;;  %v3014_v1 = vld [vmem:[%s3972_s1 + $0x120] ss:$8 sps:$4 sm:$0xff]  }
  0x8b   : > { %1165 = vmatpush1.bf16.msra.mxu1 %v2909_v52  ;;  %v3007_v52 = vld [vmem:[%s3975_s4 + $0x104] ss:$8 sps:$4 sm:$0xff]  }
  0x8c   : > { %2193 = vmatpush1.bf16.msra.mxu0 %v2912_v53  ;;  %1166 = vmatprep.subr.bf16.mxu1 %v2917_v54  ;;  %v3100_v53 = vld [vmem:[%s3301_s30 + $0xc] ss:$16 sps:$4 sm:$0x7c]   ;;  %v1862_v54 = vrot.slane %v3002_v47, 2 }
  0x8d   : > { %2194 = vmatprep.subr.bf16.mxu0 %v2920_v56  ;;  %v2999_v56 = vld [vmem:[%s3972_s1 + $0x100] ss:$8 sps:$4 sm:$0xff]   ;;  %v3088_v47 = vld [vmem:[%s3972_s1 + $0x1e4] ss:$8 sps:$4 sm:$0xff]  }
  0x8f   : > { %1167 = vmatpush1.bf16.msra.mxu1 %v2915_v57  ;;  %v3005_v57 = vld [vmem:[%s3975_s4 + $0x100] ss:$8 sps:$4 sm:$0xff]  }
  0x90   : > { %2195 = vmatpush1.bf16.msra.mxu0 %v2918_v58  ;;  %1168 = vmatprep.subr.bf16.mxu1 %v2923_v59  ;;  %v3010_v58 = vld [vmem:[%s3972_s1 + $0x114] ss:$8 sps:$4 sm:$0xff]  }
  0x91   : > { %2196 = vmatprep.subr.bf16.mxu0 %v2926_v49  ;;  %v3013_v59 = vld [vmem:[%s3975_s4 + $0x114] ss:$8 sps:$4 sm:$0xff]   ;;  %v1865_v49 = vrot.slane %v3100_v53, 2 }
  0x92   : > { %v3097_v53 = vld [vmem:[%s3975_s4 + $0x1f4] ss:$8 sps:$4 sm:$0xff]  }
  0x93   : > { %1169 = vmatpush1.bf16.msra.mxu1 %v2921_v60  ;;  %v3101_v60 = vld [vmem:[%s3301_s30] ss:$16 sps:$4 sm:$0x1f]  }
  0x94   : > { %2197 = vmatpush1.bf16.msra.mxu0 %v2924_v62  ;;  %1170 = vmatprep.subr.bf16.mxu1 %v2929_v63  ;;  %v3011_v62 = vld [vmem:[%s3975_s4 + $0x110] ss:$8 sps:$4 sm:$0xff]   ;;  %v3016_v63 = vld [vmem:[%s3972_s1 + $0x124] ss:$8 sps:$4 sm:$0xff]  }
  0x95   : > { %2198 = vmatprep.subr.bf16.mxu0 %v2932_v0  ;;  %v3019_v0 = vld [vmem:[%s3975_s4 + $0x124] ss:$8 sps:$4 sm:$0xff]  }
  0x97   : > { %1171 = vmatpush1.bf16.msra.mxu1 %v2927_v2  ;;  %v3017_v2 = vld [vmem:[%s3975_s4 + $0x120] ss:$8 sps:$4 sm:$0xff]  }
  0x98   : > { %2199 = vmatpush1.bf16.msra.mxu0 %v2930_v3  ;;  %1172 = vmatprep.subr.bf16.mxu1 %v2935_v4  ;;  %v3022_v3 = vld [vmem:[%s3972_s1 + $0x134] ss:$8 sps:$4 sm:$0xff]   ;;  %v3020_v4 = vld [vmem:[%s3972_s1 + $0x130] ss:$8 sps:$4 sm:$0xff]  }
  0x99   : > { %2200 = vmatprep.subr.bf16.mxu0 %v2938_v5  ;;  %v3023_v5 = vld [vmem:[%s3975_s4 + $0x130] ss:$8 sps:$4 sm:$0xff]  }
  0x9b   : > { %1173 = vmatpush1.bf16.msra.mxu1 %v2933_v6  ;;  %v3028_v6 = vld [vmem:[%s3972_s1 + $0x144] ss:$8 sps:$4 sm:$0xff]  }
  0x9c   : > { %2201 = vmatpush1.bf16.msra.mxu0 %v2936_v7  ;;  %1174 = vmatprep.subr.bf16.mxu1 %v2941_v8  ;;  %v3031_v7 = vld [vmem:[%s3975_s4 + $0x144] ss:$8 sps:$4 sm:$0xff]   ;;  %v3026_v8 = vld [vmem:[%s3972_s1 + $0x140] ss:$8 sps:$4 sm:$0xff]  }
  0x9d   : > { %2202 = vmatprep.subr.bf16.mxu0 %v2944_v9  ;;  %v3029_v9 = vld [vmem:[%s3975_s4 + $0x140] ss:$8 sps:$4 sm:$0xff]  }
  0x9f   : > { %1175 = vmatpush1.bf16.msra.mxu1 %v2939_v10  ;;  %v3034_v10 = vld [vmem:[%s3972_s1 + $0x154] ss:$8 sps:$4 sm:$0xff]  }
  0xa0   : > { %2203 = vmatpush1.bf16.msra.mxu0 %v2942_v11  ;;  %1176 = vmatprep.subr.bf16.mxu1 %v2947_v12  ;;  %v3037_v11 = vld [vmem:[%s3975_s4 + $0x154] ss:$8 sps:$4 sm:$0xff]   ;;  %v3032_v12 = vld [vmem:[%s3972_s1 + $0x150] ss:$8 sps:$4 sm:$0xff]  }
  0xa1   : > { %2204 = vmatprep.subr.bf16.mxu0 %v2950_v13  ;;  %v3035_v13 = vld [vmem:[%s3975_s4 + $0x150] ss:$8 sps:$4 sm:$0xff]  }
  0xa3   : > { %1177 = vmatpush1.bf16.msra.mxu1 %v2945_v14  ;;  %v3040_v14 = vld [vmem:[%s3972_s1 + $0x164] ss:$8 sps:$4 sm:$0xff]  }
  0xa4   : > { %2205 = vmatpush1.bf16.msra.mxu0 %v2948_v15  ;;  %1178 = vmatprep.subr.bf16.mxu1 %v2953_v16  ;;  %v3043_v15 = vld [vmem:[%s3975_s4 + $0x164] ss:$8 sps:$4 sm:$0xff]   ;;  %v3038_v16 = vld [vmem:[%s3972_s1 + $0x160] ss:$8 sps:$4 sm:$0xff]  }
  0xa5   : > { %2206 = vmatprep.subr.bf16.mxu0 %v2956_v17  ;;  %v3041_v17 = vld [vmem:[%s3975_s4 + $0x160] ss:$8 sps:$4 sm:$0xff]  }
  0xa7   : > { %1179 = vmatpush1.bf16.msra.mxu1 %v2951_v18  ;;  %v3046_v18 = vld [vmem:[%s3972_s1 + $0x174] ss:$8 sps:$4 sm:$0xff]  }
  0xa8   : > { %2207 = vmatpush1.bf16.msra.mxu0 %v2954_v19  ;;  %1180 = vmatprep.subr.bf16.mxu1 %v2959_v20  ;;  %v3049_v19 = vld [vmem:[%s3975_s4 + $0x174] ss:$8 sps:$4 sm:$0xff]   ;;  %v3044_v20 = vld [vmem:[%s3972_s1 + $0x170] ss:$8 sps:$4 sm:$0xff]  }
  0xa9   : > { %2208 = vmatprep.subr.bf16.mxu0 %v2962_v21  ;;  %v3047_v21 = vld [vmem:[%s3975_s4 + $0x170] ss:$8 sps:$4 sm:$0xff]  }
  0xab   : > { %1181 = vmatpush1.bf16.msra.mxu1 %v2957_v22  ;;  %v3052_v22 = vld [vmem:[%s3972_s1 + $0x184] ss:$8 sps:$4 sm:$0xff]  }
  0xac   : > { %2209 = vmatpush1.bf16.msra.mxu0 %v2960_v23  ;;  %1182 = vmatprep.subr.bf16.mxu1 %v2965_v25  ;;  %v3055_v23 = vld [vmem:[%s3975_s4 + $0x184] ss:$8 sps:$4 sm:$0xff]   ;;  %v3050_v25 = vld [vmem:[%s3972_s1 + $0x180] ss:$8 sps:$4 sm:$0xff]  }
  0xad   : > { %2210 = vmatprep.subr.bf16.mxu0 %v2968_v26  ;;  %v3053_v26 = vld [vmem:[%s3975_s4 + $0x180] ss:$8 sps:$4 sm:$0xff]  }
  0xaf   : > { %1183 = vmatpush1.bf16.msra.mxu1 %v2963_v27  ;;  %v3058_v27 = vld [vmem:[%s3972_s1 + $0x194] ss:$8 sps:$4 sm:$0xff]  }
  0xb0   : > { %2211 = vmatpush1.bf16.msra.mxu0 %v2966_v28  ;;  %1184 = vmatprep.subr.bf16.mxu1 %v2971_v29  ;;  %v3061_v28 = vld [vmem:[%s3975_s4 + $0x194] ss:$8 sps:$4 sm:$0xff]   ;;  %v3056_v29 = vld [vmem:[%s3972_s1 + $0x190] ss:$8 sps:$4 sm:$0xff]  }
  0xb1   : > { %2212 = vmatprep.subr.bf16.mxu0 %v2974_v30  ;;  %v3059_v30 = vld [vmem:[%s3975_s4 + $0x190] ss:$8 sps:$4 sm:$0xff]  }
  0xb3   : > { %1185 = vmatpush1.bf16.msra.mxu1 %v2969_v31  ;;  %v3064_v31 = vld [vmem:[%s3972_s1 + $0x1a4] ss:$8 sps:$4 sm:$0xff]  }
  0xb4   : > { %2213 = vmatpush1.bf16.msra.mxu0 %v2972_v32  ;;  %1186 = vmatprep.subr.bf16.mxu1 %v2977_v33  ;;  %v3067_v32 = vld [vmem:[%s3975_s4 + $0x1a4] ss:$8 sps:$4 sm:$0xff]   ;;  %v3062_v33 = vld [vmem:[%s3972_s1 + $0x1a0] ss:$8 sps:$4 sm:$0xff]  }
  0xb5   : > { %2214 = vmatprep.subr.bf16.mxu0 %v2980_v34  ;;  %v3065_v34 = vld [vmem:[%s3975_s4 + $0x1a0] ss:$8 sps:$4 sm:$0xff]  }
  0xb7   : > { %1187 = vmatpush1.bf16.msra.mxu1 %v2975_v35  ;;  %v3070_v35 = vld [vmem:[%s3972_s1 + $0x1b4] ss:$8 sps:$4 sm:$0xff]  }
  0xb8   : > { %2215 = vmatpush1.bf16.msra.mxu0 %v2978_v36  ;;  %1188 = vmatprep.subr.bf16.mxu1 %v2983_v37  ;;  %v3073_v36 = vld [vmem:[%s3975_s4 + $0x1b4] ss:$8 sps:$4 sm:$0xff]   ;;  %v3068_v37 = vld [vmem:[%s3972_s1 + $0x1b0] ss:$8 sps:$4 sm:$0xff]  }
  0xb9   : > { %2216 = vmatprep.subr.bf16.mxu0 %v2986_v38  ;;  %v3071_v38 = vld [vmem:[%s3975_s4 + $0x1b0] ss:$8 sps:$4 sm:$0xff]  }
  0xbb   : > { %1189 = vmatpush1.bf16.msra.mxu1 %v2981_v39  ;;  %v3076_v39 = vld [vmem:[%s3972_s1 + $0x1c4] ss:$8 sps:$4 sm:$0xff]  }
  0xbc   : > { %2217 = vmatpush1.bf16.msra.mxu0 %v2984_v40  ;;  %1190 = vmatprep.subr.bf16.mxu1 %v2989_v41  ;;  %v3079_v40 = vld [vmem:[%s3975_s4 + $0x1c4] ss:$8 sps:$4 sm:$0xff]   ;;  %v3074_v41 = vld [vmem:[%s3972_s1 + $0x1c0] ss:$8 sps:$4 sm:$0xff]  }
  0xbd   : > { %2218 = vmatprep.subr.bf16.mxu0 %v2992_v42  ;;  %v3077_v42 = vld [vmem:[%s3975_s4 + $0x1c0] ss:$8 sps:$4 sm:$0xff]  }
  0xbf   : > { %1191 = vmatpush1.bf16.msra.mxu1 %v2987_v43  ;;  %v3082_v43 = vld [vmem:[%s3972_s1 + $0x1d4] ss:$8 sps:$4 sm:$0xff]  }
  0xc0   : > { %2219 = vmatpush1.bf16.msra.mxu0 %v2990_v44  ;;  %1192 = vmatprep.subr.bf16.mxu1 %v2995_v45  ;;  %v3085_v44 = vld [vmem:[%s3975_s4 + $0x1d4] ss:$8 sps:$4 sm:$0xff]   ;;  %v3080_v45 = vld [vmem:[%s3972_s1 + $0x1d0] ss:$8 sps:$4 sm:$0xff]  }
  0xc1   : > { %2220 = vmatprep.subr.bf16.mxu0 %v2998_v46  ;;  %v3083_v46 = vld [vmem:[%s3975_s4 + $0x1d0] ss:$8 sps:$4 sm:$0xff]  }
  0xc3   : > { %1193 = vmatpush1.bf16.msra.mxu1 %v2993_v48  ;;  %v3091_v48 = vld [vmem:[%s3975_s4 + $0x1e4] ss:$8 sps:$4 sm:$0xff]  }
  0xc4   : > { %2221 = vmatpush1.bf16.msra.mxu0 %v2996_v50  ;;  %1205 = vmatprep.subr.bf16.mxu1 %v3001_v51  ;;  %v3086_v50 = vld [vmem:[%s3972_s1 + $0x1e0] ss:$8 sps:$4 sm:$0xff]  }
  0xc5   : > { %2233 = vmatprep.subr.bf16.mxu0 %v3007_v52  ;;  %v3089_v51 = vld [vmem:[%s3975_s4 + $0x1e0] ss:$8 sps:$4 sm:$0xff]   ;;  %v3094_v52 = vld [vmem:[%s3972_s1 + $0x1f4] ss:$8 sps:$4 sm:$0xff]  }
  0xc6   : > { %1195 = vmatmul.mubr.bf16.vlgmr.msra.gmra.mrb[0].mxu1 %v3101_v60 }
  0xc7   : > { %2223 = vmatmul.mubr.bf16.vlgmr.msra.gmra.mrb[0].mxu0 %v1862_v54  ;;  %1206 = vmatpush1.bf16.msra.mxu1 %v2999_v56  ;;  %v3098_v54 = vld [vmem:[%s3301_s30 + $0x8] ss:$16 sps:$4 sm:$0x7c]  }
  0xc8   : > { %2234 = vmatpush1.bf16.msra.mxu0 %v3005_v57  ;;  %1207 = vmatprep.subr.bf16.mxu1 %v3010_v58  ;;  %v3092_v56 = vld [vmem:[%s3972_s1 + $0x1f0] ss:$8 sps:$4 sm:$0xff]   ;;  %v1864_v58 = vrot.slane %v3098_v54, 2 }
  0xc9   : > { %2235 = vmatprep.subr.bf16.mxu0 %v3013_v59  ;;  %1237 = vmatprep.mubr.bf16.mxu1 %v3462_v55  ;;  %v3025_v55 = vld [vmem:[%s3975_s4 + $0x134] ss:$8 sps:$4 sm:$0xff]   ;;  %v3095_v57 = vld [vmem:[%s3975_s4 + $0x1f0] ss:$8 sps:$4 sm:$0xff]   ;;  %v2282_v59 = vlaneseq }
  0xca   : > { %2265 = vmatprep.mubr.bf16.mxu0 %v1865_v49 }
  0xcb   : > { %1208 = vmatpush1.bf16.msra.mxu1 %v3008_v61  ;;  %v2283_v49 = vshrl.u32 %v2282_v59, 7  ;;  %v2280_v61 = vld [vmem:[%s3976_s5] sm:$0x3] }
  0xcc   : > { %2236 = vmatpush1.bf16.msra.mxu0 %v3011_v62  ;;  %1209 = vmatprep.subr.bf16.mxu1 %v3016_v63 }
  0xcd   : > { %2237 = vmatprep.subr.bf16.mxu0 %v3019_v0  ;;  %v2284_v60 = vsub.s32 0, %v2283_v49  ;;  %v2288_v62 = vsub.s32 1, %v2283_v49 }
  0xcf   : > { %1210 = vmatpush1.bf16.msra.mxu1 %v3014_v1  ;;  %v2285_v63 = vrot.slane %v2280_v61, %v2284_v60 }
  0xd0   : > { %2238 = vmatpush1.bf16.msra.mxu0 %v3017_v2  ;;  %1211 = vmatprep.subr.bf16.mxu1 %v3022_v3  ;;  %v2289_v2 = vrot.slane %v2280_v61, %v2288_v62 }
  0xd1   : > { %2239 = vmatprep.subr.bf16.mxu0 %v3025_v55 }
  0xd3   : > { %1212 = vmatpush1.bf16.msra.mxu1 %v3020_v4 }
  0xd4   : > { %2240 = vmatpush1.bf16.msra.mxu0 %v3023_v5  ;;  %1213 = vmatprep.subr.bf16.mxu1 %v3028_v6 }
  0xd5   : > { %2241 = vmatprep.subr.bf16.mxu0 %v3031_v7 }
  0xd7   : > { %1214 = vmatpush1.bf16.msra.mxu1 %v3026_v8 }
  0xd8   : > { %2242 = vmatpush1.bf16.msra.mxu0 %v3029_v9  ;;  %1215 = vmatprep.subr.bf16.mxu1 %v3034_v10 }
  0xd9   : > { %2243 = vmatprep.subr.bf16.mxu0 %v3037_v11 }
  0xdb   : > { %1216 = vmatpush1.bf16.msra.mxu1 %v3032_v12 }
  0xdc   : > { %2244 = vmatpush1.bf16.msra.mxu0 %v3035_v13  ;;  %1217 = vmatprep.subr.bf16.mxu1 %v3040_v14 }
  0xdd   : > { %2245 = vmatprep.subr.bf16.mxu0 %v3043_v15 }
  0xdf   : > { %1218 = vmatpush1.bf16.msra.mxu1 %v3038_v16 }
  0xe0   : > { %2246 = vmatpush1.bf16.msra.mxu0 %v3041_v17  ;;  %1219 = vmatprep.subr.bf16.mxu1 %v3046_v18 }
  0xe1   : > { %2247 = vmatprep.subr.bf16.mxu0 %v3049_v19 }
  0xe3   : > { %1220 = vmatpush1.bf16.msra.mxu1 %v3044_v20  ;;  %v2320_v20 = vld [vmem:[%s251_s11 + $0x8] sm:$0x11] }
  0xe4   : > { %2248 = vmatpush1.bf16.msra.mxu0 %v3047_v21  ;;  %1221 = vmatprep.subr.bf16.mxu1 %v3052_v22 }
  0xe5   : > { %2249 = vmatprep.subr.bf16.mxu0 %v3055_v23 }
  0xe7   : > { %1222 = vmatpush1.bf16.msra.mxu1 %v3050_v25 }
  0xe8   : > { %2250 = vmatpush1.bf16.msra.mxu0 %v3053_v26  ;;  %1223 = vmatprep.subr.bf16.mxu1 %v3058_v27 }
  0xe9   : > { %2251 = vmatprep.subr.bf16.mxu0 %v3061_v28 }
  0xeb   : > { %1224 = vmatpush1.bf16.msra.mxu1 %v3056_v29 }
  0xec   : > { %2252 = vmatpush1.bf16.msra.mxu0 %v3059_v30  ;;  %1225 = vmatprep.subr.bf16.mxu1 %v3064_v31 }
  0xed   : > { %2253 = vmatprep.subr.bf16.mxu0 %v3067_v32 }
  0xef   : > { %1226 = vmatpush1.bf16.msra.mxu1 %v3062_v33 }
  0xf0   : > { %2254 = vmatpush1.bf16.msra.mxu0 %v3065_v34  ;;  %1227 = vmatprep.subr.bf16.mxu1 %v3070_v35 }
  0xf1   : > { %2255 = vmatprep.subr.bf16.mxu0 %v3073_v36 }
  0xf3   : > { %1228 = vmatpush1.bf16.msra.mxu1 %v3068_v37 }
  0xf4   : > { %2256 = vmatpush1.bf16.msra.mxu0 %v3071_v38  ;;  %1229 = vmatprep.subr.bf16.mxu1 %v3076_v39 }
  0xf5   : > { %2257 = vmatprep.subr.bf16.mxu0 %v3079_v40 }
  0xf7   : > { %1230 = vmatpush1.bf16.msra.mxu1 %v3074_v41 }
  0xf8   : > { %2258 = vmatpush1.bf16.msra.mxu0 %v3077_v42  ;;  %1231 = vmatprep.subr.bf16.mxu1 %v3082_v43 }
  0xf9   : > { %2259 = vmatprep.subr.bf16.mxu0 %v3085_v44 }
  0xfb   : > { %1232 = vmatpush1.bf16.msra.mxu1 %v3080_v45 }
  0xfc   : > { %2260 = vmatpush1.bf16.msra.mxu0 %v3083_v46  ;;  %1233 = vmatprep.subr.bf16.mxu1 %v3088_v47 }
  0xfd   : > { %2261 = vmatprep.subr.bf16.mxu0 %v3091_v48 }
  0xff   : > { %1234 = vmatpush1.bf16.msra.mxu1 %v3086_v50 }
 0x100   : > { %2262 = vmatpush1.bf16.msra.mxu0 %v3089_v51  ;;  %1235 = vmatprep.subr.bf16.mxu1 %v3094_v52 }
 0x101   : > { %2263 = vmatprep.subr.bf16.mxu0 %v3097_v53 }
 0x103   : > { %1236 = vmatpush1.bf16.msra.mxu1 %v3092_v56 }
 0x104   : > { %2264 = vmatpush1.bf16.msra.mxu0 %v3095_v57 }
 0x106   : > { %1238 = vmatmul.mubr.bf16.vlgmr.msra.gmra.mrb[0].mxu1 %v3534_v24 }
 0x107   : > { %2266 = vmatmul.mubr.bf16.vlgmr.msra.gmra.mrb[0].mxu0 %v1864_v58 }
 0x1d9   : > { %v1239_v0 = vpop.f32.mrb[0].mxu1 }
 0x1da   : > { %v2267_v1 = vpop.f32.mrb[0].mxu0  ;;  %v1241_v55 = vpop.f32.mrb[1].mxu1 }
 0x1db   : > { %v2663_v3 = vadd.f32 %v2267_v1, %v1239_v0  ;;  %v2269_v4 = vpop.f32.mrb[1].mxu0  ;;  %v1243_v6 = vpop.f32.mrb[2].mxu1 }
 0x1dc   : > { %v2664_v5 = vadd.f32 %v2269_v4, %v1241_v55  ;;  %v2271_v24 = vpop.f32.mrb[2].mxu0  ;;  %v1245_v9 = vpop.f32.mrb[3].mxu1 }
 0x1dd   : > { %v2292_v7 = vadd.f32 %v2663_v3, %v2285_v63  ;;  %v2665_v8 = vadd.f32 %v2271_v24, %v1243_v6  ;;  %v2273_v10 = vpop.f32.mrb[3].mxu0 }
 0x1de   : > { %v2293_v11 = vadd.f32 %v2664_v5, %v2289_v2  ;;  %v2666_v12 = vadd.f32 %v2273_v10, %v1245_v9 }
 0x1df   : > { %v2296_v13 = vmax.f32 %v2292_v7, 0.0  ;;  %v2294_v14 = vadd.f32 %v2665_v8, %v2285_v63 }
 0x1e0   : > { %v2297_v15 = vmax.f32 %v2293_v11, 0.0  ;;  %v2295_v16 = vadd.f32 %v2666_v12, %v2289_v2 }
 0x1e1   : > { %v2298_v17 = vmax.f32 %v2294_v14, 0.0 }
 0x1e2   : > { %v2661_v18 = vpack.c.bf16 %v2297_v15, %v2296_v13  ;;  %v2299_v19 = vmax.f32 %v2295_v16, 0.0 }
 0x1e4   : > { %2312 = vst [vmem:[%s251_s11] sm:$0xff] %v2661_v18  ;;  %v2662_v21 = vpack.c.bf16 %v2299_v19, %v2298_v17 }
 0x1e6   : > { %v2321_v22 = vsel %vm2319_vm6, %v2662_v21, %v2320_v20 }
 0x1e7   : > { %2322 = vst [vmem:[%s251_s11 + $0x8] sm:$0x11] %v2321_v22 }
 0x1e8 PF: > { %s16_s21 = sadd.s32 1, %s3108_s21  }
 0x1e9   : > { %p13_p4 = scmp.ge.s32.totalorder %s16_s21, 4  }
 0x1eb   :  { %15 = sbr.rel (!%p13_p4) target bundleno = 1 (0x1), region = 74 }

// kernel: _lambda_.9
= control target key start
LH: loop header
LB: loop body
LE: loop exit
PB: predicated region body
PF: predicated region fallthrough
CT: control target
= control target key end

     0   :  { %s2035_s21 = smov 0   ;;  %s2542_s0 = inlined_call_operand.vmem [shape: bf16[2,13,256], index: 0, kind: input, shape index: {}]   ;;  %s2543_s1 = inlined_call_operand.vmem [shape: bf16[256,512], index: 1, kind: input, shape index: {}]   ;;  %s2544_s2 = inlined_call_operand.vmem [shape: bf16[256,256], index: 2, kind: input, shape index: {}]   ;;  %s2545_s3 = inlined_call_operand.vmem [shape: bf16[256,256], index: 3, kind: input, shape index: {}]   ;;  %s2546_s4 = inlined_call_operand.vmem [shape: bf16[256,128], index: 4, kind: input, shape index: {}]   ;;  %s2547_s5 = inlined_call_operand.vmem [shape: f32[1,512], index: 5, kind: input, shape index: {}]   ;;  %s2548_s6 = inlined_call_operand.vmem [shape: bf16[2,9,512], index: 6, kind: output, shape index: {}]  }
   0x1 LB: > { %s1574_s22 = sadd.s32 4294967295, %s1998_s21   ;;  %p1578_p0 = scmp.ge.s32.totalorder %s1998_s21, 1  ;;  %s1998_s21 = sphi %s2035_s21, %s16_s21  }
   0x2   : > { %p212_p1 = scmp.lt.s32.totalorder %s1998_s21, 3 }
   0x4   : > { %p213_p2 = pnand %p1578_p0, %p212_p1 }
   0x5   : > { %v1775_v0 = vld [vmem:[%s2543_s1 + $0x4] ss:$16 sps:$4 sm:$0xff] (!%p213_p2)   ;;  %v1777_v1 = vld [vmem:[%s2543_s1 + $0xc] ss:$16 sps:$4 sm:$0xff] (!%p213_p2)   ;;  %v1779_v2 = vld [vmem:[%s2543_s1] ss:$16 sps:$4 sm:$0xff] (!%p213_p2)  }
   0x6   : > { %216 = sbr.rel (%p213_p2) target bundleno = 393 (0x189), region = 44  ;;  %653 = vmatprep.subr.bf16.mxu0 (!%p213_p2), %v1775_v0  ;;  %v1780_v3 = vld [vmem:[%s2543_s1 + $0x8] ss:$16 sps:$4 sm:$0xff] (!%p213_p2)   ;;  %696 = vmatprep.subr.bf16.mxu1 (!%p213_p2), %v1777_v1  ;;  %v1781_v4 = vld [vmem:[%s2543_s1 + $0x24] ss:$16 sps:$4 sm:$0xff] (!%p213_p2)   ;;  %p242_p3 = scmp.lt.s32.totalorder (!%p213_p2), %s1574_s22, 1 }
   0x7   : > { %654 = vmatpush1.bf16.msra.mxu0 (!%p213_p2), %v1779_v2  ;;  %697 = vmatpush1.bf16.msra.mxu1 (!%p213_p2), %v1780_v3  ;;  %v1783_v5 = vld [vmem:[%s2543_s1 + $0x2c] ss:$16 sps:$4 sm:$0xff] (!%p213_p2)   ;;  %v1785_v6 = vld [vmem:[%s2543_s1 + $0x20] ss:$16 sps:$4 sm:$0xff] (!%p213_p2)   ;;  %v1786_v7 = vld [vmem:[%s2543_s1 + $0x28] ss:$16 sps:$4 sm:$0xff] (!%p213_p2)  }
   0x8   : > { %655 = vmatprep.subr.bf16.mxu0 (!%p213_p2), %v1781_v4  ;;  %698 = vmatprep.subr.bf16.mxu1 (!%p213_p2), %v1783_v5  ;;  %v1787_v8 = vld [vmem:[%s2543_s1 + $0x44] ss:$16 sps:$4 sm:$0xff] (!%p213_p2)   ;;  %v1789_v9 = vld [vmem:[%s2543_s1 + $0x4c] ss:$16 sps:$4 sm:$0xff] (!%p213_p2)   ;;  %v1791_v10 = vld [vmem:[%s2543_s1 + $0x40] ss:$16 sps:$4 sm:$0xff] (!%p213_p2)  }
   0x9   : > { %v1792_v11 = vld [vmem:[%s2543_s1 + $0x48] ss:$16 sps:$4 sm:$0xff] (!%p213_p2)   ;;  %v1793_v12 = vld [vmem:[%s2543_s1 + $0x64] ss:$16 sps:$4 sm:$0xff] (!%p213_p2)   ;;  %v1795_v13 = vld [vmem:[%s2543_s1 + $0x6c] ss:$16 sps:$4 sm:$0xff] (!%p213_p2)  }
   0xa   : > { %v1797_v14 = vld [vmem:[%s2543_s1 + $0x60] ss:$16 sps:$4 sm:$0xff] (!%p213_p2)   ;;  %v1798_v15 = vld [vmem:[%s2543_s1 + $0x68] ss:$16 sps:$4 sm:$0xff] (!%p213_p2)   ;;  %v1799_v16 = vld [vmem:[%s2543_s1 + $0x84] ss:$16 sps:$4 sm:$0xff] (!%p213_p2)  }
   0xb   : > { %656 = vmatpush1.bf16.msra.mxu0 (!%p213_p2), %v1785_v6  ;;  %699 = vmatpush1.bf16.msra.mxu1 (!%p213_p2), %v1786_v7  ;;  %v1801_v17 = vld [vmem:[%s2543_s1 + $0x8c] ss:$16 sps:$4 sm:$0xff] (!%p213_p2)   ;;  %v1803_v18 = vld [vmem:[%s2543_s1 + $0x80] ss:$16 sps:$4 sm:$0xff] (!%p213_p2)   ;;  %v1804_v19 = vld [vmem:[%s2543_s1 + $0x88] ss:$16 sps:$4 sm:$0xff] (!%p213_p2)  }
   0xc   : > { %657 = vmatprep.subr.bf16.mxu0 (!%p213_p2), %v1787_v8  ;;  %700 = vmatprep.subr.bf16.mxu1 (!%p213_p2), %v1789_v9  ;;  %v1805_v20 = vld [vmem:[%s2543_s1 + $0xa4] ss:$16 sps:$4 sm:$0xff] (!%p213_p2)   ;;  %v1807_v21 = vld [vmem:[%s2543_s1 + $0xac] ss:$16 sps:$4 sm:$0xff] (!%p213_p2)   ;;  %v1809_v22 = vld [vmem:[%s2543_s1 + $0xa0] ss:$16 sps:$4 sm:$0xff] (!%p213_p2)  }
   0xd   : > { %v1810_v23 = vld [vmem:[%s2543_s1 + $0xa8] ss:$16 sps:$4 sm:$0xff]   ;;  %v1811_v24 = vld [vmem:[%s2543_s1 + $0xc4] ss:$16 sps:$4 sm:$0xff]   ;;  %v1813_v25 = vld [vmem:[%s2543_s1 + $0xcc] ss:$16 sps:$4 sm:$0xff]  }
   0xe   : > { %v1815_v26 = vld [vmem:[%s2543_s1 + $0xc0] ss:$16 sps:$4 sm:$0xff]   ;;  %v1816_v27 = vld [vmem:[%s2543_s1 + $0xc8] ss:$16 sps:$4 sm:$0xff]   ;;  %v1817_v28 = vld [vmem:[%s2543_s1 + $0xe4] ss:$16 sps:$4 sm:$0xff]  }
   0xf   : > { %658 = vmatpush1.bf16.msra.mxu0 %v1791_v10  ;;  %701 = vmatpush1.bf16.msra.mxu1 %v1792_v11  ;;  %v1819_v29 = vld [vmem:[%s2543_s1 + $0xec] ss:$16 sps:$4 sm:$0xff]   ;;  %v1821_v30 = vld [vmem:[%s2543_s1 + $0xe0] ss:$16 sps:$4 sm:$0xff]   ;;  %v1822_v31 = vld [vmem:[%s2543_s1 + $0xe8] ss:$16 sps:$4 sm:$0xff]  }
  0x10   : > { %659 = vmatprep.subr.bf16.mxu0 %v1793_v12  ;;  %702 = vmatprep.subr.bf16.mxu1 %v1795_v13  ;;  %v1823_v32 = vld [vmem:[%s2543_s1 + $0x104] ss:$16 sps:$4 sm:$0xff]   ;;  %v1825_v33 = vld [vmem:[%s2543_s1 + $0x10c] ss:$16 sps:$4 sm:$0xff]   ;;  %v1827_v34 = vld [vmem:[%s2543_s1 + $0x100] ss:$16 sps:$4 sm:$0xff]  }
  0x11   : > { %v1828_v35 = vld [vmem:[%s2543_s1 + $0x108] ss:$16 sps:$4 sm:$0xff]   ;;  %v1829_v36 = vld [vmem:[%s2543_s1 + $0x124] ss:$16 sps:$4 sm:$0xff]   ;;  %v1831_v37 = vld [vmem:[%s2543_s1 + $0x12c] ss:$16 sps:$4 sm:$0xff]  }
  0x12   : > { %s2554_s22 = smov (!%p242_p3, %s1574_s22), 1  ;;  %v1833_v38 = vld [vmem:[%s2543_s1 + $0x120] ss:$16 sps:$4 sm:$0xff]   ;;  %v1834_v39 = vld [vmem:[%s2543_s1 + $0x128] ss:$16 sps:$4 sm:$0xff]   ;;  %vm1506_vm0 = vcmask 1040384  }
  0x13   : > { %660 = vmatpush1.bf16.msra.mxu0 %v1797_v14  ;;  %703 = vmatpush1.bf16.msra.mxu1 %v1798_v15  ;;  %v1835_v40 = vld [vmem:[%s2543_s1 + $0x144] ss:$16 sps:$4 sm:$0xff]   ;;  %v1837_v41 = vld [vmem:[%s2543_s1 + $0x14c] ss:$16 sps:$4 sm:$0xff]   ;;  %s1739_s17 = sshll.u32 %s2554_s22, 4  ;;  %s1740_s15 = sshll.u32 %s2554_s22, 5 }
  0x14   : > { %661 = vmatprep.subr.bf16.mxu0 %v1799_v16  ;;  %704 = vmatprep.subr.bf16.mxu1 %v1801_v17  ;;  %v1839_v42 = vld [vmem:[%s2543_s1 + $0x140] ss:$16 sps:$4 sm:$0xff]   ;;  %v1840_v43 = vld [vmem:[%s2543_s1 + $0x148] ss:$16 sps:$4 sm:$0xff]   ;;  %v1841_v44 = vld [vmem:[%s2543_s1 + $0x164] ss:$16 sps:$4 sm:$0xff]   ;;  %s2188_s28 = scalar_lea.vmem %s2542_s0, %s1739_s17  ;;  %s2511_s17 = scalar_lea.vmem %s2548_s6, %s1740_s15 }
  0x15   : > { %v1843_v45 = vld [vmem:[%s2543_s1 + $0x16c] ss:$16 sps:$4 sm:$0xff]   ;;  %v1845_v46 = vld [vmem:[%s2543_s1 + $0x160] ss:$16 sps:$4 sm:$0xff]   ;;  %v1846_v48 = vld [vmem:[%s2543_s1 + $0x168] ss:$16 sps:$4 sm:$0xff]  }
  0x16   : > { %v1871_v47 = vld [vmem:[%s2188_s28 + $0x4] ss:$8 sps:$4 sm:$0x1f]   ;;  %v1851_v51 = vld [vmem:[%s2543_s1 + $0x180] ss:$16 sps:$4 sm:$0xff]   ;;  %vm1509_vm2 = vcmask 1044484  }
  0x17   : > { %662 = vmatpush1.bf16.msra.mxu0 %v1803_v18  ;;  %705 = vmatpush1.bf16.msra.mxu1 %v1804_v19  ;;  %v1847_v49 = vld [vmem:[%s2543_s1 + $0x184] ss:$16 sps:$4 sm:$0xff]   ;;  %v1849_v50 = vld [vmem:[%s2543_s1 + $0x18c] ss:$16 sps:$4 sm:$0xff]   ;;  %v1852_v52 = vld [vmem:[%s2543_s1 + $0x188] ss:$16 sps:$4 sm:$0xff]  }
  0x18   : > { %663 = vmatprep.subr.bf16.mxu0 %v1805_v20  ;;  %706 = vmatprep.subr.bf16.mxu1 %v1807_v21  ;;  %v1853_v53 = vld [vmem:[%s2543_s1 + $0x1a4] ss:$16 sps:$4 sm:$0xff]   ;;  %v1855_v54 = vld [vmem:[%s2543_s1 + $0x1ac] ss:$16 sps:$4 sm:$0xff]   ;;  %v1857_v55 = vld [vmem:[%s2543_s1 + $0x1a0] ss:$16 sps:$4 sm:$0xff]  }
  0x19   : > { %685 = vmatprep.mubr.bf16.mxu0 %v1871_v47  ;;  %728 = vmatprep.mubr.bf16.mxu1 %v1871_v47  ;;  %v1858_v56 = vld [vmem:[%s2543_s1 + $0x1a8] ss:$16 sps:$4 sm:$0xff]   ;;  %v1859_v57 = vld [vmem:[%s2543_s1 + $0x1c4] ss:$16 sps:$4 sm:$0xff]   ;;  %v1861_v58 = vld [vmem:[%s2543_s1 + $0x1cc] ss:$16 sps:$4 sm:$0xff]  }
  0x1a   : > { %v1863_v59 = vld [vmem:[%s2543_s1 + $0x1c0] ss:$16 sps:$4 sm:$0xff]   ;;  %v1864_v60 = vld [vmem:[%s2543_s1 + $0x1c8] ss:$16 sps:$4 sm:$0xff]   ;;  %v1865_v61 = vld [vmem:[%s2543_s1 + $0x1e4] ss:$16 sps:$4 sm:$0xff]  }
  0x1b   : > { %664 = vmatpush1.bf16.msra.mxu0 %v1809_v22  ;;  %707 = vmatpush1.bf16.msra.mxu1 %v1810_v23  ;;  %v1867_v62 = vld [vmem:[%s2543_s1 + $0x1ec] ss:$16 sps:$4 sm:$0xff]   ;;  %v781_v63 = vshll.u32 %v1871_v47, 16  ;;  %v1869_v0 = vld [vmem:[%s2543_s1 + $0x1e0] ss:$16 sps:$4 sm:$0xff]   ;;  %v779_v5 = vshrl.u32 %v1871_v47, 16 }
  0x1c   : > { %665 = vmatprep.subr.bf16.mxu0 %v1811_v24  ;;  %708 = vmatprep.subr.bf16.mxu1 %v1813_v25  ;;  %v1870_v1 = vld [vmem:[%s2543_s1 + $0x1e8] ss:$16 sps:$4 sm:$0xff]   ;;  %v1876_v2 = vld [vmem:[%s2544_s2 + $0x4] ss:$8 sps:$4 sm:$0xff]   ;;  %v1882_v9 = vld [vmem:[%s2544_s2 + $0x14] ss:$8 sps:$4 sm:$0xff]  }
  0x1d   : > { %v1879_v3 = vld [vmem:[%s2545_s3 + $0x4] ss:$8 sps:$4 sm:$0xff]   ;;  %v2255_v4 = vld [vmem:[%s2188_s28] ss:$8 sps:$4 sm:$0x1f]   ;;  %v783_v6 = vrot.slane %v781_v63, 1 }
  0x1e   : > { %v1874_v7 = vld [vmem:[%s2544_s2] ss:$8 sps:$4 sm:$0xff]   ;;  %v1885_v10 = vld [vmem:[%s2545_s3 + $0x14] ss:$8 sps:$4 sm:$0xff]   ;;  %v1880_v12 = vld [vmem:[%s2544_s2 + $0x10] ss:$8 sps:$4 sm:$0xff]  }
  0x1f   : > { %666 = vmatpush1.bf16.msra.mxu0 %v1815_v26  ;;  %709 = vmatpush1.bf16.msra.mxu1 %v1816_v27  ;;  %v1877_v8 = vld [vmem:[%s2545_s3] ss:$8 sps:$4 sm:$0xff]   ;;  %v784_v11 = vor.u32 %v783_v6, %v779_v5  ;;  %v1883_v13 = vld [vmem:[%s2545_s3 + $0x10] ss:$8 sps:$4 sm:$0xff]   ;;  %v1888_v14 = vld [vmem:[%s2544_s2 + $0x24] ss:$8 sps:$4 sm:$0xff]  }
  0x20   : > { %667 = vmatprep.subr.bf16.mxu0 %v1817_v28  ;;  %710 = vmatprep.subr.bf16.mxu1 %v1819_v29  ;;  %v1891_v15 = vld [vmem:[%s2545_s3 + $0x24] ss:$8 sps:$4 sm:$0xff]   ;;  %v1886_v16 = vld [vmem:[%s2544_s2 + $0x20] ss:$8 sps:$4 sm:$0xff]   ;;  %v1894_v18 = vld [vmem:[%s2544_s2 + $0x34] ss:$8 sps:$4 sm:$0xff]  }
  0x21   : > { %v1889_v17 = vld [vmem:[%s2545_s3 + $0x20] ss:$8 sps:$4 sm:$0xff]   ;;  %v1897_v19 = vld [vmem:[%s2545_s3 + $0x34] ss:$8 sps:$4 sm:$0xff]   ;;  %v1892_v20 = vld [vmem:[%s2544_s2 + $0x30] ss:$8 sps:$4 sm:$0xff]  }
  0x22   : > { %v1895_v21 = vld [vmem:[%s2545_s3 + $0x30] ss:$8 sps:$4 sm:$0xff]   ;;  %v1900_v22 = vld [vmem:[%s2544_s2 + $0x44] ss:$8 sps:$4 sm:$0xff]   ;;  %v1898_v24 = vld [vmem:[%s2544_s2 + $0x40] ss:$8 sps:$4 sm:$0xff]  }
  0x23   : > { %668 = vmatpush1.bf16.msra.mxu0 %v1821_v30  ;;  %711 = vmatpush1.bf16.msra.mxu1 %v1822_v31  ;;  %v1903_v23 = vld [vmem:[%s2545_s3 + $0x44] ss:$8 sps:$4 sm:$0xff]   ;;  %v1901_v25 = vld [vmem:[%s2545_s3 + $0x40] ss:$8 sps:$4 sm:$0xff]   ;;  %v1906_v26 = vld [vmem:[%s2544_s2 + $0x54] ss:$8 sps:$4 sm:$0xff]  }
  0x24   : > { %669 = vmatprep.subr.bf16.mxu0 %v1823_v32  ;;  %712 = vmatprep.subr.bf16.mxu1 %v1825_v33  ;;  %v1909_v27 = vld [vmem:[%s2545_s3 + $0x54] ss:$8 sps:$4 sm:$0xff]   ;;  %v1904_v28 = vld [vmem:[%s2544_s2 + $0x50] ss:$8 sps:$4 sm:$0xff]   ;;  %v1912_v30 = vld [vmem:[%s2544_s2 + $0x64] ss:$8 sps:$4 sm:$0xff]  }
  0x25   : > { %v1907_v29 = vld [vmem:[%s2545_s3 + $0x50] ss:$8 sps:$4 sm:$0xff]   ;;  %v1915_v31 = vld [vmem:[%s2545_s3 + $0x64] ss:$8 sps:$4 sm:$0xff]   ;;  %v1910_v32 = vld [vmem:[%s2544_s2 + $0x60] ss:$8 sps:$4 sm:$0xff]  }
  0x26   : > { %v1913_v33 = vld [vmem:[%s2545_s3 + $0x60] ss:$8 sps:$4 sm:$0xff]   ;;  %v1955_v5 = vld [vmem:[%s2545_s3 + $0xd0] ss:$8 sps:$4 sm:$0xff]   ;;  %v1960_v6 = vld [vmem:[%s2544_s2 + $0xe4] ss:$8 sps:$4 sm:$0xff]  }
  0x27   : > { %670 = vmatpush1.bf16.msra.mxu0 %v1827_v34  ;;  %713 = vmatpush1.bf16.msra.mxu1 %v1828_v35  ;;  %v1918_v34 = vld [vmem:[%s2544_s2 + $0x74] ss:$8 sps:$4 sm:$0xff]   ;;  %v1972_v35 = vld [vmem:[%s2188_s28 + $0x4] ss:$8 sps:$4 sm:$0x3e]  }
  0x28   : > { %671 = vmatprep.subr.bf16.mxu0 %v1829_v36  ;;  %714 = vmatprep.subr.bf16.mxu1 %v1831_v37  ;;  %v1921_v36 = vld [vmem:[%s2545_s3 + $0x74] ss:$8 sps:$4 sm:$0xff]   ;;  %v1916_v37 = vld [vmem:[%s2544_s2 + $0x70] ss:$8 sps:$4 sm:$0xff]   ;;  %v1925_v47 = vld [vmem:[%s2545_s3 + $0x80] ss:$8 sps:$4 sm:$0xff]  }
  0x29   : > { %v1949_v63 = vld [vmem:[%s2545_s3 + $0xc0] ss:$8 sps:$4 sm:$0xff]   ;;  %vm1507_vm1 = vsmask.f32 256  ;;  %vm1510_vm3 = vsmask.f32 4352 }
  0x2a   : > { %vm2504_vm4 = vmand %vm1506_vm0, %vm1507_vm1 }
  0x2b   : > { %672 = vmatpush1.bf16.msra.mxu0 %v1833_v38  ;;  %715 = vmatpush1.bf16.msra.mxu1 %v1834_v39  ;;  %v1039_v38 = vshrl.u32 %v1972_v35, 16  ;;  %v1042_v39 = vshll.u32 %v1972_v35, 16  ;;  %v1984_v35 = vld [vmem:[%s2546_s4 + $0x28] sm:$0xff]   ;;  %vm2515_vm5 = vmand %vm1509_vm2, %vm1510_vm3 }
  0x2c   : > { %673 = vmatprep.subr.bf16.mxu0 %v1835_v40  ;;  %716 = vmatprep.subr.bf16.mxu1 %v1837_v41  ;;  %v1919_v40 = vld [vmem:[%s2545_s3 + $0x70] ss:$8 sps:$4 sm:$0xff]   ;;  %v1924_v41 = vld [vmem:[%s2544_s2 + $0x84] ss:$8 sps:$4 sm:$0xff]   ;;  %vm1512_vm6 = vmor %vm2515_vm5, %vm2504_vm4 }
  0x2f   : > { %674 = vmatpush1.bf16.msra.mxu0 %v1839_v42  ;;  %717 = vmatpush1.bf16.msra.mxu1 %v1840_v43  ;;  %v1041_v42 = vrot.slane %v1039_v38, 1  ;;  %v1044_v43 = vrot.slane %v1042_v39, 2  ;;  %v1987_v38 = vld [vmem:[%s2546_s4 + $0x78] sm:$0xff]   ;;  %v1989_v39 = vld [vmem:[%s2188_s28] ss:$8 sps:$4 sm:$0x7c]  }
  0x30   : > { %675 = vmatprep.subr.bf16.mxu0 %v1841_v44  ;;  %718 = vmatprep.subr.bf16.mxu1 %v1843_v45  ;;  %v1927_v44 = vld [vmem:[%s2545_s3 + $0x84] ss:$8 sps:$4 sm:$0xff]   ;;  %v1922_v45 = vld [vmem:[%s2544_s2 + $0x80] ss:$8 sps:$4 sm:$0xff]  }
  0x33   : > { %676 = vmatpush1.bf16.msra.mxu0 %v1845_v46  ;;  %719 = vmatpush1.bf16.msra.mxu1 %v1846_v48  ;;  %v1045_v46 = vor.u32 %v1044_v43, %v1041_v42  ;;  %v1930_v48 = vld [vmem:[%s2544_s2 + $0x94] ss:$8 sps:$4 sm:$0xff]  }
  0x34   : > { %677 = vmatprep.subr.bf16.mxu0 %v1847_v49  ;;  %720 = vmatprep.subr.bf16.mxu1 %v1849_v50  ;;  %v1933_v49 = vld [vmem:[%s2545_s3 + $0x94] ss:$8 sps:$4 sm:$0xff]   ;;  %v1928_v50 = vld [vmem:[%s2544_s2 + $0x90] ss:$8 sps:$4 sm:$0xff]  }
  0x37   : > { %678 = vmatpush1.bf16.msra.mxu0 %v1851_v51  ;;  %721 = vmatpush1.bf16.msra.mxu1 %v1852_v52  ;;  %v1931_v51 = vld [vmem:[%s2545_s3 + $0x90] ss:$8 sps:$4 sm:$0xff]   ;;  %v1936_v52 = vld [vmem:[%s2544_s2 + $0xa4] ss:$8 sps:$4 sm:$0xff]  }
  0x38   : > { %679 = vmatprep.subr.bf16.mxu0 %v1853_v53  ;;  %722 = vmatprep.subr.bf16.mxu1 %v1855_v54  ;;  %v1939_v53 = vld [vmem:[%s2545_s3 + $0xa4] ss:$8 sps:$4 sm:$0xff]   ;;  %v1934_v54 = vld [vmem:[%s2544_s2 + $0xa0] ss:$8 sps:$4 sm:$0xff]  }
  0x3b   : > { %680 = vmatpush1.bf16.msra.mxu0 %v1857_v55  ;;  %723 = vmatpush1.bf16.msra.mxu1 %v1858_v56  ;;  %v1937_v55 = vld [vmem:[%s2545_s3 + $0xa0] ss:$8 sps:$4 sm:$0xff]   ;;  %v1942_v56 = vld [vmem:[%s2544_s2 + $0xb4] ss:$8 sps:$4 sm:$0xff]  }
  0x3c   : > { %681 = vmatprep.subr.bf16.mxu0 %v1859_v57  ;;  %724 = vmatprep.subr.bf16.mxu1 %v1861_v58  ;;  %v1945_v57 = vld [vmem:[%s2545_s3 + $0xb4] ss:$8 sps:$4 sm:$0xff]   ;;  %v1940_v58 = vld [vmem:[%s2544_s2 + $0xb0] ss:$8 sps:$4 sm:$0xff]  }
  0x3f   : > { %682 = vmatpush1.bf16.msra.mxu0 %v1863_v59  ;;  %725 = vmatpush1.bf16.msra.mxu1 %v1864_v60  ;;  %v1943_v59 = vld [vmem:[%s2545_s3 + $0xb0] ss:$8 sps:$4 sm:$0xff]   ;;  %v1948_v60 = vld [vmem:[%s2544_s2 + $0xc4] ss:$8 sps:$4 sm:$0xff]  }
  0x40   : > { %683 = vmatprep.subr.bf16.mxu0 %v1865_v61  ;;  %726 = vmatprep.subr.bf16.mxu1 %v1867_v62  ;;  %v1951_v61 = vld [vmem:[%s2545_s3 + $0xc4] ss:$8 sps:$4 sm:$0xff]   ;;  %v1946_v62 = vld [vmem:[%s2544_s2 + $0xc0] ss:$8 sps:$4 sm:$0xff]  }
  0x43   : > { %684 = vmatpush1.bf16.msra.mxu0 %v1869_v0  ;;  %727 = vmatpush1.bf16.msra.mxu1 %v1870_v1  ;;  %v1954_v0 = vld [vmem:[%s2544_s2 + $0xd4] ss:$8 sps:$4 sm:$0xff]  }
  0x44   : > { %947 = vmatprep.subr.bf16.mxu0 %v1876_v2  ;;  %1208 = vmatprep.subr.bf16.mxu1 %v1879_v3  ;;  %v1957_v1 = vld [vmem:[%s2545_s3 + $0xd4] ss:$8 sps:$4 sm:$0xff]   ;;  %v1970_v2 = vld [vmem:[%s2188_s28] ss:$8 sps:$4 sm:$0x3e]  }
  0x45   : > { %v1952_v3 = vld [vmem:[%s2544_s2 + $0xd0] ss:$8 sps:$4 sm:$0xff]  }
  0x46   : > { %686 = vmatmul.mubr.bf16.vlgmr.msra.gmra.mrb[0].mxu0 %v2255_v4  ;;  %729 = vmatmul.mubr.bf16.vlgmr.msra.gmra.mrb[0].mxu1 %v2255_v4 }
  0x47   : > { %948 = vmatpush1.bf16.msra.mxu0 %v1874_v7  ;;  %1209 = vmatpush1.bf16.msra.mxu1 %v1877_v8  ;;  %v1963_v7 = vld [vmem:[%s2545_s3 + $0xe4] ss:$8 sps:$4 sm:$0xff]   ;;  %v774_v8 = vshll.u32 %v2255_v4, 16 }
  0x48   : > { %949 = vmatprep.subr.bf16.mxu0 %v1882_v9  ;;  %1210 = vmatprep.subr.bf16.mxu1 %v1885_v10  ;;  %v1031_v9 = vshrl.u32 %v1970_v2, 16  ;;  %v1034_v10 = vshll.u32 %v1970_v2, 16 }
  0x49   : > { %979 = vmatprep.mubr.bf16.mxu0 %v784_v11  ;;  %1240 = vmatprep.mubr.bf16.mxu1 %v1045_v46  ;;  %v1958_v11 = vld [vmem:[%s2544_s2 + $0xe0] ss:$8 sps:$4 sm:$0xff]  }
  0x4b   : > { %950 = vmatpush1.bf16.msra.mxu0 %v1880_v12  ;;  %1211 = vmatpush1.bf16.msra.mxu1 %v1883_v13  ;;  %v1961_v12 = vld [vmem:[%s2545_s3 + $0xe0] ss:$8 sps:$4 sm:$0xff]   ;;  %v1966_v13 = vld [vmem:[%s2544_s2 + $0xf4] ss:$8 sps:$4 sm:$0xff]  }
  0x4c   : > { %951 = vmatprep.subr.bf16.mxu0 %v1888_v14  ;;  %1212 = vmatprep.subr.bf16.mxu1 %v1891_v15  ;;  %v1969_v14 = vld [vmem:[%s2545_s3 + $0xf4] ss:$8 sps:$4 sm:$0xff]   ;;  %v1964_v15 = vld [vmem:[%s2544_s2 + $0xf0] ss:$8 sps:$4 sm:$0xff]  }
  0x4f   : > { %952 = vmatpush1.bf16.msra.mxu0 %v1886_v16  ;;  %1213 = vmatpush1.bf16.msra.mxu1 %v1889_v17  ;;  %v772_v16 = vshrl.u32 %v2255_v4, 16  ;;  %v776_v17 = vrot.slane %v774_v8, 1  ;;  %v1974_v4 = vld [vmem:[%s2546_s4] sm:$0xff]  }
  0x50   : > { %953 = vmatprep.subr.bf16.mxu0 %v1894_v18  ;;  %1214 = vmatprep.subr.bf16.mxu1 %v1897_v19  ;;  %v1033_v18 = vrot.slane %v1031_v9, 1  ;;  %v1036_v19 = vrot.slane %v1034_v10, 2 }
  0x53   : > { %954 = vmatpush1.bf16.msra.mxu0 %v1892_v20  ;;  %1215 = vmatpush1.bf16.msra.mxu1 %v1895_v21  ;;  %v1967_v20 = vld [vmem:[%s2545_s3 + $0xf0] ss:$8 sps:$4 sm:$0xff]   ;;  %v1991_v21 = vld [vmem:[%s2188_s28 + $0x4] ss:$8 sps:$4 sm:$0x7c]  }
  0x54   : > { %955 = vmatprep.subr.bf16.mxu0 %v1900_v22  ;;  %1216 = vmatprep.subr.bf16.mxu1 %v1903_v23  ;;  %v1973_v22 = vld [vmem:[%s2546_s4 + $0x40] sm:$0xff]   ;;  %v777_v23 = vor.u32 %v776_v17, %v772_v16 }
  0x57   : > { %956 = vmatpush1.bf16.msra.mxu0 %v1898_v24  ;;  %1217 = vmatpush1.bf16.msra.mxu1 %v1901_v25  ;;  %v1037_v24 = vor.u32 %v1036_v19, %v1033_v18  ;;  %v1292_v25 = vrot.slane %v1991_v21, 2  ;;  %v1513_v21 = vld [vmem:[%s2511_s17 + $0x10] sm:$0x11] }
  0x58   : > { %957 = vmatprep.subr.bf16.mxu0 %v1906_v26  ;;  %1218 = vmatprep.subr.bf16.mxu1 %v1909_v27  ;;  %v1975_v26 = vld [vmem:[%s2546_s4 + $0x48] sm:$0xff]  }
  0x59   : > { %v1976_v27 = vld [vmem:[%s2546_s4 + $0x8] sm:$0xff]  }
  0x5b   : > { %958 = vmatpush1.bf16.msra.mxu0 %v1904_v28  ;;  %1219 = vmatpush1.bf16.msra.mxu1 %v1907_v29  ;;  %v1977_v28 = vld [vmem:[%s2546_s4 + $0x50] sm:$0xff]  }
  0x5c   : > { %959 = vmatprep.subr.bf16.mxu0 %v1912_v30  ;;  %1220 = vmatprep.subr.bf16.mxu1 %v1915_v31  ;;  %v1978_v29 = vld [vmem:[%s2546_s4 + $0x10] sm:$0xff]   ;;  %v1979_v30 = vld [vmem:[%s2546_s4 + $0x58] sm:$0xff]  }
  0x5d   : > { %v1980_v31 = vld [vmem:[%s2546_s4 + $0x18] sm:$0xff]  }
  0x5f   : > { %960 = vmatpush1.bf16.msra.mxu0 %v1910_v32  ;;  %1221 = vmatpush1.bf16.msra.mxu1 %v1913_v33  ;;  %v1981_v32 = vld [vmem:[%s2546_s4 + $0x60] sm:$0xff]  }
  0x60   : > { %961 = vmatprep.subr.bf16.mxu0 %v1918_v34  ;;  %1222 = vmatprep.subr.bf16.mxu1 %v1921_v36  ;;  %v1982_v33 = vld [vmem:[%s2546_s4 + $0x20] sm:$0xff]   ;;  %v1983_v34 = vld [vmem:[%s2546_s4 + $0x68] sm:$0xff]   ;;  %v1985_v36 = vld [vmem:[%s2546_s4 + $0x70] sm:$0xff]  }
  0x63   : > { %962 = vmatpush1.bf16.msra.mxu0 %v1916_v37  ;;  %1223 = vmatpush1.bf16.msra.mxu1 %v1919_v40  ;;  %v1986_v37 = vld [vmem:[%s2546_s4 + $0x30] sm:$0xff]   ;;  %v1988_v40 = vld [vmem:[%s2546_s4 + $0x38] sm:$0xff]  }
  0x64   : > { %963 = vmatprep.subr.bf16.mxu0 %v1924_v41  ;;  %1224 = vmatprep.subr.bf16.mxu1 %v1927_v44  ;;  %v1291_v41 = vrot.slane %v1989_v39, 2 }
  0x67   : > { %964 = vmatpush1.bf16.msra.mxu0 %v1922_v45  ;;  %1225 = vmatpush1.bf16.msra.mxu1 %v1925_v47 }
  0x68   : > { %965 = vmatprep.subr.bf16.mxu0 %v1930_v48  ;;  %1226 = vmatprep.subr.bf16.mxu1 %v1933_v49 }
  0x6b   : > { %966 = vmatpush1.bf16.msra.mxu0 %v1928_v50  ;;  %1227 = vmatpush1.bf16.msra.mxu1 %v1931_v51  ;;  %v1444_v50 = vlaneseq }
  0x6c   : > { %967 = vmatprep.subr.bf16.mxu0 %v1936_v52  ;;  %1228 = vmatprep.subr.bf16.mxu1 %v1939_v53  ;;  %v1442_v53 = vld [vmem:[%s2547_s5] sm:$0xf] }
  0x6d   : > { %v1445_v51 = vshrl.u32 %v1444_v50, 7 }
  0x6f   : > { %968 = vmatpush1.bf16.msra.mxu0 %v1934_v54  ;;  %1229 = vmatpush1.bf16.msra.mxu1 %v1937_v55  ;;  %v1446_v52 = vsub.s32 0, %v1445_v51  ;;  %v1450_v54 = vsub.s32 1, %v1445_v51 }
  0x70   : > { %969 = vmatprep.subr.bf16.mxu0 %v1942_v56  ;;  %1230 = vmatprep.subr.bf16.mxu1 %v1945_v57 }
  0x71   : > { %v1447_v55 = vrot.slane %v1442_v53, %v1446_v52  ;;  %v1451_v56 = vrot.slane %v1442_v53, %v1450_v54 }
  0x73   : > { %970 = vmatpush1.bf16.msra.mxu0 %v1940_v58  ;;  %1231 = vmatpush1.bf16.msra.mxu1 %v1943_v59 }
  0x74   : > { %971 = vmatprep.subr.bf16.mxu0 %v1948_v60  ;;  %1232 = vmatprep.subr.bf16.mxu1 %v1951_v61 }
  0x77   : > { %972 = vmatpush1.bf16.msra.mxu0 %v1946_v62  ;;  %1233 = vmatpush1.bf16.msra.mxu1 %v1949_v63 }
  0x78   : > { %973 = vmatprep.subr.bf16.mxu0 %v1954_v0  ;;  %1234 = vmatprep.subr.bf16.mxu1 %v1957_v1 }
  0x7b   : > { %974 = vmatpush1.bf16.msra.mxu0 %v1952_v3  ;;  %1235 = vmatpush1.bf16.msra.mxu1 %v1955_v5 }
  0x7c   : > { %975 = vmatprep.subr.bf16.mxu0 %v1960_v6  ;;  %1236 = vmatprep.subr.bf16.mxu1 %v1963_v7 }
  0x7f   : > { %976 = vmatpush1.bf16.msra.mxu0 %v1958_v11  ;;  %1237 = vmatpush1.bf16.msra.mxu1 %v1961_v12 }
  0x80   : > { %977 = vmatprep.subr.bf16.mxu0 %v1966_v13  ;;  %1238 = vmatprep.subr.bf16.mxu1 %v1969_v14 }
  0x83   : > { %978 = vmatpush1.bf16.msra.mxu0 %v1964_v15  ;;  %1239 = vmatpush1.bf16.msra.mxu1 %v1967_v20 }
  0x84   : > { %1745 = vmatprep.subr.bf16.mxu0 %v1973_v22 }
  0x86   : > { %980 = vmatmul.mubr.bf16.vlgmr.msra.gmra.mrb[4].mxu0 %v777_v23  ;;  %1241 = vmatmul.mubr.bf16.vlgmr.msra.gmra.mrb[4].mxu1 %v1037_v24  ;;  %v1454_v24 = vsub.s32 2, %v1445_v51 }
  0x87   : > { %1746 = vmatpush3.bf16.msra.mxu0 %v1974_v4  ;;  %1423 = vmatprep.mubr.bf16.mxu0 %v1292_v25  ;;  %v1458_v4 = vsub.s32 3, %v1445_v51 }
  0x88   : > { %1747 = vmatprep.subr.bf16.mxu0 %v1975_v26  ;;  %v1455_v25 = vrot.slane %v1442_v53, %v1454_v24 }
  0x8b   : > { %1748 = vmatpush3.bf16.msra.mxu0 %v1976_v27 }
  0x8c   : > { %1749 = vmatprep.subr.bf16.mxu0 %v1977_v28 }
  0x8f   : > { %1750 = vmatpush3.bf16.msra.mxu0 %v1978_v29  ;;  %v1459_v29 = vrot.slane %v1442_v53, %v1458_v4 }
  0x90   : > { %1751 = vmatprep.subr.bf16.mxu0 %v1979_v30 }
  0x93   : > { %1752 = vmatpush3.bf16.msra.mxu0 %v1980_v31 }
  0x94   : > { %1753 = vmatprep.subr.bf16.mxu0 %v1981_v32 }
  0x97   : > { %1754 = vmatpush3.bf16.msra.mxu0 %v1982_v33 }
  0x98   : > { %1755 = vmatprep.subr.bf16.mxu0 %v1983_v34 }
  0x9b   : > { %1756 = vmatpush3.bf16.msra.mxu0 %v1984_v35 }
  0x9c   : > { %1757 = vmatprep.subr.bf16.mxu0 %v1985_v36 }
  0x9f   : > { %1758 = vmatpush3.bf16.msra.mxu0 %v1986_v37 }
  0xa0   : > { %1759 = vmatprep.subr.bf16.mxu0 %v1987_v38 }
  0xa3   : > { %1760 = vmatpush3.bf16.msra.mxu0 %v1988_v40 }
  0xa6   : > { %1424 = vmatmul.mubr.bf16.vlgmr.msra.gmra.mrb[8].mxu0 %v1291_v41 }
 0x119   : > { %v687_v42 = vpop.f32.mrb[0].mxu0  ;;  %v730_v43 = vpop.f32.mrb[0].mxu1 }
 0x11a   : > { %v689_v44 = vpop.f32.mrb[1].mxu0  ;;  %v732_v45 = vpop.f32.mrb[1].mxu1  ;;  %v1464_v59 = vadd.f32 %v1447_v55, %v687_v42 }
 0x11b   : > { %v691_v46 = vpop.f32.mrb[2].mxu0  ;;  %v734_v47 = vpop.f32.mrb[2].mxu1 }
 0x11c   : > { %v693_v48 = vpop.f32.mrb[3].mxu0  ;;  %v736_v49 = vpop.f32.mrb[3].mxu1  ;;  %v1468_v3 = vadd.f32 %v1447_v55, %v691_v46  ;;  %v1472_v13 = vmax.f32 %v1464_v59, 0.0 }
 0x11e   : > { %v1476_v18 = vmax.f32 %v1468_v3, 0.0 }
 0x159   : > { %v981_v57 = vpop.f32.mrb[4].mxu0  ;;  %v1242_v58 = vpop.f32.mrb[4].mxu1 }
 0x15a   : > { %v1432_v60 = vadd.f32 %v981_v57, %v689_v44  ;;  %v1434_v61 = vadd.f32 %v1242_v58, %v730_v43  ;;  %v983_v62 = vpop.f32.mrb[5].mxu0  ;;  %v1244_v63 = vpop.f32.mrb[5].mxu1  ;;  %v1516_v44 = vld [vmem:[%s2511_s17 + $0x18] sm:$0x11] }
 0x15b   : > { %v1436_v0 = vadd.f32 %v983_v62, %v732_v45  ;;  %v985_v1 = vpop.f32.mrb[6].mxu0  ;;  %v1246_v2 = vpop.f32.mrb[6].mxu1 }
 0x15c   : > { %v1465_v5 = vadd.f32 %v1451_v56, %v1432_v60  ;;  %v1433_v6 = vadd.f32 %v985_v1, %v693_v48  ;;  %v1435_v7 = vadd.f32 %v1246_v2, %v734_v47  ;;  %v987_v8 = vpop.f32.mrb[7].mxu0  ;;  %v1248_v9 = vpop.f32.mrb[7].mxu1  ;;  %v1466_v32 = vadd.f32 %v1455_v25, %v1434_v61 }
 0x15d   : > { %v1438_v10 = vadd.f32 %v1436_v0, %v1244_v63  ;;  %v1437_v12 = vadd.f32 %v987_v8, %v736_v49 }
 0x15e   : > { %v1473_v14 = vmax.f32 %v1465_v5, 0.0  ;;  %v1469_v15 = vadd.f32 %v1451_v56, %v1433_v6  ;;  %v1470_v35 = vadd.f32 %v1455_v25, %v1435_v7  ;;  %v1474_v38 = vmax.f32 %v1466_v32, 0.0 }
 0x15f   : > { %v1439_v17 = vadd.f32 %v1437_v12, %v1248_v9 }
 0x160   : > { %v1741_v19 = vpack.c.bf16 %v1473_v14, %v1472_v13  ;;  %v1477_v20 = vmax.f32 %v1469_v15, 0.0  ;;  %v1478_v41 = vmax.f32 %v1470_v35, 0.0 }
 0x162   : > { %1504 = vst [vmem:[%s2511_s17] sm:$0xff] %v1741_v19  ;;  %v1743_v22 = vpack.c.bf16 %v1477_v20, %v1476_v18 }
 0x164   : > { %v1514_v23 = vsel %vm1512_vm6, %v1743_v22, %v1513_v21 }
 0x165   : > { %1515 = vst [vmem:[%s2511_s17 + $0x10] sm:$0x11] %v1514_v23 }
 0x179   : > { %v1761_v26 = vpop.f32.mrb[8].mxu0 }
 0x17a   : > { %v1762_v27 = vpop.f32.mrb[9].mxu0 }
 0x17b   : > { %v1763_v28 = vadd.f32 %v1762_v27, %v1761_v26  ;;  %v1764_v30 = vpop.f32.mrb[10].mxu0 }
 0x17c   : > { %v1765_v31 = vpop.f32.mrb[11].mxu0 }
 0x17d   : > { %v1440_v33 = vadd.f32 %v1763_v28, %v1438_v10  ;;  %v1766_v34 = vadd.f32 %v1765_v31, %v1764_v30 }
 0x17f   : > { %v1467_v36 = vadd.f32 %v1459_v29, %v1440_v33  ;;  %v1441_v37 = vadd.f32 %v1766_v34, %v1439_v17 }
 0x181   : > { %v1475_v39 = vmax.f32 %v1467_v36, 0.0  ;;  %v1471_v40 = vadd.f32 %v1459_v29, %v1441_v37 }
 0x183   : > { %v1742_v42 = vpack.c.bf16 %v1475_v39, %v1474_v38  ;;  %v1479_v43 = vmax.f32 %v1471_v40, 0.0 }
 0x185   : > { %1505 = vst [vmem:[%s2511_s17 + $0x8] sm:$0xff] %v1742_v42  ;;  %v1744_v45 = vpack.c.bf16 %v1479_v43, %v1478_v41 }
 0x187   : > { %v1517_v46 = vsel %vm1512_vm6, %v1744_v45, %v1516_v44 }
 0x188   : > { %1518 = vst [vmem:[%s2511_s17 + $0x18] sm:$0x11] %v1517_v46 }
 0x189 PF: > { %s16_s21 = sadd.s32 1, %s1998_s21  }
 0x18a   : > { %p13_p4 = scmp.ge.s32.totalorder %s16_s21, 4  }
 0x18c   :  { %15 = sbr.rel (!%p13_p4) target bundleno = 1 (0x1), region = 74 }

// kernel: _lambda_.10
= control target key start
LH: loop header
LB: loop body
LE: loop exit
PB: predicated region body
PF: predicated region fallthrough
CT: control target
= control target key end

     0   :  { %s1534_s21 = smov 0   ;;  %s1874_s0 = inlined_call_operand.vmem [shape: bf16[2,31,128], index: 0, kind: input, shape index: {}]   ;;  %s1875_s1 = inlined_call_operand.vmem [shape: bf16[128,512], index: 1, kind: input, shape index: {}]   ;;  %s1876_s2 = inlined_call_operand.vmem [shape: bf16[128,256], index: 2, kind: input, shape index: {}]   ;;  %s1877_s3 = inlined_call_operand.vmem [shape: bf16[128,256], index: 3, kind: input, shape index: {}]   ;;  %s1878_s4 = inlined_call_operand.vmem [shape: bf16[128,128], index: 4, kind: input, shape index: {}]   ;;  %s1879_s5 = inlined_call_operand.vmem [shape: f32[1,512], index: 5, kind: input, shape index: {}]   ;;  %s1880_s6 = inlined_call_operand.vmem [shape: bf16[2,25,512], index: 6, kind: output, shape index: {}]  }
   0x1 LB: > { %s1234_s22 = sadd.s32 4294967295, %s1496_s21   ;;  %p1238_p0 = scmp.ge.s32.totalorder %s1496_s21, 1  ;;  %s1496_s21 = sphi %s1534_s21, %s16_s21  }
   0x2   : > { %p212_p1 = scmp.lt.s32.totalorder %s1496_s21, 3 }
   0x4   : > { %p213_p2 = pnand %p1238_p0, %p212_p1 }
   0x5   : > { %v1380_v0 = vld [vmem:[%s1875_s1 + $0x4] ss:$16 sps:$4 sm:$0xff] (!%p213_p2)   ;;  %v1382_v1 = vld [vmem:[%s1875_s1 + $0xc] ss:$16 sps:$4 sm:$0xff] (!%p213_p2)   ;;  %v1498_v2 = vmov (!%p213_p2), 0   ;;  %p242_p3 = scmp.lt.s32.totalorder (!%p213_p2), %s1234_s22, 1 }
   0x6   : > { %216 = sbr.rel (%p213_p2) target bundleno = 327 (0x147), region = 44  ;;  %497 = vmatprep.mubr.bf16.mxu0 (!%p213_p2), %v1498_v2  ;;  %550 = vmatprep.mubr.bf16.mxu1 (!%p213_p2), %v1498_v2  ;;  %v1384_v3 = vld [vmem:[%s1875_s1] ss:$16 sps:$4 sm:$0xff] (!%p213_p2)   ;;  %v1385_v4 = vld [vmem:[%s1875_s1 + $0x8] ss:$16 sps:$4 sm:$0xff] (!%p213_p2)   ;;  %vm935_vm2 = vcmask (!%p213_p2), 1044480  }
   0x7   : > { %465 = vmatprep.subr.bf16.mxu0 (!%p213_p2), %v1380_v0  ;;  %518 = vmatprep.subr.bf16.mxu1 (!%p213_p2), %v1382_v1  ;;  %v1386_v5 = vld [vmem:[%s1875_s1 + $0x24] ss:$16 sps:$4 sm:$0xff] (!%p213_p2)   ;;  %v1388_v6 = vld [vmem:[%s1875_s1 + $0x2c] ss:$16 sps:$4 sm:$0xff] (!%p213_p2)   ;;  %v1390_v7 = vld [vmem:[%s1875_s1 + $0x20] ss:$16 sps:$4 sm:$0xff] (!%p213_p2)  }
   0x8   : > { %466 = vmatpush1.bf16.msra.mxu0 (!%p213_p2), %v1384_v3  ;;  %519 = vmatpush1.bf16.msra.mxu1 (!%p213_p2), %v1385_v4  ;;  %v1391_v8 = vld [vmem:[%s1875_s1 + $0x28] ss:$16 sps:$4 sm:$0xff] (!%p213_p2)   ;;  %v1392_v9 = vld [vmem:[%s1875_s1 + $0x44] ss:$16 sps:$4 sm:$0xff] (!%p213_p2)   ;;  %v1394_v10 = vld [vmem:[%s1875_s1 + $0x4c] ss:$16 sps:$4 sm:$0xff] (!%p213_p2)  }
   0x9   : > { %467 = vmatprep.subr.bf16.mxu0 (!%p213_p2), %v1386_v5  ;;  %520 = vmatprep.subr.bf16.mxu1 (!%p213_p2), %v1388_v6  ;;  %v1396_v11 = vld [vmem:[%s1875_s1 + $0x40] ss:$16 sps:$4 sm:$0xff] (!%p213_p2)   ;;  %v1397_v12 = vld [vmem:[%s1875_s1 + $0x48] ss:$16 sps:$4 sm:$0xff] (!%p213_p2)   ;;  %v1398_v13 = vld [vmem:[%s1875_s1 + $0x64] ss:$16 sps:$4 sm:$0xff] (!%p213_p2)  }
   0xa   : > { %v1400_v14 = vld [vmem:[%s1875_s1 + $0x6c] ss:$16 sps:$4 sm:$0xff] (!%p213_p2)   ;;  %v1402_v15 = vld [vmem:[%s1875_s1 + $0x60] ss:$16 sps:$4 sm:$0xff] (!%p213_p2)   ;;  %v1403_v16 = vld [vmem:[%s1875_s1 + $0x68] ss:$16 sps:$4 sm:$0xff] (!%p213_p2)  }
   0xb   : > { %v1404_v17 = vld [vmem:[%s1875_s1 + $0x84] ss:$16 sps:$4 sm:$0xff] (!%p213_p2)   ;;  %v1406_v18 = vld [vmem:[%s1875_s1 + $0x8c] ss:$16 sps:$4 sm:$0xff] (!%p213_p2)   ;;  %v1408_v19 = vld [vmem:[%s1875_s1 + $0x80] ss:$16 sps:$4 sm:$0xff] (!%p213_p2)  }
   0xc   : > { %468 = vmatpush1.bf16.msra.mxu0 (!%p213_p2), %v1390_v7  ;;  %521 = vmatpush1.bf16.msra.mxu1 (!%p213_p2), %v1391_v8  ;;  %v1409_v20 = vld [vmem:[%s1875_s1 + $0x88] ss:$16 sps:$4 sm:$0xff] (!%p213_p2)   ;;  %v1410_v21 = vld [vmem:[%s1875_s1 + $0xa4] ss:$16 sps:$4 sm:$0xff] (!%p213_p2)   ;;  %v1412_v22 = vld [vmem:[%s1875_s1 + $0xac] ss:$16 sps:$4 sm:$0xff] (!%p213_p2)  }
   0xd   : > { %469 = vmatprep.subr.bf16.mxu0 %v1392_v9  ;;  %522 = vmatprep.subr.bf16.mxu1 %v1394_v10  ;;  %s1886_s22 = smov (!%p242_p3, %s1234_s22), 1  ;;  %v1414_v23 = vld [vmem:[%s1875_s1 + $0xa0] ss:$16 sps:$4 sm:$0xff]   ;;  %v1415_v24 = vld [vmem:[%s1875_s1 + $0xa8] ss:$16 sps:$4 sm:$0xff]   ;;  %vm1166_vm3 = vcmask 1040384  }
   0xe   : > { %v1416_v25 = vld [vmem:[%s1875_s1 + $0xc4] ss:$16 sps:$4 sm:$0xff]   ;;  %v1418_v26 = vld [vmem:[%s1875_s1 + $0xcc] ss:$16 sps:$4 sm:$0xff]   ;;  %s1331_s7 = sshll.u32 %s1886_s22, 4  ;;  %s1332_s20 = sshll.u32 %s1886_s22, 6 }
   0xf   : > { %v1420_v27 = vld [vmem:[%s1875_s1 + $0xc0] ss:$16 sps:$4 sm:$0xff]   ;;  %v1421_v28 = vld [vmem:[%s1875_s1 + $0xc8] ss:$16 sps:$4 sm:$0xff]   ;;  %v1422_v29 = vld [vmem:[%s1875_s1 + $0xe4] ss:$16 sps:$4 sm:$0xff]   ;;  %s1641_s16 = scalar_lea.vmem %s1874_s0, %s1331_s7  ;;  %s1827_s25 = scalar_lea.vmem %s1880_s6, %s1332_s20 }
  0x10   : > { %470 = vmatpush1.bf16.msra.mxu0 %v1396_v11  ;;  %523 = vmatpush1.bf16.msra.mxu1 %v1397_v12  ;;  %v1424_v30 = vld [vmem:[%s1875_s1 + $0xec] ss:$16 sps:$4 sm:$0xff]   ;;  %v1426_v31 = vld [vmem:[%s1875_s1 + $0xe0] ss:$16 sps:$4 sm:$0xff]   ;;  %v1427_v32 = vld [vmem:[%s1875_s1 + $0xe8] ss:$16 sps:$4 sm:$0xff]  }
  0x11   : > { %471 = vmatprep.subr.bf16.mxu0 %v1398_v13  ;;  %524 = vmatprep.subr.bf16.mxu1 %v1400_v14  ;;  %v253_v33 = vld [vmem:[%s1641_s16] sm:$0xf]  ;;  %v1654_v34 = vld [vmem:[%s1641_s16 + $0x4] sm:$0xf]  ;;  %v1438_v40 = vld [vmem:[%s1876_s2 + $0x14] ss:$8 sps:$4 sm:$0xff]  }
  0x12   : > { %v1432_v35 = vld [vmem:[%s1876_s2 + $0x4] ss:$8 sps:$4 sm:$0xff]   ;;  %v1663_v37 = vcombine.low %v253_v33, %v1654_v34  ;;  %v1430_v38 = vld [vmem:[%s1876_s2] ss:$8 sps:$4 sm:$0xff]   ;;  %v1441_v41 = vld [vmem:[%s1877_s3 + $0x14] ss:$8 sps:$4 sm:$0xff]  }
  0x13   : > { %v1435_v36 = vld [vmem:[%s1877_s3 + $0x4] ss:$8 sps:$4 sm:$0xff]   ;;  %v1433_v39 = vld [vmem:[%s1877_s3] ss:$8 sps:$4 sm:$0xff]   ;;  %v1436_v43 = vld [vmem:[%s1876_s2 + $0x10] ss:$8 sps:$4 sm:$0xff]  }
  0x14   : > { %472 = vmatpush1.bf16.msra.mxu0 %v1402_v15  ;;  %525 = vmatpush1.bf16.msra.mxu1 %v1403_v16  ;;  %v257_v42 = vld [vmem:[%s1641_s16] sm:$0xc]  ;;  %v1439_v44 = vld [vmem:[%s1877_s3 + $0x10] ss:$8 sps:$4 sm:$0xff]   ;;  %v1444_v45 = vld [vmem:[%s1876_s2 + $0x24] ss:$8 sps:$4 sm:$0xff]  }
  0x15   : > { %473 = vmatprep.subr.bf16.mxu0 %v1404_v17  ;;  %526 = vmatprep.subr.bf16.mxu1 %v1406_v18  ;;  %v1447_v46 = vld [vmem:[%s1877_s3 + $0x24] ss:$8 sps:$4 sm:$0xff]   ;;  %v1694_v47 = vld [vmem:[%s1641_s16 + $0x8] sm:$0xf]  ;;  %v1293_v49 = vcombine.low %v257_v42, %v1654_v34  ;;  %v1450_v53 = vld [vmem:[%s1876_s2 + $0x34] ss:$8 sps:$4 sm:$0xff]  }
  0x16   : > { %v256_v48 = vld [vmem:[%s1641_s16 + $0xc] sm:$0x1]  ;;  %v1442_v51 = vld [vmem:[%s1876_s2 + $0x20] ss:$8 sps:$4 sm:$0xff]   ;;  %v1453_v54 = vld [vmem:[%s1877_s3 + $0x34] ss:$8 sps:$4 sm:$0xff]  }
  0x17   : > { %v1700_v50 = vcombine.low %v1694_v47, %v256_v48  ;;  %v1445_v52 = vld [vmem:[%s1877_s3 + $0x20] ss:$8 sps:$4 sm:$0xff]   ;;  %v591_v55 = vshll.u32 %v1663_v37, 16  ;;  %v1448_v56 = vld [vmem:[%s1876_s2 + $0x30] ss:$8 sps:$4 sm:$0xff]   ;;  %v762_v57 = vshrl.u32 %v1293_v49, 16 }
  0x18   : > { %474 = vmatpush1.bf16.msra.mxu0 %v1408_v19  ;;  %527 = vmatpush1.bf16.msra.mxu1 %v1409_v20  ;;  %v765_v58 = vshll.u32 %v1293_v49, 16  ;;  %v1451_v59 = vld [vmem:[%s1877_s3 + $0x30] ss:$8 sps:$4 sm:$0xff]   ;;  %v1456_v60 = vld [vmem:[%s1876_s2 + $0x44] ss:$8 sps:$4 sm:$0xff]   ;;  %v589_v12 = vshrl.u32 %v1663_v37, 16 }
  0x19   : > { %475 = vmatprep.subr.bf16.mxu0 %v1410_v21  ;;  %528 = vmatprep.subr.bf16.mxu1 %v1412_v22  ;;  %v1459_v61 = vld [vmem:[%s1877_s3 + $0x44] ss:$8 sps:$4 sm:$0xff]   ;;  %v1454_v63 = vld [vmem:[%s1876_s2 + $0x40] ss:$8 sps:$4 sm:$0xff]   ;;  %v1462_v1 = vld [vmem:[%s1876_s2 + $0x54] ss:$8 sps:$4 sm:$0xff]  }
  0x1a   : > { %v258_v62 = vld [vmem:[%s1641_s16 + $0xc] sm:$0x7]  ;;  %v1457_v0 = vld [vmem:[%s1877_s3 + $0x40] ss:$8 sps:$4 sm:$0xff]   ;;  %v1465_v4 = vld [vmem:[%s1877_s3 + $0x54] ss:$8 sps:$4 sm:$0xff]  }
  0x1b   : > { %v1294_v3 = vcombine.low %v1694_v47, %v258_v62  ;;  %v1460_v5 = vld [vmem:[%s1876_s2 + $0x50] ss:$8 sps:$4 sm:$0xff]   ;;  %v1470_v9 = vld [vmem:[%s1876_s2 + $0x64] ss:$8 sps:$4 sm:$0xff]   ;;  %v1468_v11 = vld [vmem:[%s1876_s2 + $0x60] ss:$8 sps:$4 sm:$0xff]   ;;  %v1060_v62 = vlaneseq }
  0x1c   : > { %476 = vmatpush1.bf16.msra.mxu0 %v1414_v23  ;;  %529 = vmatpush1.bf16.msra.mxu1 %v1415_v24  ;;  %v1463_v6 = vld [vmem:[%s1877_s3 + $0x50] ss:$8 sps:$4 sm:$0xff]   ;;  %v1473_v10 = vld [vmem:[%s1877_s3 + $0x64] ss:$8 sps:$4 sm:$0xff]   ;;  %v593_v13 = vrot.slane %v591_v55, 1  ;;  %v764_v14 = vrot.slane %v762_v57, 2 }
  0x1d   : > { %477 = vmatprep.subr.bf16.mxu0 %v1416_v25  ;;  %530 = vmatprep.subr.bf16.mxu1 %v1418_v26  ;;  %v770_v7 = vshrl.u32 %v1294_v3, 16  ;;  %v773_v8 = vshll.u32 %v1294_v3, 16  ;;  %v1471_v15 = vld [vmem:[%s1877_s3 + $0x60] ss:$8 sps:$4 sm:$0xff]   ;;  %v596_v16 = vshll.u32 %v1700_v50, 16  ;;  %v767_v17 = vrot.slane %v765_v58, 3 }
  0x1e   : > { %v1476_v20 = vld [vmem:[%s1876_s2 + $0x74] ss:$8 sps:$4 sm:$0xff]   ;;  %v1474_v22 = vld [vmem:[%s1876_s2 + $0x70] ss:$8 sps:$4 sm:$0xff]   ;;  %v594_v24 = vor.u32 %v593_v13, %v589_v12  ;;  %vm587_vm0 = vsmask.f32 7424 }
  0x1f   : > { %v772_v18 = vrot.slane %v770_v7, 2  ;;  %v775_v19 = vrot.slane %v773_v8, 3  ;;  %v1479_v21 = vld [vmem:[%s1877_s3 + $0x74] ss:$8 sps:$4 sm:$0xff]   ;;  %v1477_v23 = vld [vmem:[%s1877_s3 + $0x70] ss:$8 sps:$4 sm:$0xff]   ;;  %v768_v26 = vor.u32 %v767_v17, %v764_v14 }
  0x20   : > { %478 = vmatpush1.bf16.msra.mxu0 %v1420_v27  ;;  %531 = vmatpush1.bf16.msra.mxu1 %v1421_v28  ;;  %v598_v25 = vrot.slane %v596_v16, 1  ;;  %vm760_vm1 = vsmask.f32 5376  ;;  %v1480_v28 = vld [vmem:[%s1878_s4] sm:$0xff]   ;;  %v1481_v33 = vld [vmem:[%s1878_s4 + $0x8] sm:$0xff]   ;;  %vm1169_vm5 = vcmask 1044484  }
  0x21   : > { %479 = vmatprep.subr.bf16.mxu0 %v1422_v29  ;;  %532 = vmatprep.subr.bf16.mxu1 %v1424_v30  ;;  %v776_v27 = vor.u32 %v775_v19, %v772_v18  ;;  %v259_v29 = vld [vmem:[%s1641_s16] sm:$0x8]  ;;  %v260_v30 = vld [vmem:[%s1641_s16 + $0xc] sm:$0xf]  ;;  %vm1167_vm4 = vsmask.f32 256 }
  0x22   : > { %vm1170_vm6 = vsmask.f32 4352  ;;  %vm1833_vm7 = vmand %vm1166_vm3, %vm1167_vm4 }
  0x23   : > { %vm1839_vm8 = vmand %vm1169_vm5, %vm1170_vm6 }
  0x24   : > { %480 = vmatpush1.bf16.msra.mxu0 %v1426_v31  ;;  %533 = vmatpush1.bf16.msra.mxu1 %v1427_v32  ;;  %v599_v31 = vsel %vm587_vm0, %v594_v24, %v598_v25  ;;  %v777_v32 = vsel %vm760_vm1, %v768_v26, %v776_v27  ;;  %vm1172_vm9 = vmor %vm1839_vm8, %vm1833_vm7 }
  0x25   : > { %685 = vmatprep.subr.bf16.mxu0 %v1432_v35  ;;  %860 = vmatprep.subr.bf16.mxu1 %v1435_v36  ;;  %v1311_v35 = vcombine.low %v259_v29, %v1654_v34  ;;  %v1312_v36 = vcombine.low %v1694_v47, %v260_v30 }
  0x27   : > { %498 = vmatmul.mubr.bf16.vlgmr.msra.gmra.mrb[0].mxu0 %v1663_v37  ;;  %551 = vmatmul.mubr.bf16.vlgmr.msra.gmra.mrb[0].mxu1 %v1663_v37  ;;  %v600_v37 = vshrl.u32 %v1700_v50, 16 }
  0x28   : > { %686 = vmatpush1.bf16.msra.mxu0 %v1430_v38  ;;  %861 = vmatpush1.bf16.msra.mxu1 %v1433_v39  ;;  %v1482_v38 = vld [vmem:[%s1878_s4 + $0x10] sm:$0xff]   ;;  %v936_v39 = vrot.slane %v1311_v35, 3 }
  0x29   : > { %687 = vmatprep.subr.bf16.mxu0 %v1438_v40  ;;  %862 = vmatprep.subr.bf16.mxu1 %v1441_v41  ;;  %v937_v40 = vrot.slane %v1312_v36, 3  ;;  %v602_v34 = vor.u32 %v600_v37, %v598_v25  ;;  %v1483_v41 = vld [vmem:[%s1878_s4 + $0x18] sm:$0xff]  }
  0x2a   : > { %507 = vmatprep.mubr.bf16.mxu0 %v1498_v2  ;;  %560 = vmatprep.mubr.bf16.mxu1 %v1498_v2 }
  0x2b   : > { %v938_v42 = vsel %vm935_vm2, %v936_v39, %v937_v40 }
  0x2c   : > { %688 = vmatpush1.bf16.msra.mxu0 %v1436_v43  ;;  %863 = vmatpush1.bf16.msra.mxu1 %v1439_v44  ;;  %v1485_v43 = vld [vmem:[%s1878_s4 + $0x28] sm:$0xff]   ;;  %v1486_v44 = vld [vmem:[%s1878_s4 + $0x30] sm:$0xff]  }
  0x2d   : > { %689 = vmatprep.subr.bf16.mxu0 %v1444_v45  ;;  %864 = vmatprep.subr.bf16.mxu1 %v1447_v46  ;;  %v1487_v45 = vld [vmem:[%s1878_s4 + $0x38] sm:$0xff]  }
  0x2f   : > { %508 = vmatmul.mubr.bf16.gmra.mrb[4].mxu0 %v1700_v50  ;;  %561 = vmatmul.mubr.bf16.gmra.mrb[4].mxu1 %v1700_v50 }
  0x30   : > { %690 = vmatpush1.bf16.msra.mxu0 %v1442_v51  ;;  %865 = vmatpush1.bf16.msra.mxu1 %v1445_v52 }
  0x31   : > { %691 = vmatprep.subr.bf16.mxu0 %v1450_v53  ;;  %866 = vmatprep.subr.bf16.mxu1 %v1453_v54 }
  0x32   : > { %717 = vmatprep.mubr.bf16.mxu0 %v1498_v2  ;;  %892 = vmatprep.mubr.bf16.mxu1 %v1498_v2 }
  0x34   : > { %692 = vmatpush1.bf16.msra.mxu0 %v1448_v56  ;;  %867 = vmatpush1.bf16.msra.mxu1 %v1451_v59 }
  0x35   : > { %693 = vmatprep.subr.bf16.mxu0 %v1456_v60  ;;  %868 = vmatprep.subr.bf16.mxu1 %v1459_v61 }
  0x38   : > { %694 = vmatpush1.bf16.msra.mxu0 %v1454_v63  ;;  %869 = vmatpush1.bf16.msra.mxu1 %v1457_v0  ;;  %v1808_v63 = vshrl.u32 %v1060_v62, 7 }
  0x39   : > { %695 = vmatprep.subr.bf16.mxu0 %v1462_v1  ;;  %870 = vmatprep.subr.bf16.mxu1 %v1465_v4  ;;  %v1814_v1 = vld [vmem:[%s1879_s5] sm:$0xf] }
  0x3a   : > { %v1062_v0 = vsub.s32 0, %v1808_v63  ;;  %v1066_v3 = vsub.s32 1, %v1808_v63  ;;  %v1074_v62 = vsub.s32 3, %v1808_v63 }
  0x3c   : > { %696 = vmatpush1.bf16.msra.mxu0 %v1460_v5  ;;  %871 = vmatpush1.bf16.msra.mxu1 %v1463_v6  ;;  %v1063_v4 = vrot.slane %v1814_v1, %v1062_v0  ;;  %v1067_v5 = vrot.slane %v1814_v1, %v1066_v3  ;;  %v1075_v3 = vrot.slane %v1814_v1, %v1074_v62 }
  0x3d   : > { %697 = vmatprep.subr.bf16.mxu0 %v1470_v9  ;;  %872 = vmatprep.subr.bf16.mxu1 %v1473_v10 }
  0x40   : > { %698 = vmatpush1.bf16.msra.mxu0 %v1468_v11  ;;  %873 = vmatpush1.bf16.msra.mxu1 %v1471_v15 }
  0x41   : > { %699 = vmatprep.subr.bf16.mxu0 %v1476_v20  ;;  %874 = vmatprep.subr.bf16.mxu1 %v1479_v21 }
  0x44   : > { %700 = vmatpush1.bf16.msra.mxu0 %v1474_v22  ;;  %875 = vmatpush1.bf16.msra.mxu1 %v1477_v23 }
  0x45   : > { %1351 = vmatprep.subr.bf16.mxu0 %v1480_v28 }
  0x47   : > { %718 = vmatmul.mubr.bf16.vlgmr.msra.gmra.mrb[8].mxu0 %v599_v31  ;;  %893 = vmatmul.mubr.bf16.vlgmr.msra.gmra.mrb[8].mxu1 %v777_v32 }
  0x48   : > { %1352 = vmatpush3.bf16.msra.mxu0 %v1480_v28  ;;  %727 = vmatprep.mubr.bf16.mxu0 %v1498_v2 }
  0x49   : > { %1353 = vmatprep.subr.bf16.mxu0 %v1481_v33  ;;  %902 = vmatprep.mubr.bf16.mxu1 %v1498_v2  ;;  %v1484_v2 = vld [vmem:[%s1878_s4 + $0x20] sm:$0xff]  }
  0x4c   : > { %1354 = vmatpush3.bf16.msra.mxu0 %v1481_v33 }
  0x4d   : > { %1355 = vmatprep.subr.bf16.mxu0 %v1482_v38 }
  0x4f   : > { %728 = vmatmul.mubr.bf16.gmra.mrb[12].mxu0 %v602_v34  ;;  %903 = vmatmul.mubr.bf16.gmra.mrb[12].mxu1 %v776_v27 }
  0x50   : > { %1356 = vmatpush3.bf16.msra.mxu0 %v1482_v38  ;;  %1367 = vmatprep.mubr.bf16.mxu0 %v938_v42 }
  0x51   : > { %1357 = vmatprep.subr.bf16.mxu0 %v1483_v41 }
  0x54   : > { %1358 = vmatpush3.bf16.msra.mxu0 %v1483_v41 }
  0x55   : > { %1359 = vmatprep.subr.bf16.mxu0 %v1484_v2 }
  0x58   : > { %1360 = vmatpush3.bf16.msra.mxu0 %v1484_v2 }
  0x59   : > { %1361 = vmatprep.subr.bf16.mxu0 %v1485_v43 }
  0x5c   : > { %1362 = vmatpush3.bf16.msra.mxu0 %v1485_v43 }
  0x5d   : > { %1363 = vmatprep.subr.bf16.mxu0 %v1486_v44 }
  0x60   : > { %1364 = vmatpush3.bf16.msra.mxu0 %v1486_v44 }
  0x61   : > { %1365 = vmatprep.subr.bf16.mxu0 %v1487_v45 }
  0x64   : > { %1366 = vmatpush3.bf16.msra.mxu0 %v1487_v45 }
  0x67   : > { %1368 = vmatmul.mubr.bf16.vlgmr.msra.gmra.mrb[16].mxu0 %v937_v40 }
  0xfa   : > { %v499_v46 = vpop.f32.mrb[0].mxu0  ;;  %v552_v47 = vpop.f32.mrb[0].mxu1 }
  0xfb   : > { %v501_v48 = vpop.f32.mrb[1].mxu0  ;;  %v554_v49 = vpop.f32.mrb[1].mxu1  ;;  %v1080_v8 = vadd.f32 %v1063_v4, %v499_v46 }
  0xfc   : > { %v503_v50 = vpop.f32.mrb[2].mxu0  ;;  %v556_v51 = vpop.f32.mrb[2].mxu1 }
  0xfd   : > { %v505_v52 = vpop.f32.mrb[3].mxu0  ;;  %v558_v53 = vpop.f32.mrb[3].mxu1  ;;  %v1084_v16 = vadd.f32 %v1063_v4, %v503_v50  ;;  %v1096_v24 = vmax.f32 %v1080_v8, 0.0 }
  0xff   : > { %v1100_v28 = vmax.f32 %v1084_v16, 0.0 }
 0x102   : > { %v509_v54 = vpop.f32.mrb[4].mxu0  ;;  %v562_v55 = vpop.f32.mrb[4].mxu1 }
 0x103   : > { %v511_v56 = vpop.f32.mrb[5].mxu0  ;;  %v564_v57 = vpop.f32.mrb[5].mxu1  ;;  %v1088_v33 = vadd.f32 %v1063_v4, %v509_v54 }
 0x104   : > { %v513_v58 = vpop.f32.mrb[6].mxu0  ;;  %v566_v59 = vpop.f32.mrb[6].mxu1 }
 0x105   : > { %v515_v60 = vpop.f32.mrb[7].mxu0  ;;  %v568_v61 = vpop.f32.mrb[7].mxu1  ;;  %v1092_v42 = vadd.f32 %v1063_v4, %v513_v58  ;;  %v1104_v50 = vmax.f32 %v1088_v33, 0.0  ;;  %v1173_v58 = vld [vmem:[%s1827_s25 + $0x30] sm:$0x11] }
 0x11a   : > { %v719_v6 = vpop.f32.mrb[8].mxu0  ;;  %v894_v7 = vpop.f32.mrb[8].mxu1 }
 0x11b   : > { %v1038_v9 = vadd.f32 %v719_v6, %v501_v48  ;;  %v1819_v10 = vadd.f32 %v894_v7, %v552_v47  ;;  %v721_v11 = vpop.f32.mrb[9].mxu0  ;;  %v896_v12 = vpop.f32.mrb[9].mxu1 }
 0x11c   : > { %v1046_v13 = vadd.f32 %v721_v11, %v554_v49  ;;  %v723_v14 = vpop.f32.mrb[10].mxu0  ;;  %v898_v15 = vpop.f32.mrb[10].mxu1 }
 0x11d   : > { %v1081_v17 = vadd.f32 %v1067_v5, %v1038_v9  ;;  %v1039_v18 = vadd.f32 %v723_v14, %v505_v52  ;;  %v1822_v19 = vadd.f32 %v898_v15, %v556_v51  ;;  %v725_v20 = vpop.f32.mrb[11].mxu0  ;;  %v900_v21 = vpop.f32.mrb[11].mxu1 }
 0x11e   : > { %v1050_v22 = vadd.f32 %v1046_v13, %v896_v12  ;;  %v1047_v23 = vadd.f32 %v725_v20, %v558_v53 }
 0x11f   : > { %v1097_v25 = vmax.f32 %v1081_v17, 0.0  ;;  %v1085_v26 = vadd.f32 %v1067_v5, %v1039_v18 }
 0x120   : > { %v1051_v27 = vadd.f32 %v1047_v23, %v900_v21 }
 0x121   : > { %v1333_v29 = vpack.c.bf16 %v1097_v25, %v1096_v24  ;;  %v1101_v30 = vmax.f32 %v1085_v26, 0.0 }
 0x122   : > { %v729_v31 = vpop.f32.mrb[12].mxu0  ;;  %v904_v32 = vpop.f32.mrb[12].mxu1 }
 0x123   : > { %1160 = vst [vmem:[%s1827_s25] sm:$0xff] %v1333_v29  ;;  %v1335_v35 = vpack.c.bf16 %v1101_v30, %v1100_v28  ;;  %v1040_v36 = vadd.f32 %v729_v31, %v511_v56  ;;  %v731_v37 = vpop.f32.mrb[13].mxu0  ;;  %v1044_v38 = vadd.f32 %v904_v32, %v562_v55  ;;  %v906_v39 = vpop.f32.mrb[13].mxu1  ;;  %v1108_v55 = vmax.f32 %v1092_v42, 0.0  ;;  %v1176_v29 = vld [vmem:[%s1827_s25 + $0x38] sm:$0x11] }
 0x124   : > { %v1048_v40 = vadd.f32 %v731_v37, %v564_v57  ;;  %v733_v34 = vpop.f32.mrb[14].mxu0  ;;  %v908_v41 = vpop.f32.mrb[14].mxu1 }
 0x125   : > { %1162 = vst [vmem:[%s1827_s25 + $0x10] sm:$0xff] %v1335_v35  ;;  %v1089_v2 = vadd.f32 %v1067_v5, %v1040_v36  ;;  %v1041_v43 = vadd.f32 %v733_v34, %v515_v60  ;;  %v735_v44 = vpop.f32.mrb[15].mxu0  ;;  %v1045_v45 = vadd.f32 %v908_v41, %v566_v59  ;;  %v910_v46 = vpop.f32.mrb[15].mxu1 }
 0x126   : > { %v1052_v48 = vadd.f32 %v1048_v40, %v906_v39  ;;  %v1049_v49 = vadd.f32 %v735_v44, %v568_v61  ;;  %v1070_v61 = vsub.s32 2, %v1808_v63 }
 0x127   : > { %v1105_v51 = vmax.f32 %v1089_v2, 0.0  ;;  %v1093_v52 = vadd.f32 %v1067_v5, %v1041_v43 }
 0x128   : > { %v1053_v54 = vadd.f32 %v1049_v49, %v910_v46  ;;  %v1071_v0 = vrot.slane %v1814_v1, %v1070_v61 }
 0x129   : > { %v1337_v56 = vpack.c.bf16 %v1105_v51, %v1104_v50  ;;  %v1109_v57 = vmax.f32 %v1093_v52, 0.0 }
 0x12a   : > { %v1090_v5 = vadd.f32 %v1071_v0, %v1044_v38  ;;  %v1082_v8 = vadd.f32 %v1071_v0, %v1819_v10  ;;  %v1094_v12 = vadd.f32 %v1071_v0, %v1045_v45  ;;  %v1086_v16 = vadd.f32 %v1071_v0, %v1822_v19 }
 0x12b   : > { %1164 = vst [vmem:[%s1827_s25 + $0x20] sm:$0xff] %v1337_v56  ;;  %v1339_v59 = vpack.c.bf16 %v1109_v57, %v1108_v55 }
 0x12c   : > { %v1106_v1 = vmax.f32 %v1090_v5, 0.0  ;;  %v1098_v21 = vmax.f32 %v1082_v8, 0.0  ;;  %v1110_v23 = vmax.f32 %v1094_v12, 0.0  ;;  %v1102_v26 = vmax.f32 %v1086_v16, 0.0 }
 0x12d   : > { %v1174_v60 = vsel %vm1172_vm9, %v1339_v59, %v1173_v58 }
 0x12e   : > { %1175 = vst [vmem:[%s1827_s25 + $0x30] sm:$0x11] %v1174_v60 }
 0x13a   : > { %v1369_v4 = vpop.f32.mrb[16].mxu0 }
 0x13b   : > { %v1056_v6 = vadd.f32 %v1369_v4, %v1052_v48  ;;  %v1023_v7 = vpop.f32.mrb[17].mxu0 }
 0x13c   : > { %v1054_v9 = vadd.f32 %v1050_v22, %v1023_v7  ;;  %v1370_v11 = vpop.f32.mrb[18].mxu0 }
 0x13d   : > { %v1091_v13 = vadd.f32 %v1075_v3, %v1056_v6  ;;  %v1057_v14 = vadd.f32 %v1370_v11, %v1053_v54  ;;  %v1026_v15 = vpop.f32.mrb[19].mxu0 }
 0x13e   : > { %v1083_v63 = vadd.f32 %v1075_v3, %v1054_v9  ;;  %v1055_v17 = vadd.f32 %v1051_v27, %v1026_v15 }
 0x13f   : > { %v1107_v18 = vmax.f32 %v1091_v13, 0.0  ;;  %v1095_v20 = vadd.f32 %v1075_v3, %v1057_v14 }
 0x140   : > { %v1099_v10 = vmax.f32 %v1083_v63, 0.0  ;;  %v1087_v22 = vadd.f32 %v1075_v3, %v1055_v17 }
 0x141   : > { %v1338_v24 = vpack.c.bf16 %v1107_v18, %v1106_v1  ;;  %v1111_v25 = vmax.f32 %v1095_v20, 0.0 }
 0x142   : > { %v1334_v28 = vpack.c.bf16 %v1099_v10, %v1098_v21  ;;  %v1103_v30 = vmax.f32 %v1087_v22, 0.0 }
 0x143   : > { %1165 = vst [vmem:[%s1827_s25 + $0x28] sm:$0xff] %v1338_v24  ;;  %v1340_v19 = vpack.c.bf16 %v1111_v25, %v1110_v23 }
 0x144   : > { %1161 = vst [vmem:[%s1827_s25 + $0x8] sm:$0xff] %v1334_v28  ;;  %v1336_v27 = vpack.c.bf16 %v1103_v30, %v1102_v26 }
 0x145   : > { %v1177_v31 = vsel %vm1172_vm9, %v1340_v19, %v1176_v29 }
 0x146   : > { %1178 = vst [vmem:[%s1827_s25 + $0x38] sm:$0x11] %v1177_v31  ;;  %1163 = vst [vmem:[%s1827_s25 + $0x18] sm:$0xff] %v1336_v27 }
 0x147 PF: > { %s16_s21 = sadd.s32 1, %s1496_s21  }
 0x148   : > { %p13_p4 = scmp.ge.s32.totalorder %s16_s21, 4  }
 0x14a   :  { %15 = sbr.rel (!%p13_p4) target bundleno = 1 (0x1), region = 74 }

// kernel: _lambda_.11
= control target key start
LH: loop header
LB: loop body
LE: loop exit
PB: predicated region body
PF: predicated region fallthrough
CT: control target
= control target key end

     0   :  { %s1752_s21 = smov 0   ;;  %s2268_s0 = inlined_call_operand.vmem [shape: bf16[2,91,64], index: 0, kind: input, shape index: {}]   ;;  %s2269_s1 = inlined_call_operand.vmem [shape: bf16[64,512], index: 1, kind: input, shape index: {}]   ;;  %s2270_s2 = inlined_call_operand.vmem [shape: bf16[64,256], index: 2, kind: input, shape index: {}]   ;;  %s2271_s3 = inlined_call_operand.vmem [shape: bf16[64,256], index: 3, kind: input, shape index: {}]   ;;  %s2272_s4 = inlined_call_operand.vmem [shape: bf16[64,128], index: 4, kind: input, shape index: {}]   ;;  %s2273_s5 = inlined_call_operand.vmem [shape: f32[1,512], index: 5, kind: input, shape index: {}]   ;;  %s2274_s6 = inlined_call_operand.vmem [shape: f32[2,81,512], index: 6, kind: output, shape index: {}]  }
   0x1 LB: > { %s1416_s22 = sadd.s32 4294967295, %s1714_s21   ;;  %p1420_p0 = scmp.ge.s32.totalorder %s1714_s21, 1  ;;  %s1714_s21 = sphi %s1752_s21, %s16_s21  }
   0x2   : > { %p212_p1 = scmp.lt.s32.totalorder %s1714_s21, 3 }
   0x4   : > { %p213_p2 = pnand %p1420_p0, %p212_p1 }
   0x5   : > { %v1554_v0 = vld [vmem:[%s2269_s1 + $0x4] ss:$16 sps:$4 sm:$0xff] (!%p213_p2)   ;;  %p242_p3 = scmp.lt.s32.totalorder (!%p213_p2), %s1416_s22, 1  ;;  %v1556_v1 = vld [vmem:[%s2269_s1 + $0xc] ss:$16 sps:$4 sm:$0xff] (!%p213_p2)   ;;  %v1716_v2 = vmov (!%p213_p2), 0  }
   0x6   : > { %216 = sbr.rel (%p213_p2) target bundleno = 358 (0x166), region = 44  ;;  %443 = vmatprep.mubr.bf16.mxu0 (!%p213_p2), %v1716_v2  ;;  %534 = vmatprep.mubr.bf16.mxu1 (!%p213_p2), %v1716_v2  ;;  %v1558_v3 = vld [vmem:[%s2269_s1] ss:$16 sps:$4 sm:$0xff] (!%p213_p2)   ;;  %v1559_v4 = vld [vmem:[%s2269_s1 + $0x8] ss:$16 sps:$4 sm:$0xff] (!%p213_p2)   ;;  %vm392_vm0 = vcmask (!%p213_p2), 523264  }
   0x7   : > { %411 = vmatprep.subr.bf16.mxu0 (!%p213_p2), %v1554_v0  ;;  %502 = vmatprep.subr.bf16.mxu1 (!%p213_p2), %v1556_v1  ;;  %v1560_v5 = vld [vmem:[%s2269_s1 + $0x24] ss:$16 sps:$4 sm:$0xff] (!%p213_p2)   ;;  %v1562_v6 = vld [vmem:[%s2269_s1 + $0x2c] ss:$16 sps:$4 sm:$0xff] (!%p213_p2)   ;;  %v1564_v7 = vld [vmem:[%s2269_s1 + $0x20] ss:$16 sps:$4 sm:$0xff] (!%p213_p2)  }
   0x8   : > { %412 = vmatpush1.bf16.msra.mxu0 (!%p213_p2), %v1558_v3  ;;  %503 = vmatpush1.bf16.msra.mxu1 (!%p213_p2), %v1559_v4  ;;  %v1565_v8 = vld [vmem:[%s2269_s1 + $0x28] ss:$16 sps:$4 sm:$0xff] (!%p213_p2)   ;;  %v1566_v9 = vld [vmem:[%s2269_s1 + $0x44] ss:$16 sps:$4 sm:$0xff] (!%p213_p2)   ;;  %v1568_v10 = vld [vmem:[%s2269_s1 + $0x4c] ss:$16 sps:$4 sm:$0xff] (!%p213_p2)  }
   0x9   : > { %413 = vmatprep.subr.bf16.mxu0 (!%p213_p2), %v1560_v5  ;;  %504 = vmatprep.subr.bf16.mxu1 (!%p213_p2), %v1562_v6  ;;  %v1570_v11 = vld [vmem:[%s2269_s1 + $0x40] ss:$16 sps:$4 sm:$0xff] (!%p213_p2)   ;;  %v1571_v12 = vld [vmem:[%s2269_s1 + $0x48] ss:$16 sps:$4 sm:$0xff] (!%p213_p2)   ;;  %v1572_v13 = vld [vmem:[%s2269_s1 + $0x64] ss:$16 sps:$4 sm:$0xff] (!%p213_p2)  }
   0xa   : > { %v1574_v14 = vld [vmem:[%s2269_s1 + $0x6c] ss:$16 sps:$4 sm:$0xff] (!%p213_p2)   ;;  %v1576_v15 = vld [vmem:[%s2269_s1 + $0x60] ss:$16 sps:$4 sm:$0xff] (!%p213_p2)   ;;  %v1577_v16 = vld [vmem:[%s2269_s1 + $0x68] ss:$16 sps:$4 sm:$0xff] (!%p213_p2)  }
   0xb   : > { %v1582_v19 = vld [vmem:[%s2271_s3 + $0x4] ss:$8 sps:$4 sm:$0xff] (!%p213_p2)   ;;  %v1580_v22 = vld [vmem:[%s2271_s3] ss:$8 sps:$4 sm:$0xff] (!%p213_p2)   ;;  %v1589_v24 = vld [vmem:[%s2271_s3 + $0x14] ss:$8 sps:$4 sm:$0xff] (!%p213_p2)  }
   0xc   : > { %414 = vmatpush1.bf16.msra.mxu0 (!%p213_p2), %v1564_v7  ;;  %505 = vmatpush1.bf16.msra.mxu1 (!%p213_p2), %v1565_v8  ;;  %v1586_v20 = vld [vmem:[%s2270_s2 + $0x4] ss:$8 sps:$4 sm:$0xff] (!%p213_p2)   ;;  %v1584_v23 = vld [vmem:[%s2270_s2] ss:$8 sps:$4 sm:$0xff] (!%p213_p2)   ;;  %v1594_v25 = vld [vmem:[%s2270_s2 + $0x14] ss:$8 sps:$4 sm:$0xff] (!%p213_p2)  }
   0xd   : > { %s2276_s22 = smov (!%p242_p3, %s1416_s22), 1  ;;  %415 = vmatprep.subr.bf16.mxu0 %v1566_v9  ;;  %506 = vmatprep.subr.bf16.mxu1 %v1568_v10  ;;  %v1587_v28 = vld [vmem:[%s2271_s3 + $0x10] ss:$8 sps:$4 sm:$0xff]   ;;  %v1599_v30 = vld [vmem:[%s2271_s3 + $0x24] ss:$8 sps:$4 sm:$0xff]   ;;  %vm1018_vm2 = vcmask 1046528  }
   0xe   : > { %s1543_s15 = smul.u32 48, %s2276_s22  ;;  %v1592_v29 = vld [vmem:[%s2270_s2 + $0x10] ss:$8 sps:$4 sm:$0xff]   ;;  %v1605_v31 = vld [vmem:[%s2270_s2 + $0x24] ss:$8 sps:$4 sm:$0xff]  }
   0xf   : > { %v1597_v33 = vld [vmem:[%s2271_s3 + $0x20] ss:$8 sps:$4 sm:$0xff]   ;;  %v1608_v35 = vld [vmem:[%s2271_s3 + $0x34] ss:$8 sps:$4 sm:$0xff]   ;;  %v1606_v39 = vld [vmem:[%s2271_s3 + $0x30] ss:$8 sps:$4 sm:$0xff]  }
  0x10   : > { %s1810_s8 = scalar_lea.vmem %s2268_s0, %s1543_s15  ;;  %416 = vmatpush1.bf16.msra.mxu0 %v1570_v11  ;;  %507 = vmatpush1.bf16.msra.mxu1 %v1571_v12  ;;  %v1603_v34 = vld [vmem:[%s2270_s2 + $0x20] ss:$8 sps:$4 sm:$0xff]   ;;  %v1612_v36 = vld [vmem:[%s2270_s2 + $0x34] ss:$8 sps:$4 sm:$0xff]   ;;  %v1610_v40 = vld [vmem:[%s2270_s2 + $0x30] ss:$8 sps:$4 sm:$0xff]  }
  0x11   : > { %v253_v17 = vld [vmem:[%s1810_s8] sm:$0xf]  ;;  %v1820_v18 = vld [vmem:[%s1810_s8 + $0x4] sm:$0xf]  ;;  %417 = vmatprep.subr.bf16.mxu0 %v1572_v13  ;;  %508 = vmatprep.subr.bf16.mxu1 %v1574_v14  ;;  %v1844_v26 = vld [vmem:[%s1810_s8 + $0x8] sm:$0xf] }
  0x12   : > { %v1829_v21 = vcombine.low %v253_v17, %v1820_v18  ;;  %v256_v27 = vld [vmem:[%s1810_s8 + $0xc] sm:$0xf]  ;;  %v257_v37 = vld [vmem:[%s1810_s8 + $0x10] sm:$0xf]  ;;  %v258_v38 = vld [vmem:[%s1810_s8 + $0x14] sm:$0xf]  ;;  %v1471_v51 = vcombine.low %v1820_v18, %v1844_v26 }
  0x13   : > { %v1866_v32 = vcombine.low %v1844_v26, %v256_v27  ;;  %v1897_v41 = vld [vmem:[%s2272_s4] sm:$0xff]   ;;  %v1899_v42 = vcombine.low %v257_v37, %v258_v38  ;;  %v259_v44 = vld [vmem:[%s1810_s8 + $0x18] sm:$0xf]  ;;  %v260_v45 = vld [vmem:[%s1810_s8 + $0x1c] sm:$0xf]  ;;  %v1935_v54 = vcombine.low %v256_v27, %v257_v37  ;;  %s1544_s12 = smul.u32 352, %s2276_s22 }
  0x14   : > { %418 = vmatpush1.bf16.msra.mxu0 %v1576_v15  ;;  %509 = vmatpush1.bf16.msra.mxu1 %v1577_v16  ;;  %v1902_v43 = vld [vmem:[%s1810_s8 + $0x4] sm:$0xe]  ;;  %v1916_v47 = vcombine.low %v259_v44, %v260_v45  ;;  %v261_v48 = vld [vmem:[%s1810_s8 + $0x20] sm:$0xf]  ;;  %v604_v52 = vshll.u32 %v1829_v21, 16  ;;  %v812_v53 = vshll.u32 %v1471_v51, 16  ;;  %v1949_v0 = vcombine.low %v258_v38, %v259_v44 }
  0x15   : > { %913 = vmatprep.subr.bf16.mxu1 %v1582_v19  ;;  %700 = vmatprep.subr.bf16.mxu0 %v1586_v20  ;;  %v1491_v46 = vcombine.low %v1902_v43, %v1844_v26  ;;  %v262_v49 = vld [vmem:[%s1810_s8 + $0x24] sm:$0xf]  ;;  %v1940_v55 = vld [vmem:[%s1810_s8 + $0x28] ss:$0 sps:$4 sm:$0x11]   ;;  %v602_v56 = vshrl.u32 %v1829_v21, 16  ;;  %v1962_v11 = vcombine.low %v260_v45, %v261_v48  ;;  %s2070_s15 = scalar_lea.vmem %s2274_s6, %s1544_s12 }
  0x16   : > { %v1926_v50 = vcombine.low %v261_v48, %v262_v49  ;;  %v606_v57 = vrot.slane %v604_v52, 1  ;;  %v608_v58 = vshll.u32 %v1866_v32, 16  ;;  %v810_v59 = vshrl.u32 %v1471_v51, 16  ;;  %v1614_v10 = vld [vmem:[%s2272_s4 + $0x8] sm:$0xff]   ;;  %v1615_v16 = vld [vmem:[%s2272_s4 + $0x10] sm:$0xff]  }
  0x17   : > { %1445 = vmatmul.mubr.msk.bf16.vlgmr.msra.gmra.mrb[0].mxu0 %vm392_vm0, %v1829_v21  ;;  %1451 = vmatmul.mubr.msk.bf16.vlgmr.msra.gmra.mrb[0].mxu1 %vm392_vm0, %v1829_v21  ;;  %v814_v60 = vrot.slane %v812_v53, 1  ;;  %v817_v61 = vshll.u32 %v1935_v54, 16  ;;  %vm601_vm1 = vsmask.f32 7424  ;;  %v612_v5 = vshrl.u32 %v1866_v32, 16 }
  0x18   : > { %914 = vmatpush1.bf16.msra.mxu1 %v1580_v22  ;;  %453 = vmatprep.mubr.bf16.mxu0 %v1716_v2  ;;  %v607_v62 = vor.u32 %v606_v57, %v602_v56  ;;  %v610_v63 = vrot.slane %v608_v58, 1  ;;  %v615_v7 = vshll.u32 %v1899_v42, 16  ;;  %v821_v8 = vshrl.u32 %v1935_v54, 16  ;;  %v264_v19 = vld [vmem:[%s1810_s8 + $0x28] sm:$0xf] }
  0x19   : > { %544 = vmatprep.mubr.bf16.mxu1 %v1716_v2  ;;  %701 = vmatpush1.bf16.msra.mxu0 %v1584_v23  ;;  %v815_v1 = vor.u32 %v814_v60, %v810_v59  ;;  %v819_v3 = vrot.slane %v817_v61, 1  ;;  %v825_v9 = vshll.u32 %v1949_v0, 16  ;;  %v619_v17 = vshrl.u32 %v1899_v42, 16 }
  0x1a   : > { %915 = vmatprep.subr.bf16.mxu1 %v1589_v24  ;;  %702 = vmatprep.subr.bf16.mxu0 %v1594_v25  ;;  %v611_v4 = vsel %vm601_vm1, %v607_v62, %v610_v63  ;;  %v614_v12 = vor.u32 %v612_v5, %v610_v63  ;;  %v617_v13 = vrot.slane %v615_v7, 1  ;;  %v622_v18 = vshll.u32 %v1916_v47, 16  ;;  %v1617_v24 = vld [vmem:[%s2272_s4 + $0x18] sm:$0xff]  }
  0x1b   : > { %v820_v6 = vsel %vm601_vm1, %v815_v1, %v819_v3  ;;  %v823_v14 = vor.u32 %v821_v8, %v819_v3  ;;  %v827_v15 = vrot.slane %v825_v9, 1  ;;  %v829_v22 = vshrl.u32 %v1949_v0, 16 }
  0x1c   : > { %916 = vmatpush1.bf16.msra.mxu1 %v1587_v28  ;;  %v618_v20 = vsel %vm601_vm1, %v614_v12, %v617_v13  ;;  %v833_v23 = vshll.u32 %v1962_v11, 16  ;;  %v1983_v25 = vcombine.low %v262_v49, %v264_v19  ;;  %v621_v27 = vor.u32 %v619_v17, %v617_v13 }
  0x1d   : > { %703 = vmatpush1.bf16.msra.mxu0 %v1592_v29  ;;  %917 = vmatprep.subr.bf16.mxu1 %v1599_v30  ;;  %v828_v21 = vsel %vm601_vm1, %v823_v14, %v827_v15  ;;  %v624_v28 = vrot.slane %v622_v18, 1  ;;  %v831_v29 = vor.u32 %v829_v22, %v827_v15  ;;  %v636_v44 = vshll.u32 %v1940_v55, 16 }
  0x1e   : > { %704 = vmatprep.subr.bf16.mxu0 %v1605_v31  ;;  %v835_v30 = vrot.slane %v833_v23, 1  ;;  %v626_v31 = vshrl.u32 %v1916_v47, 16  ;;  %v845_v48 = vshrl.u32 %v1983_v25, 16  ;;  %v1019_v58 = vrot.slane %v1491_v46, 1 }
  0x1f   : > { %1446 = vmatmul.mubr.msk.bf16.gmra.mrb[4].mxu0 %vm392_vm0, %v1866_v32  ;;  %1452 = vmatmul.mubr.msk.bf16.gmra.mrb[4].mxu1 %vm392_vm0, %v1866_v32  ;;  %v629_v32 = vshll.u32 %v1926_v50, 16  ;;  %v638_v52 = vrot.slane %v636_v44, 1  ;;  %v1020_v59 = vrot.slane %v1935_v54, 1  ;;  %v1022_v60 = vrot.slane %v1949_v0, 1 }
  0x20   : > { %463 = vmatprep.mubr.bf16.mxu0 %v1716_v2  ;;  %554 = vmatprep.mubr.bf16.mxu1 %v1716_v2  ;;  %v628_v37 = vor.u32 %v626_v31, %v624_v28  ;;  %v1024_v61 = vrot.slane %v1962_v11, 1  ;;  %v640_v62 = vshrl.u32 %v1940_v55, 16 }
  0x21   : > { %918 = vmatpush1.bf16.msra.mxu1 %v1597_v33  ;;  %705 = vmatpush1.bf16.msra.mxu0 %v1603_v34  ;;  %v625_v33 = vsel %vm601_vm1, %v621_v27, %v624_v28  ;;  %v836_v34 = vsel %vm601_vm1, %v831_v29, %v835_v30  ;;  %v631_v38 = vrot.slane %v629_v32, 1  ;;  %v1021_v1 = vsel %vm1018_vm2, %v1019_v58, %v1020_v59 }
  0x22   : > { %919 = vmatprep.subr.bf16.mxu1 %v1608_v35  ;;  %706 = vmatprep.subr.bf16.mxu0 %v1612_v36  ;;  %v837_v35 = vshrl.u32 %v1962_v11, 16  ;;  %v841_v36 = vshll.u32 %v1983_v25, 16  ;;  %v1025_v3 = vsel %vm1018_vm2, %v1022_v60, %v1024_v61  ;;  %v1023_v43 = vsel %vm1018_vm2, %v1020_v59, %v1022_v60 }
  0x23   : > { %v632_v45 = vsel %vm601_vm1, %v628_v37, %v631_v38 }
  0x25   : > { %920 = vmatpush1.bf16.msra.mxu1 %v1606_v39  ;;  %707 = vmatpush1.bf16.msra.mxu0 %v1610_v40  ;;  %v839_v39 = vor.u32 %v837_v35, %v835_v30  ;;  %v843_v40 = vrot.slane %v841_v36, 1 }
  0x26   : > { %1535 = vmatprep.subr.bf16.mxu1 %v1897_v41  ;;  %1515 = vmatprep.subr.bf16.mxu0 %v1897_v41 }
  0x27   : > { %1447 = vmatmul.mubr.msk.bf16.gmra.mrb[8].mxu0 %vm392_vm0, %v1899_v42  ;;  %1453 = vmatmul.mubr.msk.bf16.gmra.mrb[8].mxu1 %vm392_vm0, %v1899_v42  ;;  %v633_v42 = vshrl.u32 %v1926_v50, 16 }
  0x28   : > { %473 = vmatprep.mubr.bf16.mxu0 %v1716_v2  ;;  %564 = vmatprep.mubr.bf16.mxu1 %v1716_v2 }
  0x29   : > { %v635_v51 = vor.u32 %v633_v42, %v631_v38 }
  0x2b   : > { %v639_v56 = vsel %vm601_vm1, %v635_v51, %v638_v52 }
  0x2f   : > { %1448 = vmatmul.mubr.msk.bf16.gmra.mrb[12].mxu0 %vm392_vm0, %v1916_v47  ;;  %1454 = vmatmul.mubr.msk.bf16.gmra.mrb[12].mxu1 %vm392_vm0, %v1916_v47  ;;  %v844_v47 = vsel %vm601_vm1, %v839_v39, %v843_v40 }
  0x30   : > { %483 = vmatprep.mubr.bf16.mxu0 %v1716_v2  ;;  %574 = vmatprep.mubr.bf16.mxu1 %v1716_v2 }
  0x37   : > { %1449 = vmatmul.mubr.msk.bf16.gmra.mrb[16].mxu0 %vm392_vm0, %v1926_v50  ;;  %1455 = vmatmul.mubr.msk.bf16.gmra.mrb[16].mxu1 %vm392_vm0, %v1926_v50  ;;  %v847_v50 = vor.u32 %v845_v48, %v843_v40 }
  0x38   : > { %493 = vmatprep.mubr.bf16.mxu0 %v1716_v2  ;;  %584 = vmatprep.mubr.bf16.mxu1 %v1716_v2 }
  0x3f   : > { %1450 = vmatmul.mubr.msk.bf16.gmra.mrb[20].mxu0 %vm392_vm0, %v1940_v55  ;;  %1456 = vmatmul.mubr.msk.bf16.gmra.mrb[20].mxu1 %vm392_vm0, %v1940_v55  ;;  %v1209_v55 = vlaneseq }
  0x40   : > { %732 = vmatprep.mubr.bf16.mxu0 %v1716_v2  ;;  %945 = vmatprep.mubr.bf16.mxu1 %v1716_v2 }
  0x41   : > { %v2032_v0 = vshrl.u32 %v1209_v55, 7 }
  0x43   : > { %v1211_v5 = vsub.s32 0, %v2032_v0 }
  0x47   : > { %1465 = vmatmul.mubr.msk.bf16.vlgmr.msra.gmra.mrb[24].mxu0 %vm392_vm0, %v611_v4  ;;  %1485 = vmatmul.mubr.msk.bf16.vlgmr.msra.gmra.mrb[24].mxu1 %vm392_vm0, %v820_v6  ;;  %v1619_v4 = vld [vmem:[%s1810_s8 + $0x2c] ss:$0 sps:$4 sm:$0x33]   ;;  %v2038_v6 = vld [vmem:[%s2273_s5] sm:$0xf] }
  0x48   : > { %1539 = vmatpush3.bf16.msra.mxu1 %v1897_v41  ;;  %742 = vmatprep.mubr.bf16.mxu0 %v1716_v2  ;;  %v1028_v26 = vrot.slane %v1619_v4, 1  ;;  %v2041_v7 = vrot.slane %v2038_v6, %v1211_v5 }
  0x49   : > { %955 = vmatprep.mubr.bf16.mxu1 %v1716_v2  ;;  %1516 = vmatpush3.bf16.msra.mxu0 %v1897_v41  ;;  %v1616_v41 = vld [vmem:[%s1810_s8 + $0x2c] ss:$0 sps:$4 sm:$0x11]  }
  0x4a   : > { %1536 = vmatprep.subr.bf16.mxu1 %v1614_v10  ;;  %1517 = vmatprep.subr.bf16.mxu0 %v1614_v10  ;;  %v849_v49 = vshll.u32 %v1616_v41, 16  ;;  %v853_v63 = vshrl.u32 %v1616_v41, 16 }
  0x4c   : > { %1540 = vmatpush3.bf16.msra.mxu1 %v1614_v10  ;;  %v851_v53 = vrot.slane %v849_v49, 1 }
  0x4d   : > { %1518 = vmatpush3.bf16.msra.mxu0 %v1614_v10  ;;  %1537 = vmatprep.subr.bf16.mxu1 %v1615_v16 }
  0x4e   : > { %1519 = vmatprep.subr.bf16.mxu0 %v1615_v16  ;;  %v852_v57 = vsel %vm601_vm1, %v847_v50, %v851_v53 }
  0x4f   : > { %1466 = vmatmul.mubr.msk.bf16.gmra.mrb[28].mxu0 %vm392_vm0, %v618_v20  ;;  %1486 = vmatmul.mubr.msk.bf16.gmra.mrb[28].mxu1 %vm392_vm0, %v828_v21 }
  0x50   : > { %752 = vmatprep.mubr.bf16.mxu0 %v1716_v2  ;;  %965 = vmatprep.mubr.bf16.mxu1 %v1716_v2 }
  0x51   : > { %1541 = vmatpush3.bf16.msra.mxu1 %v1615_v16  ;;  %1520 = vmatpush3.bf16.msra.mxu0 %v1615_v16 }
  0x52   : > { %1538 = vmatprep.subr.bf16.mxu1 %v1617_v24  ;;  %1521 = vmatprep.subr.bf16.mxu0 %v1617_v24 }
  0x55   : > { %1542 = vmatpush3.bf16.msra.mxu1 %v1617_v24  ;;  %1522 = vmatpush3.bf16.msra.mxu0 %v1617_v24 }
  0x57   : > { %1467 = vmatmul.mubr.msk.bf16.gmra.mrb[32].mxu0 %vm392_vm0, %v625_v33  ;;  %1487 = vmatmul.mubr.msk.bf16.gmra.mrb[32].mxu1 %vm392_vm0, %v836_v34 }
  0x58   : > { %762 = vmatprep.mubr.bf16.mxu0 %v1716_v2  ;;  %975 = vmatprep.mubr.bf16.mxu1 %v1716_v2 }
  0x5f   : > { %1468 = vmatmul.mubr.msk.bf16.gmra.mrb[36].mxu0 %vm392_vm0, %v632_v45  ;;  %1488 = vmatmul.mubr.msk.bf16.gmra.mrb[36].mxu1 %vm392_vm0, %v844_v47 }
  0x60   : > { %772 = vmatprep.mubr.bf16.mxu0 %v1716_v2  ;;  %985 = vmatprep.mubr.bf16.mxu1 %v1716_v2 }
  0x67   : > { %1469 = vmatmul.mubr.msk.bf16.gmra.mrb[40].mxu0 %vm392_vm0, %v639_v56  ;;  %1489 = vmatmul.mubr.msk.bf16.gmra.mrb[40].mxu1 %vm392_vm0, %v852_v57 }
  0x68   : > { %782 = vmatprep.mubr.bf16.mxu0 %v1716_v2  ;;  %995 = vmatprep.mubr.bf16.mxu1 %v1716_v2  ;;  %v1026_v2 = vrot.slane %v1983_v25, 1 }
  0x6a   : > { %v1027_v46 = vsel %vm1018_vm2, %v1024_v61, %v1026_v2  ;;  %v1029_v54 = vsel %vm1018_vm2, %v1026_v2, %v1028_v26 }
  0x6f   : > { %1470 = vmatmul.mubr.msk.bf16.gmra.mrb[44].mxu0 %vm392_vm0, %v640_v62  ;;  %1490 = vmatmul.mubr.msk.bf16.gmra.mrb[44].mxu1 %vm392_vm0, %v853_v63 }
  0x70   : > { %1523 = vmatprep.mubr.msk.bf16.mxu0 %vm392_vm0, %v1021_v1  ;;  %1527 = vmatprep.mubr.msk.bf16.mxu1 %vm392_vm0, %v1025_v3 }
  0x77   : > { %1524 = vmatmul.mubr.msk.bf16.vlgmr.msra.gmra.mrb[48].mxu0 %vm392_vm0, %v1023_v43  ;;  %1528 = vmatmul.mubr.msk.bf16.vlgmr.msra.gmra.mrb[48].mxu1 %vm392_vm0, %v1027_v46 }
  0x78   : > { %1531 = vmatprep.mubr.msk.bf16.mxu1 %vm392_vm0, %v1029_v54 }
  0x7f   : > { %1532 = vmatmul.mubr.msk.bf16.gmra.mrb[52].mxu1 %vm392_vm0, %v1028_v26 }
  0xea   : > { %v2043_v8 = vpop.f32.mrb[0].mxu1  ;;  %v445_v9 = vpop.f32.mrb[0].mxu0 }
  0xeb   : > { %v2045_v10 = vpop.f32.mrb[1].mxu1  ;;  %v1229_v11 = vadd.f32 %v2041_v7, %v445_v9  ;;  %v2048_v12 = vpop.f32.mrb[1].mxu0 }
  0xec   : > { %v2050_v13 = vpop.f32.mrb[2].mxu1  ;;  %v449_v14 = vpop.f32.mrb[2].mxu0 }
  0xed   : > { %v2052_v15 = vpop.f32.mrb[3].mxu1  ;;  %1620 = vtanh.f32 %v1229_v11  ;;  %v1233_v16 = vadd.f32 %v2041_v7, %v449_v14  ;;  %v2055_v17 = vpop.f32.mrb[3].mxu0 }
  0xef   : > { %1622 = vtanh.f32 %v1233_v16 }
  0xf2   : > { %v2058_v18 = vpop.f32.mrb[4].mxu1  ;;  %v455_v19 = vpop.f32.mrb[4].mxu0 }
  0xf3   : > { %v2060_v20 = vpop.f32.mrb[5].mxu1  ;;  %v1237_v21 = vadd.f32 %v2041_v7, %v455_v19  ;;  %v2063_v22 = vpop.f32.mrb[5].mxu0 }
  0xf4   : > { %v2065_v23 = vpop.f32.mrb[6].mxu1  ;;  %v459_v24 = vpop.f32.mrb[6].mxu0 }
  0xf5   : > { %v2072_v25 = vpop.f32.mrb[7].mxu1  ;;  %1624 = vtanh.f32 %v1237_v21  ;;  %v1241_v27 = vadd.f32 %v2041_v7, %v459_v24  ;;  %v2075_v28 = vpop.f32.mrb[7].mxu0  ;;  %v1215_v24 = vsub.s32 1, %v2032_v0 }
  0xf7   : > { %v1621_v29 = vpop.eup %1620  ;;  %1626 = vtanh.f32 %v1241_v27  ;;  %v1219_v27 = vsub.s32 2, %v2032_v0 }
  0xf8   : > { %1317 = vst [vmem:[%s2070_s15] sm:$0xff] %v1621_v29 }
  0xf9   : > { %v1623_v30 = vpop.eup %1622 }
  0xfa   : > { %1321 = vst [vmem:[%s2070_s15 + $0x20] sm:$0xff] %v1623_v30  ;;  %v2079_v31 = vpop.f32.mrb[8].mxu1  ;;  %v465_v32 = vpop.f32.mrb[8].mxu0 }
  0xfb   : > { %v2081_v33 = vpop.f32.mrb[9].mxu1  ;;  %v1245_v34 = vadd.f32 %v2041_v7, %v465_v32  ;;  %v2084_v35 = vpop.f32.mrb[9].mxu0  ;;  %v2138_v32 = vrot.slane %v2038_v6, %v1215_v24 }
  0xfc   : > { %v2086_v36 = vpop.f32.mrb[10].mxu1  ;;  %v469_v37 = vpop.f32.mrb[10].mxu0 }
  0xfd   : > { %v2088_v38 = vpop.f32.mrb[11].mxu1  ;;  %1628 = vtanh.f32 %v1245_v34  ;;  %v1249_v39 = vadd.f32 %v2041_v7, %v469_v37  ;;  %v2091_v40 = vpop.f32.mrb[11].mxu0  ;;  %v2141_v34 = vrot.slane %v2038_v6, %v1219_v27 }
  0xff   : > { %v1625_v41 = vpop.eup %1624  ;;  %1630 = vtanh.f32 %v1249_v39 }
 0x100   : > { %1325 = vst [vmem:[%s2070_s15 + $0x40] sm:$0xff] %v1625_v41 }
 0x101   : > { %v1627_v42 = vpop.eup %1626 }
 0x102   : > { %1329 = vst [vmem:[%s2070_s15 + $0x60] sm:$0xff] %v1627_v42  ;;  %v2095_v44 = vpop.f32.mrb[12].mxu1  ;;  %v475_v45 = vpop.f32.mrb[12].mxu0 }
 0x103   : > { %v2097_v47 = vpop.f32.mrb[13].mxu1  ;;  %v1253_v48 = vadd.f32 %v2041_v7, %v475_v45  ;;  %v2100_v49 = vpop.f32.mrb[13].mxu0 }
 0x104   : > { %v2102_v51 = vpop.f32.mrb[14].mxu1  ;;  %v479_v52 = vpop.f32.mrb[14].mxu0 }
 0x105   : > { %v2104_v50 = vpop.f32.mrb[15].mxu1  ;;  %1632 = vtanh.f32 %v1253_v48  ;;  %v1257_v53 = vadd.f32 %v2041_v7, %v479_v52  ;;  %v2107_v56 = vpop.f32.mrb[15].mxu0 }
 0x107   : > { %v1629_v57 = vpop.eup %1628  ;;  %1634 = vtanh.f32 %v1257_v53 }
 0x108   : > { %1333 = vst [vmem:[%s2070_s15 + $0x80] sm:$0xff] %v1629_v57 }
 0x109   : > { %v1631_v58 = vpop.eup %1630 }
 0x10a   : > { %1337 = vst [vmem:[%s2070_s15 + $0xa0] sm:$0xff] %v1631_v58  ;;  %v2111_v59 = vpop.f32.mrb[16].mxu1  ;;  %v485_v60 = vpop.f32.mrb[16].mxu0 }
 0x10b   : > { %v2113_v61 = vpop.f32.mrb[17].mxu1  ;;  %v1261_v62 = vadd.f32 %v2041_v7, %v485_v60  ;;  %v2116_v63 = vpop.f32.mrb[17].mxu0 }
 0x10c   : > { %v2118_v1 = vpop.f32.mrb[18].mxu1  ;;  %v489_v3 = vpop.f32.mrb[18].mxu0 }
 0x10d   : > { %v2120_v4 = vpop.f32.mrb[19].mxu1  ;;  %1636 = vtanh.f32 %v1261_v62  ;;  %v1265_v2 = vadd.f32 %v2041_v7, %v489_v3  ;;  %v2123_v26 = vpop.f32.mrb[19].mxu0 }
 0x10f   : > { %v1633_v43 = vpop.eup %1632  ;;  %1638 = vtanh.f32 %v1265_v2 }
 0x110   : > { %1341 = vst [vmem:[%s2070_s15 + $0xc0] sm:$0xff] %v1633_v43 }
 0x111   : > { %v1635_v46 = vpop.eup %1634 }
 0x112   : > { %1345 = vst [vmem:[%s2070_s15 + $0xe0] sm:$0xff] %v1635_v46  ;;  %v2127_v54 = vpop.f32.mrb[20].mxu1  ;;  %v495_v55 = vpop.f32.mrb[20].mxu0 }
 0x113   : > { %v2129_v5 = vpop.f32.mrb[21].mxu1  ;;  %v1269_v9 = vadd.f32 %v2041_v7, %v495_v55  ;;  %v2132_v11 = vpop.f32.mrb[21].mxu0 }
 0x114   : > { %v590_v14 = vpop.f32.mrb[22].mxu1  ;;  %v499_v16 = vpop.f32.mrb[22].mxu0 }
 0x115   : > { %v591_v19 = vpop.f32.mrb[23].mxu1  ;;  %1640 = vtanh.f32 %v1269_v9  ;;  %v500_v21 = vpop.f32.mrb[23].mxu0 }
 0x117   : > { %v1637_v29 = vpop.eup %1636 }
 0x118   : > { %1349 = vst [vmem:[%s2070_s15 + $0x100] sm:$0xff] %v1637_v29 }
 0x119   : > { %v1639_v30 = vpop.eup %1638 }
 0x11a   : > { %1353 = vst [vmem:[%s2070_s15 + $0x120] sm:$0xff] %v1639_v30  ;;  %v734_v7 = vpop.f32.mrb[24].mxu0  ;;  %v947_v37 = vpop.f32.mrb[24].mxu1 }
 0x11b   : > { %v1152_v39 = vadd.f32 %v734_v7, %v2048_v12  ;;  %v1163_v41 = vadd.f32 %v947_v37, %v2043_v8  ;;  %v736_v42 = vpop.f32.mrb[25].mxu0  ;;  %v949_v45 = vpop.f32.mrb[25].mxu1 }
 0x11c   : > { %v1174_v48 = vadd.f32 %v736_v42, %v2045_v10  ;;  %v738_v52 = vpop.f32.mrb[26].mxu0  ;;  %v951_v53 = vpop.f32.mrb[26].mxu1 }
 0x11d   : > { %v1230_v57 = vadd.f32 %v2138_v32, %v1152_v39  ;;  %v1231_v58 = vadd.f32 %v2141_v34, %v1163_v41  ;;  %v1153_v60 = vadd.f32 %v738_v52, %v2055_v17  ;;  %v1164_v62 = vadd.f32 %v951_v53, %v2050_v13  ;;  %v740_v3 = vpop.f32.mrb[27].mxu0  ;;  %v953_v2 = vpop.f32.mrb[27].mxu1 }
 0x11e   : > { %v2151_v12 = vadd.f32 %v1174_v48, %v949_v45  ;;  %v1175_v8 = vadd.f32 %v740_v3, %v2052_v15 }
 0x11f   : > { %v1641_v43 = vpop.eup %1640  ;;  %1642 = vtanh.f32 %v1230_v57  ;;  %v1234_v10 = vadd.f32 %v2138_v32, %v1153_v60  ;;  %v1235_v46 = vadd.f32 %v2141_v34, %v1164_v62 }
 0x120   : > { %1357 = vst [vmem:[%s2070_s15 + $0x140] sm:$0x1] %v1641_v43  ;;  %1644 = vtanh.f32 %v1231_v58  ;;  %v2157_v55 = vadd.f32 %v1175_v8, %v953_v2 }
 0x121   : > { %1646 = vtanh.f32 %v1234_v10 }
 0x122   : > { %1648 = vtanh.f32 %v1235_v46  ;;  %v744_v17 = vpop.f32.mrb[28].mxu0  ;;  %v957_v13 = vpop.f32.mrb[28].mxu1 }
 0x123   : > { %v1154_v9 = vadd.f32 %v744_v17, %v2063_v22  ;;  %v1165_v14 = vadd.f32 %v957_v13, %v2058_v18  ;;  %v746_v16 = vpop.f32.mrb[29].mxu0  ;;  %v959_v15 = vpop.f32.mrb[29].mxu1 }
 0x124   : > { %v1176_v19 = vadd.f32 %v746_v16, %v2060_v20  ;;  %v748_v21 = vpop.f32.mrb[30].mxu0  ;;  %v961_v24 = vpop.f32.mrb[30].mxu1 }
 0x125   : > { %v1238_v27 = vadd.f32 %v2138_v32, %v1154_v9  ;;  %v1239_v29 = vadd.f32 %v2141_v34, %v1165_v14  ;;  %v1155_v30 = vadd.f32 %v748_v21, %v2075_v28  ;;  %v1166_v7 = vadd.f32 %v961_v24, %v2065_v23  ;;  %v750_v37 = vpop.f32.mrb[31].mxu0  ;;  %v963_v39 = vpop.f32.mrb[31].mxu1 }
 0x126   : > { %v2166_v22 = vadd.f32 %v1176_v19, %v959_v15  ;;  %v1177_v18 = vadd.f32 %v750_v37, %v2072_v25 }
 0x127   : > { %1650 = vtanh.f32 %v1238_v27  ;;  %v1242_v20 = vadd.f32 %v2138_v32, %v1155_v30  ;;  %v1243_v41 = vadd.f32 %v2141_v34, %v1166_v7 }
 0x128   : > { %1652 = vtanh.f32 %v1239_v29  ;;  %v2171_v42 = vadd.f32 %v1177_v18, %v963_v39 }
 0x129   : > { %v1643_v45 = vpop.eup %1642  ;;  %1654 = vtanh.f32 %v1242_v20 }
 0x12a   : > { %v1645_v28 = vpop.eup %1644  ;;  %1318 = vst [vmem:[%s2070_s15 + $0x8] sm:$0xff] %v1643_v45  ;;  %1656 = vtanh.f32 %v1243_v41  ;;  %v754_v23 = vpop.f32.mrb[32].mxu0 }
 0x12b   : > { %v967_v48 = vpop.f32.mrb[32].mxu1  ;;  %v1647_v52 = vpop.eup %1646  ;;  %1319 = vst [vmem:[%s2070_s15 + $0x10] sm:$0xff] %v1645_v28  ;;  %v1156_v25 = vadd.f32 %v754_v23, %v2084_v35 }
 0x12c   : > { %v1167_v53 = vadd.f32 %v967_v48, %v2079_v31  ;;  %v756_v57 = vpop.f32.mrb[33].mxu0  ;;  %v969_v58 = vpop.f32.mrb[33].mxu1  ;;  %1322 = vst [vmem:[%s2070_s15 + $0x28] sm:$0xff] %v1647_v52 }
 0x12d   : > { %v1649_v60 = vpop.eup %1648  ;;  %v1178_v62 = vadd.f32 %v756_v57, %v2081_v33  ;;  %v758_v3 = vpop.f32.mrb[34].mxu0  ;;  %v1246_v8 = vadd.f32 %v2138_v32, %v1156_v25 }
 0x12e   : > { %v971_v2 = vpop.f32.mrb[34].mxu1  ;;  %1323 = vst [vmem:[%s2070_s15 + $0x30] sm:$0xff] %v1649_v60  ;;  %v1247_v43 = vadd.f32 %v2141_v34, %v1167_v53  ;;  %v1157_v10 = vadd.f32 %v758_v3, %v2091_v40  ;;  %v760_v46 = vpop.f32.mrb[35].mxu0 }
 0x12f   : > { %v1168_v35 = vadd.f32 %v971_v2, %v2086_v36  ;;  %v973_v31 = vpop.f32.mrb[35].mxu1  ;;  %v2184_v17 = vadd.f32 %v1178_v62, %v969_v58  ;;  %v1179_v13 = vadd.f32 %v760_v46, %v2088_v38  ;;  %1658 = vtanh.f32 %v1246_v8 }
 0x130   : > { %v1250_v33 = vadd.f32 %v2138_v32, %v1157_v10  ;;  %1660 = vtanh.f32 %v1247_v43 }
 0x131   : > { %v1251_v9 = vadd.f32 %v2141_v34, %v1168_v35  ;;  %v2189_v14 = vadd.f32 %v1179_v13, %v973_v31  ;;  %v1651_v16 = vpop.eup %1650 }
 0x132   : > { %1662 = vtanh.f32 %v1250_v33  ;;  %v1653_v40 = vpop.eup %1652  ;;  %1326 = vst [vmem:[%s2070_s15 + $0x48] sm:$0xff] %v1651_v16  ;;  %v764_v36 = vpop.f32.mrb[36].mxu0 }
 0x133   : > { %1664 = vtanh.f32 %v1251_v9  ;;  %v977_v15 = vpop.f32.mrb[36].mxu1  ;;  %v1655_v19 = vpop.eup %1654  ;;  %1327 = vst [vmem:[%s2070_s15 + $0x50] sm:$0xff] %v1653_v40  ;;  %v1158_v38 = vadd.f32 %v764_v36, %v2100_v49 }
 0x134   : > { %v1169_v21 = vadd.f32 %v977_v15, %v2095_v44  ;;  %v766_v24 = vpop.f32.mrb[37].mxu0  ;;  %v979_v27 = vpop.f32.mrb[37].mxu1  ;;  %1330 = vst [vmem:[%s2070_s15 + $0x68] sm:$0xff] %v1655_v19 }
 0x135   : > { %v1657_v29 = vpop.eup %1656  ;;  %v1180_v30 = vadd.f32 %v766_v24, %v2097_v47  ;;  %v768_v7 = vpop.f32.mrb[38].mxu0  ;;  %v1254_v39 = vadd.f32 %v2138_v32, %v1158_v38 }
 0x136   : > { %v981_v37 = vpop.f32.mrb[38].mxu1  ;;  %1331 = vst [vmem:[%s2070_s15 + $0x70] sm:$0xff] %v1657_v29  ;;  %v1255_v18 = vadd.f32 %v2141_v34, %v1169_v21  ;;  %v1159_v20 = vadd.f32 %v768_v7, %v2107_v56  ;;  %v770_v41 = vpop.f32.mrb[39].mxu0 }
 0x137   : > { %v1170_v49 = vadd.f32 %v981_v37, %v2102_v51  ;;  %v983_v44 = vpop.f32.mrb[39].mxu1  ;;  %v2202_v45 = vadd.f32 %v1180_v30, %v979_v27  ;;  %v1181_v28 = vadd.f32 %v770_v41, %v2104_v50  ;;  %1666 = vtanh.f32 %v1254_v39 }
 0x138   : > { %v1258_v47 = vadd.f32 %v2138_v32, %v1159_v20  ;;  %1668 = vtanh.f32 %v1255_v18 }
 0x139   : > { %v1259_v23 = vadd.f32 %v2141_v34, %v1170_v49  ;;  %v2207_v48 = vadd.f32 %v1181_v28, %v983_v44  ;;  %v1659_v52 = vpop.eup %1658 }
 0x13a   : > { %1670 = vtanh.f32 %v1258_v47  ;;  %v1661_v56 = vpop.eup %1660  ;;  %1334 = vst [vmem:[%s2070_s15 + $0x88] sm:$0xff] %v1659_v52  ;;  %v774_v51 = vpop.f32.mrb[40].mxu0 }
 0x13b   : > { %1672 = vtanh.f32 %v1259_v23  ;;  %v987_v25 = vpop.f32.mrb[40].mxu1  ;;  %1335 = vst [vmem:[%s2070_s15 + $0x90] sm:$0xff] %v1661_v56  ;;  %v1160_v50 = vadd.f32 %v774_v51, %v2116_v63  ;;  %v776_v58 = vpop.f32.mrb[41].mxu0 }
 0x13c   : > { %v1663_v53 = vpop.eup %1662  ;;  %v1171_v57 = vadd.f32 %v987_v25, %v2111_v59  ;;  %v989_v60 = vpop.f32.mrb[41].mxu1  ;;  %v1182_v3 = vadd.f32 %v776_v58, %v2113_v61 }
 0x13d   : > { %v1665_v62 = vpop.eup %1664  ;;  %1338 = vst [vmem:[%s2070_s15 + $0xa8] sm:$0xff] %v1663_v53  ;;  %v778_v2 = vpop.f32.mrb[42].mxu0  ;;  %v1262_v43 = vadd.f32 %v2138_v32, %v1160_v50 }
 0x13e   : > { %v991_v8 = vpop.f32.mrb[42].mxu1  ;;  %1339 = vst [vmem:[%s2070_s15 + $0xb0] sm:$0xff] %v1665_v62  ;;  %v1263_v10 = vadd.f32 %v2141_v34, %v1171_v57  ;;  %v1161_v35 = vadd.f32 %v778_v2, %v2123_v26  ;;  %v780_v46 = vpop.f32.mrb[43].mxu0  ;;  %v2220_v31 = vadd.f32 %v1182_v3, %v989_v60 }
 0x13f   : > { %v1172_v63 = vadd.f32 %v991_v8, %v2118_v1  ;;  %v993_v59 = vpop.f32.mrb[43].mxu1  ;;  %v1183_v13 = vadd.f32 %v780_v46, %v2120_v4  ;;  %1674 = vtanh.f32 %v1262_v43 }
 0x140   : > { %v1266_v61 = vadd.f32 %v2138_v32, %v1161_v35  ;;  %1676 = vtanh.f32 %v1263_v10 }
 0x141   : > { %v1267_v33 = vadd.f32 %v2141_v34, %v1172_v63  ;;  %v2225_v9 = vadd.f32 %v1183_v13, %v993_v59  ;;  %v1667_v16 = vpop.eup %1666 }
 0x142   : > { %1678 = vtanh.f32 %v1266_v61  ;;  %v1669_v26 = vpop.eup %1668  ;;  %1342 = vst [vmem:[%s2070_s15 + $0xc8] sm:$0xff] %v1667_v16  ;;  %v784_v1 = vpop.f32.mrb[44].mxu0 }
 0x143   : > { %1680 = vtanh.f32 %v1267_v33  ;;  %v997_v40 = vpop.f32.mrb[44].mxu1  ;;  %1343 = vst [vmem:[%s2070_s15 + $0xd0] sm:$0xff] %v1669_v26  ;;  %v1162_v4 = vadd.f32 %v784_v1, %v2132_v11  ;;  %v786_v19 = vpop.f32.mrb[45].mxu0  ;;  %v1223_v11 = vsub.s32 3, %v2032_v0 }
 0x144   : > { %v1671_v36 = vpop.eup %1670  ;;  %v1173_v15 = vadd.f32 %v997_v40, %v2127_v54  ;;  %v999_v38 = vpop.f32.mrb[45].mxu1  ;;  %v1184_v24 = vadd.f32 %v786_v19, %v2129_v5 }
 0x145   : > { %v1673_v21 = vpop.eup %1672  ;;  %1346 = vst [vmem:[%s2070_s15 + $0xe8] sm:$0xff] %v1671_v36  ;;  %v1001_v27 = vpop.f32.mrb[46].mxu1  ;;  %v1270_v30 = vadd.f32 %v2138_v32, %v1162_v4  ;;  %v1224_v20 = vrot.slane %v2038_v6, %v1223_v11 }
 0x146   : > { %v788_v29 = vpop.f32.mrb[46].mxu0  ;;  %1347 = vst [vmem:[%s2070_s15 + $0xf0] sm:$0xff] %v1673_v21  ;;  %v1271_v7 = vadd.f32 %v2141_v34, %v1173_v15  ;;  %v1002_v37 = vpop.f32.mrb[47].mxu1  ;;  %v1195_v54 = vadd.f32 %v1184_v24, %v999_v38 }
 0x147   : > { %v789_v39 = vpop.f32.mrb[47].mxu0  ;;  %1682 = vtanh.f32 %v1270_v30 }
 0x148   : > { %1684 = vtanh.f32 %v1271_v7 }
 0x149   : > { %v1675_v18 = vpop.eup %1674 }
 0x14a   : > { %v1677_v5 = vpop.eup %1676  ;;  %1350 = vst [vmem:[%s2070_s15 + $0x108] sm:$0xff] %v1675_v18  ;;  %v1525_v49 = vpop.f32.mrb[48].mxu0 }
 0x14b   : > { %v1529_v41 = vpop.f32.mrb[48].mxu1  ;;  %1351 = vst [vmem:[%s2070_s15 + $0x110] sm:$0xff] %v1677_v5  ;;  %v1198_v32 = vadd.f32 %v1525_v49, %v2166_v22  ;;  %v1106_v28 = vpop.f32.mrb[49].mxu0 }
 0x14c   : > { %v1679_v44 = vpop.eup %1678  ;;  %v1202_v34 = vadd.f32 %v1529_v41, %v2202_v45  ;;  %v1122_v0 = vpop.f32.mrb[49].mxu1  ;;  %v1196_v23 = vadd.f32 %v2151_v12, %v1106_v28 }
 0x14d   : > { %v1681_v47 = vpop.eup %1680  ;;  %1354 = vst [vmem:[%s2070_s15 + $0x128] sm:$0xff] %v1679_v44  ;;  %v1200_v52 = vadd.f32 %v2184_v17, %v1122_v0  ;;  %v1526_v6 = vpop.f32.mrb[50].mxu0  ;;  %v1240_v51 = vadd.f32 %v1224_v20, %v1198_v32 }
 0x14e   : > { %v1530_v56 = vpop.f32.mrb[50].mxu1  ;;  %1355 = vst [vmem:[%s2070_s15 + $0x130] sm:$0xff] %v1681_v47  ;;  %v1256_v25 = vadd.f32 %v1224_v20, %v1202_v34  ;;  %v1199_v53 = vadd.f32 %v1526_v6, %v2171_v42  ;;  %v1109_v50 = vpop.f32.mrb[51].mxu0  ;;  %v1232_v57 = vadd.f32 %v1224_v20, %v1196_v23 }
 0x14f   : > { %v1203_v22 = vadd.f32 %v1530_v56, %v2207_v48  ;;  %v1125_v45 = vpop.f32.mrb[51].mxu1  ;;  %v1248_v58 = vadd.f32 %v1224_v20, %v1200_v52  ;;  %v1197_v60 = vadd.f32 %v2157_v55, %v1109_v50  ;;  %1686 = vtanh.f32 %v1240_v51 }
 0x150   : > { %v1201_v12 = vadd.f32 %v2189_v14, %v1125_v45  ;;  %v1244_v17 = vadd.f32 %v1224_v20, %v1199_v53  ;;  %1688 = vtanh.f32 %v1256_v25 }
 0x151   : > { %v1260_v62 = vadd.f32 %v1224_v20, %v1203_v22  ;;  %v1683_v3 = vpop.eup %1682  ;;  %1690 = vtanh.f32 %v1232_v57  ;;  %v1236_v2 = vadd.f32 %v1224_v20, %v1197_v60 }
 0x152   : > { %v1685_v42 = vpop.eup %1684  ;;  %1358 = vst [vmem:[%s2070_s15 + $0x148] sm:$0x1] %v1683_v3  ;;  %1692 = vtanh.f32 %v1248_v58  ;;  %v1252_v48 = vadd.f32 %v1224_v20, %v1201_v12  ;;  %v1533_v8 = vpop.f32.mrb[52].mxu1 }
 0x153   : > { %1359 = vst [vmem:[%s2070_s15 + $0x150] sm:$0x1] %v1685_v42  ;;  %1694 = vtanh.f32 %v1244_v17  ;;  %v1206_v43 = vadd.f32 %v1533_v8, %v1195_v54  ;;  %v1138_v10 = vpop.f32.mrb[53].mxu1 }
 0x154   : > { %1696 = vtanh.f32 %v1260_v62  ;;  %v1204_v55 = vadd.f32 %v2220_v31, %v1138_v10  ;;  %v1534_v14 = vpop.f32.mrb[54].mxu1 }
 0x155   : > { %1698 = vtanh.f32 %v1236_v2  ;;  %v1272_v35 = vadd.f32 %v1224_v20, %v1206_v43  ;;  %v1141_v63 = vpop.f32.mrb[55].mxu1 }
 0x156   : > { %1700 = vtanh.f32 %v1252_v48  ;;  %v1264_v46 = vadd.f32 %v1224_v20, %v1204_v55  ;;  %v1205_v59 = vadd.f32 %v2225_v9, %v1141_v63 }
 0x157   : > { %1702 = vtanh.f32 %v1272_v35 }
 0x158   : > { %1704 = vtanh.f32 %v1264_v46  ;;  %v1268_v13 = vadd.f32 %v1224_v20, %v1205_v59 }
 0x159   : > { %v1687_v61 = vpop.eup %1686 }
 0x15a   : > { %v1689_v33 = vpop.eup %1688  ;;  %1328 = vst [vmem:[%s2070_s15 + $0x58] sm:$0xff] %v1687_v61  ;;  %1706 = vtanh.f32 %v1268_v13 }
 0x15b   : > { %v1691_v31 = vpop.eup %1690  ;;  %1344 = vst [vmem:[%s2070_s15 + $0xd8] sm:$0xff] %v1689_v33 }
 0x15c   : > { %v1693_v16 = vpop.eup %1692  ;;  %1320 = vst [vmem:[%s2070_s15 + $0x18] sm:$0xff] %v1691_v31 }
 0x15d   : > { %v1695_v26 = vpop.eup %1694  ;;  %1336 = vst [vmem:[%s2070_s15 + $0x98] sm:$0xff] %v1693_v16 }
 0x15e   : > { %v1697_v9 = vpop.eup %1696  ;;  %1332 = vst [vmem:[%s2070_s15 + $0x78] sm:$0xff] %v1695_v26 }
 0x15f   : > { %v1699_v1 = vpop.eup %1698  ;;  %1348 = vst [vmem:[%s2070_s15 + $0xf8] sm:$0xff] %v1697_v9 }
 0x160   : > { %v1701_v40 = vpop.eup %1700  ;;  %1324 = vst [vmem:[%s2070_s15 + $0x38] sm:$0xff] %v1699_v1 }
 0x161   : > { %v1703_v36 = vpop.eup %1702  ;;  %1340 = vst [vmem:[%s2070_s15 + $0xb8] sm:$0xff] %v1701_v40 }
 0x162   : > { %v1705_v4 = vpop.eup %1704  ;;  %1360 = vst [vmem:[%s2070_s15 + $0x158] sm:$0x1] %v1703_v36 }
 0x163   : > { %1352 = vst [vmem:[%s2070_s15 + $0x118] sm:$0xff] %v1705_v4 }
 0x164   : > { %v1707_v15 = vpop.eup %1706 }
 0x165   : > { %1356 = vst [vmem:[%s2070_s15 + $0x138] sm:$0xff] %v1707_v15 }
 0x166 PF: > { %s16_s21 = sadd.s32 1, %s1714_s21  }
 0x167   : > { %p13_p4 = scmp.ge.s32.totalorder %s16_s21, 4  }
 0x169   :  { %15 = sbr.rel (!%p13_p4) target bundleno = 1 (0x1), region = 74 }

</bundles_post_ra>
